<compile_context>
chip_gen: v7x
topology: tpu7x:2x2x1
jax: 0.10.0
libtpu: 0.0.40
codegen_flags: <defaults>
</compile_context>

<pallas_src>
import functools

import jax
import jax.numpy as jnp
from jax.experimental import pallas as pl
from jax.experimental.pallas import tpu as pltpu

HALO = 32  # zero halo on each side of the time axis (>= max dilation 27, multiple of 8)
HC3_DILATIONS = (1, 3, 9, 27,   # HcTwice1
                 1, 3, 9, 27,   # HcTwice2
                 1, 1)          # Hc3


def _fused_text_enc_kernel(
    # scalar prefetch
    dil_ref,                      # SMEM (10,) int32 : dilation per k=3 highway layer
    # inputs
    emb_ref,                      # (B*T, E) gathered embeddings
    cv1_w_ref, cv1_b_ref,         # (E, C), (1, C)
    cv2_w_ref, cv2_b_ref,         # (C, C), (1, C)
    hc3_w_ref, hc3_b_ref,         # (1, 3, C, 2C), (1, 1, 2C)  -- streamed per layer
    hc1_w_ref, hc1_b_ref,         # (2, C, 2C), (2, 1, 2C)
    # outputs
    k_ref, v_ref,                 # (B, D, T) each
    # scratch
    xp_ref,                       # VMEM (B, T + 2*HALO, C) f32 padded resident activation
    *, B, T, C, D):
  l = pl.program_id(0)

  # ---- prolog (first grid step): zero halos, then embed -> cv1(ReLU) -> cv2 ----
  @pl.when(l == 0)
  def _prolog():
    xp_ref[...] = jnp.zeros_like(xp_ref)
    h = jnp.dot(emb_ref[...], cv1_w_ref[...],
                preferred_element_type=jnp.float32) + cv1_b_ref[...]
    h = jnp.maximum(h, 0.0)
    h = jnp.dot(h, cv2_w_ref[...],
                preferred_element_type=jnp.float32) + cv2_b_ref[...]
    xp_ref[:, HALO:HALO + T, :] = h.reshape(B, T, C)

  # ---- highway conv layer `l` (kernel=3, SAME, dilation dil_ref[l]) ----
  dil = dil_ref[l]
  x = xp_ref[:, HALO:HALO + T, :].reshape(B * T, C)           # current activation
  acc = None
  for tap in range(3):
    if tap == 1:
      xs = x                                                   # centre tap is x itself
    else:
      start = HALO + (tap - 1) * dil
      xs = xp_ref[:, pl.ds(start, T), :].reshape(B * T, C)     # shifted tap (zeros in halo)
    contrib = jnp.dot(xs, hc3_w_ref[0, tap], preferred_element_type=jnp.float32)
    acc = contrib if acc is None else acc + contrib
  s = acc + hc3_b_ref[0]                                       # bias added once
  g = jax.nn.sigmoid(s[:, :C])
  y = g * s[:, C:] + (1.0 - g) * x
  xp_ref[:, HALO:HALO + T, :] = y.reshape(B, T, C)

  # ---- epilog (last grid step): two k=1 highway convs, chunk + transpose ----
  @pl.when(l == pl.num_programs(0) - 1)
  def _epilog():
    xx = xp_ref[:, HALO:HALO + T, :].reshape(B * T, C)
    for j in range(2):
      sj = jnp.dot(xx, hc1_w_ref[j], preferred_element_type=jnp.float32) + hc1_b_ref[j]
      gj = jax.nn.sigmoid(sj[:, :C])
      xx = gj * sj[:, C:] + (1.0 - gj) * xx
    out = xx.reshape(B, T, C)
    for b in range(B):                     # fold chunk + (B,T,2d)->(B,d,T) into writeback
      out_t = out[b].T                     # (C, T)
      k_ref[b] = out_t[:D, :]
      v_ref[b] = out_t[D:, :]


def text_enc_forward(params, input_ids, *, d_size):
  """Fused TextEnc forward pass. Returns (K, V), each of shape (B, d_size, T)."""
  B, T = input_ids.shape
  E = params["emb"].shape[1]
  C = 2 * d_size
  n_hc3 = params["hc3_w"].shape[0]
  assert max(HC3_DILATIONS) <= HALO and T % 8 == 0 and C % 128 == 0

  # Embedding lookup as a gather (no one-hot, no MXU waste, no (B*T, vocab) HBM array).
  x_emb = jnp.take(params["emb"], input_ids.reshape(-1), axis=0)   # (B*T, E)
  dils = jnp.asarray(HC3_DILATIONS, dtype=jnp.int32)

  kernel = functools.partial(_fused_text_enc_kernel, B=B, T=T, C=C, D=d_size)

  grid_spec = pltpu.PrefetchScalarGridSpec(
      num_scalar_prefetch=1,
      grid=(n_hc3,),                                   # one step per k=3 highway layer
      in_specs=[
          pl.BlockSpec((B * T, E), lambda l, d: (0, 0)),
          pl.BlockSpec((E, C), lambda l, d: (0, 0)),
          pl.BlockSpec((1, C), lambda l, d: (0, 0)),
          pl.BlockSpec((C, C), lambda l, d: (0, 0)),
          pl.BlockSpec((1, C), lambda l, d: (0, 0)),
          pl.BlockSpec((1, 3, C, 2 * C), lambda l, d: (l, 0, 0, 0)),   # streamed weights
          pl.BlockSpec((1, 1, 2 * C), lambda l, d: (l, 0, 0)),         # streamed bias
          pl.BlockSpec((2, C, 2 * C), lambda l, d: (0, 0, 0)),
          pl.BlockSpec((2, 1, 2 * C), lambda l, d: (0, 0, 0)),
      ],
      out_specs=[
          pl.BlockSpec((B, d_size, T), lambda l, d: (0, 0, 0)),
          pl.BlockSpec((B, d_size, T), lambda l, d: (0, 0, 0)),
      ],
      scratch_shapes=[pltpu.VMEM((B, T + 2 * HALO, C), jnp.float32)],
  )

  K, V = pl.pallas_call(
      kernel,
      grid_spec=grid_spec,
      out_shape=(jax.ShapeDtypeStruct((B, d_size, T), jnp.float32),
                 jax.ShapeDtypeStruct((B, d_size, T), jnp.float32)),
      compiler_params=pltpu.CompilerParams(
          dimension_semantics=("arbitrary",)),          # layers are sequential
  )(dils, x_emb,
    params["cv1_w"], params["cv1_b"], params["cv2_w"], params["cv2_b"],
    params["hc3_w"], params["hc3_b"], params["hc1_w"], params["hc1_b"])
  return K, V


# ----------------------------------------------------------------------------
# Parameters (synthetic, deterministic) and a pure-JAX reference for checking.
# ----------------------------------------------------------------------------
def init_params(key, vocab_size, emb_size, d_size):
  C = 2 * d_size
  ks = jax.random.split(key, 9)
  w, b = 0.1, 0.05
  L = len(HC3_DILATIONS)
  return {
      "emb":   w * jax.random.normal(ks[0], (vocab_size, emb_size), jnp.float32),
      "cv1_w": w * jax.random.normal(ks[1], (emb_size, C), jnp.float32),
      "cv1_b": b * jax.random.normal(ks[2], (1, C), jnp.float32),
      "cv2_w": w * jax.random.normal(ks[3], (C, C), jnp.float32),
      "cv2_b": b * jax.random.normal(ks[4], (1, C), jnp.float32),
      "hc3_w": w * jax.random.normal(ks[5], (L, 3, C, 2 * C), jnp.float32),
      "hc3_b": b * jax.random.normal(ks[6], (L, 1, 2 * C), jnp.float32),
      "hc1_w": w * jax.random.normal(ks[7], (2, C, 2 * C), jnp.float32),
      "hc1_b": b * jax.random.normal(ks[8], (2, 1, 2 * C), jnp.float32),
  }


def text_enc_reference(params, input_ids, *, d_size):
  B, T = input_ids.shape
  C = 2 * d_size
  hp = jax.lax.Precision.HIGHEST
  x = jnp.take(params["emb"], input_ids.reshape(-1), axis=0)
  x = jnp.maximum(jnp.dot(x, params["cv1_w"], precision=hp) + params["cv1_b"], 0.0)
  x = (jnp.dot(x, params["cv2_w"], precision=hp) + params["cv2_b"]).reshape(B, T, C)
  for i, dil in enumerate(HC3_DILATIONS):
    xp = jnp.pad(x, ((0, 0), (dil, dil), (0, 0)))
    s = params["hc3_b"][i]
    for tap in range(3):
      s = s + jnp.dot(xp[:, tap * dil:tap * dil + T, :], params["hc3_w"][i, tap],
                      precision=hp)
    g = jax.nn.sigmoid(s[..., :C])
    x = g * s[..., C:] + (1.0 - g) * x
  for j in range(2):
    s = jnp.dot(x, params["hc1_w"][j], precision=hp) + params["hc1_b"][j]
    g = jax.nn.sigmoid(s[..., :C])
    x = g * s[..., C:] + (1.0 - g) * x
  K = jnp.transpose(x[..., :d_size], (0, 2, 1))
  V = jnp.transpose(x[..., d_size:], (0, 2, 1))
  return K, V


if __name__ == "__main__":
  # d=64 -> C=2d=128, 2C=256: keeps every matmul/store lane-dense (multiple of 128).
  VOCAB, EMB, D = 32, 128, 64
  B, T = 2, 128

  key = jax.random.PRNGKey(0)
  k_ids, k_params = jax.random.split(key)
  input_ids = jax.random.randint(k_ids, (B, T), 0, VOCAB, dtype=jnp.int32)
  params = init_params(k_params, VOCAB, EMB, D)

  fwd = jax.jit(functools.partial(text_enc_forward, d_size=D))
  K, V = fwd(params, input_ids)
  K = jax.block_until_ready(K)
  V = jax.block_until_ready(V)

  assert K.shape == (B, D, T) and V.shape == (B, D, T)
  assert K.dtype == jnp.float32 and V.dtype == jnp.float32
  assert bool(jnp.isfinite(K).all()) and bool(jnp.isfinite(V).all())

  # Numerical check against a pure-JAX reference of the same network.
  K_ref, V_ref = jax.jit(functools.partial(text_enc_reference, d_size=D))(params, input_ids)
  err = max(float(jnp.max(jnp.abs(K - K_ref))), float(jnp.max(jnp.abs(V - V_ref))))
  assert err < 2e-3, f"mismatch vs reference: max abs err {err}"

  print("KERNEL_OK")
</pallas_src>

<mosaic_0001>
module attributes {stable_mosaic.version = 11 : i64} {
  func.func @_fused_text_enc_kernel(%arg0: i32, %arg1: memref<10xi32, #tpu.memory_space<smem>>, %arg2: memref<256x128xf32, #tpu.memory_space<vmem>>, %arg3: memref<128x128xf32, #tpu.memory_space<vmem>>, %arg4: memref<1x128xf32, #tpu.memory_space<vmem>>, %arg5: memref<128x128xf32, #tpu.memory_space<vmem>>, %arg6: memref<1x128xf32, #tpu.memory_space<vmem>>, %arg7: memref<1x3x128x256xf32, #tpu.memory_space<vmem>>, %arg8: memref<1x1x256xf32, #tpu.memory_space<vmem>>, %arg9: memref<2x128x256xf32, #tpu.memory_space<vmem>>, %arg10: memref<2x1x256xf32, #tpu.memory_space<vmem>>, %arg11: memref<2x64x128xf32, #tpu.memory_space<vmem>>, %arg12: memref<2x64x128xf32, #tpu.memory_space<vmem>>, %arg13: memref<2x192x128xf32, #tpu.memory_space<vmem>>) attributes {dimension_semantics = [#tpu.dimension_semantics<arbitrary>], iteration_bounds = array<i64: 10>, scalar_prefetch = 1 : i64, scratch_operands = 1 : i64, tpu.core_type = #tpu.core_type<tc>, window_params = [{pipeline_mode = #tpu.pipeline_mode<synchronous>, transform_indices = @transform_0, window_bounds = array<i64: 256, 128>}, {pipeline_mode = #tpu.pipeline_mode<synchronous>, transform_indices = @transform_1, window_bounds = array<i64: 128, 128>}, {pipeline_mode = #tpu.pipeline_mode<synchronous>, transform_indices = @transform_2, window_bounds = array<i64: 1, 128>}, {pipeline_mode = #tpu.pipeline_mode<synchronous>, transform_indices = @transform_3, window_bounds = array<i64: 128, 128>}, {pipeline_mode = #tpu.pipeline_mode<synchronous>, transform_indices = @transform_4, window_bounds = array<i64: 1, 128>}, {transform_indices = @transform_5, window_bounds = array<i64: 1, 3, 128, 256>}, {transform_indices = @transform_6, window_bounds = array<i64: 1, 1, 256>}, {pipeline_mode = #tpu.pipeline_mode<synchronous>, transform_indices = @transform_7, window_bounds = array<i64: 2, 128, 256>}, {pipeline_mode = #tpu.pipeline_mode<synchronous>, transform_indices = @transform_8, window_bounds = array<i64: 2, 1, 256>}, {pipeline_mode = #tpu.pipeline_mode<synchronous>, transform_indices = @transform_9, window_bounds = array<i64: 2, 64, 128>}, {pipeline_mode = #tpu.pipeline_mode<synchronous>, transform_indices = @transform_10, window_bounds = array<i64: 2, 64, 128>}]} {
    %c0_i32 = arith.constant 0 : i32
    %0 = arith.cmpi eq, %arg0, %c0_i32 : i32
    %1 = arith.extui %0 : i1 to i32
    %c0_i32_0 = arith.constant 0 : i32
    %2 = arith.cmpi ne, %1, %c0_i32_0 : i32
    scf.if %2 {
      %cst_28 = arith.constant 0.000000e+00 : f32
      %49 = vector.broadcast %cst_28 : f32 to vector<2x192x128xf32>
      %c0_29 = arith.constant 0 : index
      %c0_30 = arith.constant 0 : index
      %c0_31 = arith.constant 0 : index
      %50 = vector.load %arg13[%c0_29, %c0_30, %c0_31] : memref<2x192x128xf32, #tpu.memory_space<vmem>>, vector<2x192x128xf32>
      tpu.vector_store %arg13[%c0_29, %c0_30, %c0_31], %49 {strides = array<i32>} : memref<2x192x128xf32, #tpu.memory_space<vmem>>, vector<2x192x128xf32>,
      %c0_32 = arith.constant 0 : index
      %c0_33 = arith.constant 0 : index
      %51 = vector.load %arg2[%c0_32, %c0_33] : memref<256x128xf32, #tpu.memory_space<vmem>>, vector<256x128xf32>
      %c0_34 = arith.constant 0 : index
      %c0_35 = arith.constant 0 : index
      %52 = vector.load %arg3[%c0_34, %c0_35] : memref<128x128xf32, #tpu.memory_space<vmem>>, vector<128x128xf32>
      %cst_36 = arith.constant dense<0.000000e+00> : vector<256x128xf32>
      %53 = tpu.matmul %51, %52, %cst_36 {dimension_numbers = #tpu.dot_dimension_numbers<[1], [0], [0], [1], [0, 0, 1, 1], [], []>} : vector<256x128xf32>, vector<128x128xf32>, vector<256x128xf32> -> vector<256x128xf32>
      %c0_37 = arith.constant 0 : index
      %c0_38 = arith.constant 0 : index
      %54 = vector.load %arg4[%c0_37, %c0_38] : memref<1x128xf32, #tpu.memory_space<vmem>>, vector<1x128xf32>
      %55 = vector.broadcast %54 : vector<1x128xf32> to vector<256x128xf32>
      %56 = arith.addf %53, %55 : vector<256x128xf32>
      %cst_39 = arith.constant 0.000000e+00 : f32
      %57 = vector.broadcast %cst_39 : f32 to vector<256x128xf32>
      %58 = arith.maximumf %56, %57 : vector<256x128xf32>
      %c0_40 = arith.constant 0 : index
      %c0_41 = arith.constant 0 : index
      %59 = vector.load %arg5[%c0_40, %c0_41] : memref<128x128xf32, #tpu.memory_space<vmem>>, vector<128x128xf32>
      %cst_42 = arith.constant dense<0.000000e+00> : vector<256x128xf32>
      %60 = tpu.matmul %58, %59, %cst_42 {dimension_numbers = #tpu.dot_dimension_numbers<[1], [0], [0], [1], [0, 0, 1, 1], [], []>} : vector<256x128xf32>, vector<128x128xf32>, vector<256x128xf32> -> vector<256x128xf32>
      %c0_43 = arith.constant 0 : index
      %c0_44 = arith.constant 0 : index
      %61 = vector.load %arg6[%c0_43, %c0_44] : memref<1x128xf32, #tpu.memory_space<vmem>>, vector<1x128xf32>
      %62 = vector.broadcast %61 : vector<1x128xf32> to vector<256x128xf32>
      %63 = arith.addf %60, %62 : vector<256x128xf32>
      %64 = vector.shape_cast %63 : vector<256x128xf32> to vector<2x128x128xf32>
      %c0_45 = arith.constant 0 : index
      %c32_46 = arith.constant 32 : index
      %c0_47 = arith.constant 0 : index
      %65 = vector.load %arg13[%c0_45, %c32_46, %c0_47] : memref<2x192x128xf32, #tpu.memory_space<vmem>>, vector<2x128x128xf32>
      tpu.vector_store %arg13[%c0_45, %c32_46, %c0_47], %64 {strides = array<i32>} : memref<2x192x128xf32, #tpu.memory_space<vmem>>, vector<2x128x128xf32>,
    } else {
    }
    %3 = arith.index_cast %arg0 : i32 to index
    %4 = memref.load %arg1[%3] : memref<10xi32, #tpu.memory_space<smem>>
    %c0 = arith.constant 0 : index
    %c32 = arith.constant 32 : index
    %c0_1 = arith.constant 0 : index
    %5 = vector.load %arg13[%c0, %c32, %c0_1] : memref<2x192x128xf32, #tpu.memory_space<vmem>>, vector<2x128x128xf32>
    %6 = vector.shape_cast %5 : vector<2x128x128xf32> to vector<256x128xf32>
    %c-1_i32 = arith.constant -1 : i32
    %7 = arith.muli %c-1_i32, %4 : i32
    %c32_i32 = arith.constant 32 : i32
    %8 = arith.addi %c32_i32, %7 : i32
    %c0_2 = arith.constant 0 : index
    %9 = arith.index_cast %8 : i32 to index
    %c0_3 = arith.constant 0 : index
    %10 = vector.load %arg13[%c0_2, %9, %c0_3] : memref<2x192x128xf32, #tpu.memory_space<vmem>>, vector<2x128x128xf32>
    %11 = vector.shape_cast %10 : vector<2x128x128xf32> to vector<256x128xf32>
    %c0_4 = arith.constant 0 : index
    %c0_5 = arith.constant 0 : index
    %c0_6 = arith.constant 0 : index
    %c0_7 = arith.constant 0 : index
    %12 = vector.load %arg7[%c0_4, %c0_5, %c0_6, %c0_7] : memref<1x3x128x256xf32, #tpu.memory_space<vmem>>, vector<1x1x128x256xf32>
    %13 = vector.shape_cast %12 : vector<1x1x128x256xf32> to vector<128x256xf32>
    %cst = arith.constant dense<0.000000e+00> : vector<256x256xf32>
    %14 = tpu.matmul %11, %13, %cst {dimension_numbers = #tpu.dot_dimension_numbers<[1], [0], [0], [1], [0, 0, 1, 1], [], []>} : vector<256x128xf32>, vector<128x256xf32>, vector<256x256xf32> -> vector<256x256xf32>
    %c0_8 = arith.constant 0 : index
    %c1 = arith.constant 1 : index
    %c0_9 = arith.constant 0 : index
    %c0_10 = arith.constant 0 : index
    %15 = vector.load %arg7[%c0_8, %c1, %c0_9, %c0_10] : memref<1x3x128x256xf32, #tpu.memory_space<vmem>>, vector<1x1x128x256xf32>
    %16 = vector.shape_cast %15 : vector<1x1x128x256xf32> to vector<128x256xf32>
    %cst_11 = arith.constant dense<0.000000e+00> : vector<256x256xf32>
    %17 = tpu.matmul %6, %16, %cst_11 {dimension_numbers = #tpu.dot_dimension_numbers<[1], [0], [0], [1], [0, 0, 1, 1], [], []>} : vector<256x128xf32>, vector<128x256xf32>, vector<256x256xf32> -> vector<256x256xf32>
    %18 = arith.addf %14, %17 : vector<256x256xf32>
    %c1_i32 = arith.constant 1 : i32
    %19 = arith.muli %c1_i32, %4 : i32
    %c32_i32_12 = arith.constant 32 : i32
    %20 = arith.addi %c32_i32_12, %19 : i32
    %c0_13 = arith.constant 0 : index
    %21 = arith.index_cast %20 : i32 to index
    %c0_14 = arith.constant 0 : index
    %22 = vector.load %arg13[%c0_13, %21, %c0_14] : memref<2x192x128xf32, #tpu.memory_space<vmem>>, vector<2x128x128xf32>
    %23 = vector.shape_cast %22 : vector<2x128x128xf32> to vector<256x128xf32>
    %c0_15 = arith.constant 0 : index
    %c2 = arith.constant 2 : index
    %c0_16 = arith.constant 0 : index
    %c0_17 = arith.constant 0 : index
    %24 = vector.load %arg7[%c0_15, %c2, %c0_16, %c0_17] : memref<1x3x128x256xf32, #tpu.memory_space<vmem>>, vector<1x1x128x256xf32>
    %25 = vector.shape_cast %24 : vector<1x1x128x256xf32> to vector<128x256xf32>
    %cst_18 = arith.constant dense<0.000000e+00> : vector<256x256xf32>
    %26 = tpu.matmul %23, %25, %cst_18 {dimension_numbers = #tpu.dot_dimension_numbers<[1], [0], [0], [1], [0, 0, 1, 1], [], []>} : vector<256x128xf32>, vector<128x256xf32>, vector<256x256xf32> -> vector<256x256xf32>
    %27 = arith.addf %18, %26 : vector<256x256xf32>
    %c0_19 = arith.constant 0 : index
    %c0_20 = arith.constant 0 : index
    %c0_21 = arith.constant 0 : index
    %28 = vector.load %arg8[%c0_19, %c0_20, %c0_21] : memref<1x1x256xf32, #tpu.memory_space<vmem>>, vector<1x1x256xf32>
    %29 = vector.shape_cast %28 : vector<1x1x256xf32> to vector<1x256xf32>
    %30 = vector.broadcast %29 : vector<1x256xf32> to vector<256x256xf32>
    %31 = arith.addf %27, %30 : vector<256x256xf32>
    %32 = vector.extract_strided_slice %31 {offsets = [0, 0], sizes = [256, 128], strides = [1, 1]} : vector<256x256xf32> to vector<256x128xf32>
    %33 = arith.negf %32 : vector<256x128xf32>
    %34 = math.exp %33 : vector<256x128xf32>
    %cst_22 = arith.constant 1.000000e+00 : f32
    %35 = vector.broadcast %cst_22 : f32 to vector<256x128xf32>
    %36 = arith.addf %35, %34 : vector<256x128xf32>
    %37 = arith.divf %35, %36 : vector<256x128xf32>
    %38 = vector.extract_strided_slice %31 {offsets = [0, 128], sizes = [256, 128], strides = [1, 1]} : vector<256x256xf32> to vector<256x128xf32>
    %39 = arith.mulf %37, %38 : vector<256x128xf32>
    %cst_23 = arith.constant 1.000000e+00 : f32
    %40 = vector.broadcast %cst_23 : f32 to vector<256x128xf32>
    %41 = arith.subf %40, %37 : vector<256x128xf32>
    %42 = arith.mulf %41, %6 : vector<256x128xf32>
    %43 = arith.addf %39, %42 : vector<256x128xf32>
    %44 = vector.shape_cast %43 : vector<256x128xf32> to vector<2x128x128xf32>
    %c0_24 = arith.constant 0 : index
    %c32_25 = arith.constant 32 : index
    %c0_26 = arith.constant 0 : index
    %45 = vector.load %arg13[%c0_24, %c32_25, %c0_26] : memref<2x192x128xf32, #tpu.memory_space<vmem>>, vector<2x128x128xf32>
    tpu.vector_store %arg13[%c0_24, %c32_25, %c0_26], %44 {strides = array<i32>} : memref<2x192x128xf32, #tpu.memory_space<vmem>>, vector<2x128x128xf32>,
    %c9_i32 = arith.constant 9 : i32
    %46 = arith.cmpi eq, %arg0, %c9_i32 : i32
    %47 = arith.extui %46 : i1 to i32
    %c0_i32_27 = arith.constant 0 : i32
    %48 = arith.cmpi ne, %47, %c0_i32_27 : i32
    scf.if %48 {
      %c0_28 = arith.constant 0 : index
      %c32_29 = arith.constant 32 : index
      %c0_30 = arith.constant 0 : index
      %49 = vector.load %arg13[%c0_28, %c32_29, %c0_30] : memref<2x192x128xf32, #tpu.memory_space<vmem>>, vector<2x128x128xf32>
      %50 = vector.shape_cast %49 : vector<2x128x128xf32> to vector<256x128xf32>
      %c0_31 = arith.constant 0 : index
      %c0_32 = arith.constant 0 : index
      %c0_33 = arith.constant 0 : index
      %51 = vector.load %arg9[%c0_31, %c0_32, %c0_33] : memref<2x128x256xf32, #tpu.memory_space<vmem>>, vector<1x128x256xf32>
      %52 = vector.shape_cast %51 : vector<1x128x256xf32> to vector<128x256xf32>
      %cst_34 = arith.constant dense<0.000000e+00> : vector<256x256xf32>
      %53 = tpu.matmul %50, %52, %cst_34 {dimension_numbers = #tpu.dot_dimension_numbers<[1], [0], [0], [1], [0, 0, 1, 1], [], []>} : vector<256x128xf32>, vector<128x256xf32>, vector<256x256xf32> -> vector<256x256xf32>
      %c0_35 = arith.constant 0 : index
      %c0_36 = arith.constant 0 : index
      %c0_37 = arith.constant 0 : index
      %54 = vector.load %arg10[%c0_35, %c0_36, %c0_37] : memref<2x1x256xf32, #tpu.memory_space<vmem>>, vector<1x1x256xf32>
      %55 = vector.shape_cast %54 : vector<1x1x256xf32> to vector<1x256xf32>
      %56 = vector.broadcast %55 : vector<1x256xf32> to vector<256x256xf32>
      %57 = arith.addf %53, %56 : vector<256x256xf32>
      %58 = vector.extract_strided_slice %57 {offsets = [0, 0], sizes = [256, 128], strides = [1, 1]} : vector<256x256xf32> to vector<256x128xf32>
      %59 = arith.negf %58 : vector<256x128xf32>
      %60 = math.exp %59 : vector<256x128xf32>
      %cst_38 = arith.constant 1.000000e+00 : f32
      %61 = vector.broadcast %cst_38 : f32 to vector<256x128xf32>
      %62 = arith.addf %61, %60 : vector<256x128xf32>
      %63 = arith.divf %61, %62 : vector<256x128xf32>
      %64 = vector.extract_strided_slice %57 {offsets = [0, 128], sizes = [256, 128], strides = [1, 1]} : vector<256x256xf32> to vector<256x128xf32>
      %65 = arith.mulf %63, %64 : vector<256x128xf32>
      %cst_39 = arith.constant 1.000000e+00 : f32
      %66 = vector.broadcast %cst_39 : f32 to vector<256x128xf32>
      %67 = arith.subf %66, %63 : vector<256x128xf32>
      %68 = arith.mulf %67, %50 : vector<256x128xf32>
      %69 = arith.addf %65, %68 : vector<256x128xf32>
      %c1_40 = arith.constant 1 : index
      %c0_41 = arith.constant 0 : index
      %c0_42 = arith.constant 0 : index
      %70 = vector.load %arg9[%c1_40, %c0_41, %c0_42] : memref<2x128x256xf32, #tpu.memory_space<vmem>>, vector<1x128x256xf32>
      %71 = vector.shape_cast %70 : vector<1x128x256xf32> to vector<128x256xf32>
      %cst_43 = arith.constant dense<0.000000e+00> : vector<256x256xf32>
      %72 = tpu.matmul %69, %71, %cst_43 {dimension_numbers = #tpu.dot_dimension_numbers<[1], [0], [0], [1], [0, 0, 1, 1], [], []>} : vector<256x128xf32>, vector<128x256xf32>, vector<256x256xf32> -> vector<256x256xf32>
      %c1_44 = arith.constant 1 : index
      %c0_45 = arith.constant 0 : index
      %c0_46 = arith.constant 0 : index
      %73 = vector.load %arg10[%c1_44, %c0_45, %c0_46] : memref<2x1x256xf32, #tpu.memory_space<vmem>>, vector<1x1x256xf32>
      %74 = vector.shape_cast %73 : vector<1x1x256xf32> to vector<1x256xf32>
      %75 = vector.broadcast %74 : vector<1x256xf32> to vector<256x256xf32>
      %76 = arith.addf %72, %75 : vector<256x256xf32>
      %77 = vector.extract_strided_slice %76 {offsets = [0, 0], sizes = [256, 128], strides = [1, 1]} : vector<256x256xf32> to vector<256x128xf32>
      %78 = arith.negf %77 : vector<256x128xf32>
      %79 = math.exp %78 : vector<256x128xf32>
      %cst_47 = arith.constant 1.000000e+00 : f32
      %80 = vector.broadcast %cst_47 : f32 to vector<256x128xf32>
      %81 = arith.addf %80, %79 : vector<256x128xf32>
      %82 = arith.divf %80, %81 : vector<256x128xf32>
      %83 = vector.extract_strided_slice %76 {offsets = [0, 128], sizes = [256, 128], strides = [1, 1]} : vector<256x256xf32> to vector<256x128xf32>
      %84 = arith.mulf %82, %83 : vector<256x128xf32>
      %cst_48 = arith.constant 1.000000e+00 : f32
      %85 = vector.broadcast %cst_48 : f32 to vector<256x128xf32>
      %86 = arith.subf %85, %82 : vector<256x128xf32>
      %87 = arith.mulf %86, %69 : vector<256x128xf32>
      %88 = arith.addf %84, %87 : vector<256x128xf32>
      %89 = vector.shape_cast %88 : vector<256x128xf32> to vector<2x128x128xf32>
      %90 = vector.extract_strided_slice %89 {offsets = [0, 0, 0], sizes = [1, 128, 128], strides = [1, 1, 1]} : vector<2x128x128xf32> to vector<1x128x128xf32>
      %91 = vector.shape_cast %90 : vector<1x128x128xf32> to vector<128x128xf32>
      %92 = tpu.transpose %91, [1, 0] : vector<128x128xf32> -> vector<128x128xf32>
      %93 = vector.extract_strided_slice %92 {offsets = [0, 0], sizes = [64, 128], strides = [1, 1]} : vector<128x128xf32> to vector<64x128xf32>
      %c0_49 = arith.constant 0 : index
      %c0_50 = arith.constant 0 : index
      %c0_51 = arith.constant 0 : index
      %94 = vector.load %arg11[%c0_49, %c0_50, %c0_51] : memref<2x64x128xf32, #tpu.memory_space<vmem>>, vector<1x64x128xf32>
      %95 = vector.shape_cast %94 : vector<1x64x128xf32> to vector<64x128xf32>
      %96 = vector.shape_cast %93 : vector<64x128xf32> to vector<1x64x128xf32>
      tpu.vector_store %arg11[%c0_49, %c0_50, %c0_51], %96 {strides = array<i32>} : memref<2x64x128xf32, #tpu.memory_space<vmem>>, vector<1x64x128xf32>,
      %97 = vector.extract_strided_slice %92 {offsets = [64, 0], sizes = [64, 128], strides = [1, 1]} : vector<128x128xf32> to vector<64x128xf32>
      %c0_52 = arith.constant 0 : index
      %c0_53 = arith.constant 0 : index
      %c0_54 = arith.constant 0 : index
      %98 = vector.load %arg12[%c0_52, %c0_53, %c0_54] : memref<2x64x128xf32, #tpu.memory_space<vmem>>, vector<1x64x128xf32>
      %99 = vector.shape_cast %98 : vector<1x64x128xf32> to vector<64x128xf32>
      %100 = vector.shape_cast %97 : vector<64x128xf32> to vector<1x64x128xf32>
      tpu.vector_store %arg12[%c0_52, %c0_53, %c0_54], %100 {strides = array<i32>} : memref<2x64x128xf32, #tpu.memory_space<vmem>>, vector<1x64x128xf32>,
      %101 = vector.extract_strided_slice %89 {offsets = [1, 0, 0], sizes = [1, 128, 128], strides = [1, 1, 1]} : vector<2x128x128xf32> to vector<1x128x128xf32>
      %102 = vector.shape_cast %101 : vector<1x128x128xf32> to vector<128x128xf32>
      %103 = tpu.transpose %102, [1, 0] : vector<128x128xf32> -> vector<128x128xf32>
      %104 = vector.extract_strided_slice %103 {offsets = [0, 0], sizes = [64, 128], strides = [1, 1]} : vector<128x128xf32> to vector<64x128xf32>
      %c1_55 = arith.constant 1 : index
      %c0_56 = arith.constant 0 : index
      %c0_57 = arith.constant 0 : index
      %105 = vector.load %arg11[%c1_55, %c0_56, %c0_57] : memref<2x64x128xf32, #tpu.memory_space<vmem>>, vector<1x64x128xf32>
      %106 = vector.shape_cast %105 : vector<1x64x128xf32> to vector<64x128xf32>
      %107 = vector.shape_cast %104 : vector<64x128xf32> to vector<1x64x128xf32>
      tpu.vector_store %arg11[%c1_55, %c0_56, %c0_57], %107 {strides = array<i32>} : memref<2x64x128xf32, #tpu.memory_space<vmem>>, vector<1x64x128xf32>,
      %108 = vector.extract_strided_slice %103 {offsets = [64, 0], sizes = [64, 128], strides = [1, 1]} : vector<128x128xf32> to vector<64x128xf32>
      %c1_58 = arith.constant 1 : index
      %c0_59 = arith.constant 0 : index
      %c0_60 = arith.constant 0 : index
      %109 = vector.load %arg12[%c1_58, %c0_59, %c0_60] : memref<2x64x128xf32, #tpu.memory_space<vmem>>, vector<1x64x128xf32>
      %110 = vector.shape_cast %109 : vector<1x64x128xf32> to vector<64x128xf32>
      %111 = vector.shape_cast %108 : vector<64x128xf32> to vector<1x64x128xf32>
      tpu.vector_store %arg12[%c1_58, %c0_59, %c0_60], %111 {strides = array<i32>} : memref<2x64x128xf32, #tpu.memory_space<vmem>>, vector<1x64x128xf32>,
    } else {
    }
    return
  }
  func.func @transform_0(%arg0: i32, %arg1: memref<10xi32, #tpu.memory_space<smem>>) -> (i32, i32) {
    %c0_i32 = arith.constant 0 : i32
    %c0_i32_0 = arith.constant 0 : i32
    %c0_i32_1 = arith.constant 0 : i32
    return %c0_i32, %c0_i32_0 : i32, i32
  }
  func.func @transform_1(%arg0: i32, %arg1: memref<10xi32, #tpu.memory_space<smem>>) -> (i32, i32) {
    %c0_i32 = arith.constant 0 : i32
    %c0_i32_0 = arith.constant 0 : i32
    %c0_i32_1 = arith.constant 0 : i32
    return %c0_i32, %c0_i32_0 : i32, i32
  }
  func.func @transform_2(%arg0: i32, %arg1: memref<10xi32, #tpu.memory_space<smem>>) -> (i32, i32) {
    %c0_i32 = arith.constant 0 : i32
    %c0_i32_0 = arith.constant 0 : i32
    %c0_i32_1 = arith.constant 0 : i32
    return %c0_i32, %c0_i32_0 : i32, i32
  }
  func.func @transform_3(%arg0: i32, %arg1: memref<10xi32, #tpu.memory_space<smem>>) -> (i32, i32) {
    %c0_i32 = arith.constant 0 : i32
    %c0_i32_0 = arith.constant 0 : i32
    %c0_i32_1 = arith.constant 0 : i32
    return %c0_i32, %c0_i32_0 : i32, i32
  }
  func.func @transform_4(%arg0: i32, %arg1: memref<10xi32, #tpu.memory_space<smem>>) -> (i32, i32) {
    %c0_i32 = arith.constant 0 : i32
    %c0_i32_0 = arith.constant 0 : i32
    %c0_i32_1 = arith.constant 0 : i32
    return %c0_i32, %c0_i32_0 : i32, i32
  }
  func.func @transform_5(%arg0: i32, %arg1: memref<10xi32, #tpu.memory_space<smem>>) -> (i32, i32, i32, i32) {
    %c0_i32 = arith.constant 0 : i32
    %c0_i32_0 = arith.constant 0 : i32
    %c0_i32_1 = arith.constant 0 : i32
    %c0_i32_2 = arith.constant 0 : i32
    return %arg0, %c0_i32, %c0_i32_0, %c0_i32_1 : i32, i32, i32, i32
  }
  func.func @transform_6(%arg0: i32, %arg1: memref<10xi32, #tpu.memory_space<smem>>) -> (i32, i32, i32) {
    %c0_i32 = arith.constant 0 : i32
    %c0_i32_0 = arith.constant 0 : i32
    %c0_i32_1 = arith.constant 0 : i32
    return %arg0, %c0_i32, %c0_i32_0 : i32, i32, i32
  }
  func.func @transform_7(%arg0: i32, %arg1: memref<10xi32, #tpu.memory_space<smem>>) -> (i32, i32, i32) {
    %c0_i32 = arith.constant 0 : i32
    %c0_i32_0 = arith.constant 0 : i32
    %c0_i32_1 = arith.constant 0 : i32
    %c0_i32_2 = arith.constant 0 : i32
    return %c0_i32, %c0_i32_0, %c0_i32_1 : i32, i32, i32
  }
  func.func @transform_8(%arg0: i32, %arg1: memref<10xi32, #tpu.memory_space<smem>>) -> (i32, i32, i32) {
    %c0_i32 = arith.constant 0 : i32
    %c0_i32_0 = arith.constant 0 : i32
    %c0_i32_1 = arith.constant 0 : i32
    %c0_i32_2 = arith.constant 0 : i32
    return %c0_i32, %c0_i32_0, %c0_i32_1 : i32, i32, i32
  }
  func.func @transform_9(%arg0: i32, %arg1: memref<10xi32, #tpu.memory_space<smem>>) -> (i32, i32, i32) {
    %c0_i32 = arith.constant 0 : i32
    %c0_i32_0 = arith.constant 0 : i32
    %c0_i32_1 = arith.constant 0 : i32
    %c0_i32_2 = arith.constant 0 : i32
    return %c0_i32, %c0_i32_0, %c0_i32_1 : i32, i32, i32
  }
  func.func @transform_10(%arg0: i32, %arg1: memref<10xi32, #tpu.memory_space<smem>>) -> (i32, i32, i32) {
    %c0_i32 = arith.constant 0 : i32
    %c0_i32_0 = arith.constant 0 : i32
    %c0_i32_1 = arith.constant 0 : i32
    %c0_i32_2 = arith.constant 0 : i32
    return %c0_i32, %c0_i32_0, %c0_i32_1 : i32, i32, i32
  }
}

</mosaic_0001>

<bundles_post_ra>
// kernel: text_enc_forward.1
= control target key start
LH: loop header
LB: loop body
LE: loop exit
PB: predicated region body
PF: predicated region fallthrough
CT: control target
= control target key end

     0   :  { %s7736_s0 = inlined_call_operand.hbm [shape: s32[10], index: 0, kind: input, shape index: {}]   ;;  %s7737_s1 = inlined_call_operand.vmem [shape: f32[256,128], index: 1, kind: input, shape index: {}]   ;;  %s7738_s2 = inlined_call_operand.hbm [shape: f32[128,128], index: 2, kind: input, shape index: {}]   ;;  %s7739_s3 = inlined_call_operand.hbm [shape: f32[1,128], index: 3, kind: input, shape index: {}]   ;;  %s7740_s4 = inlined_call_operand.hbm [shape: f32[128,128], index: 4, kind: input, shape index: {}]   ;;  %s7741_s5 = inlined_call_operand.hbm [shape: f32[1,128], index: 5, kind: input, shape index: {}]   ;;  %s7742_s6 = inlined_call_operand.hbm [shape: f32[10,3,128,256], index: 6, kind: input, shape index: {}]   ;;  %s7743_s7 = inlined_call_operand.hbm [shape: f32[10,1,256], index: 7, kind: input, shape index: {}]   ;;  %s7744_s8 = inlined_call_operand.hbm [shape: f32[2,128,256], index: 8, kind: input, shape index: {}]   ;;  %s7745_s9 = inlined_call_operand.hbm [shape: f32[2,1,256], index: 9, kind: input, shape index: {}]   ;;  %s7746_s10 = inlined_call_operand.hbm [shape: f32[2,64,128], index: 10, kind: output, shape index: {0}]   ;;  %s7747_s11 = inlined_call_operand.hbm [shape: f32[2,64,128], index: 11, kind: output, shape index: {1}]  }
   0x1   :  { %7759 = sst [smem:[#allocation29_spill]] %s7738_s2  ;;  %s5519_s19 = scalar_lea.hbm %s7736_s0, 16 }
   0x2   :  { %7760 = sst [smem:[#allocation30_spill]] %s7739_s3  ;;  %p5520_p0 = scmp.ne.s32.totalorder %s7736_s0, %s5519_s19 }
   0x3   :  { %7761 = sst [smem:[#allocation31_spill]] %s7740_s4  ;;  %p5523_p1 = scmp.lt.u32.totalorder %s5519_s19, %s7736_s0 }
   0x4   :  { %7762 = sst [smem:[#allocation32_spill]] %s7741_s5 }
   0x5   :  { %7763 = sst [smem:[#allocation33_spill]] %s7742_s6  ;;  %p5525_p2 = pnand %p5523_p1, %p5520_p0 }
   0x6   :  { %7764 = sst [smem:[#allocation34_spill]] %s7746_s10 }
   0x7   :  { %7765 = sst [smem:[#allocation35_spill]] %s7747_s11 }
   0x8   :  { %5528 = shalt.err (!%p5525_p2)  }
   0x9   :  { %s5875_s24 = smov [#allocation4]  }
   0xa   :  { %18 = dma.hbm_to_smem %s7736_s0, 16, %s5875_s24, [#allocation3] }
   0xb   :  { %5825 = dma.done.wait [#allocation3], 16 }
   0xc   :  { %5826 = vsyncadd [#allocation3], 4294967280 }
   0xd   :  { %20 = sfence }
   0xe   :  { %21 = vsyncpa [#allocation6], 0 }
   0xf   :  { %22 = vsyncpa [#allocation9], 0 }
  0x10   :  { %23 = vsyncpa [#allocation12], 0 }
  0x11   :  { %24 = vsyncpa [#allocation7], 0 }
  0x12   :  { %25 = vsyncpa [#allocation19], 0  ;;  %s5969_s27 = smov 0   ;;  %s5971_s28 = smov 0  }
  0x13   :  { %s5973_s29 = smov 0   ;;  %s5975_s30 = smov 0  }
  0x14 LB: > { %s5876_s0 = smov [#allocation5]   ;;  %s5990_s13 = sadd.s32 4294967295, %s5873_s30   ;;  %s5873_s30 = sphi %s5975_s30, %s7800_s30   ;;  %s5869_s29 = sphi %s5973_s29, %s7799_s29   ;;  %s5865_s28 = sphi %s5971_s28, %s7798_s28   ;;  %s5861_s27 = sphi %s5969_s27, %s7797_s27  }
  0x15   : > { %s292_s12 = sshll.u32 %s5876_s0, 4  ;;  %p4132_p3 = scmp.ge.s32.totalorder %s5873_s30, 1  ;;  %s5996_s12 = int_to_ptr.vmem [resolvable:$true] %s292_s12 }
  0x16   : > { %p7750_p4 = scmp.eq.s32.totalorder %s5990_s13, 0  ;;  %p277_p5 = scmp.lt.s32.totalorder %s5873_s30, 11 }
  0x17   : > { %s5877_s15 = smov [#allocation8]   ;;  %s5878_s18 = smov [#allocation10]  }
  0x18   : > { %p5998_p7 = pnand %p4132_p3, %p277_p5  ;;  %s306_s16 = sshll.u32 %s5877_s15, 4  ;;  %s6010_s16 = int_to_ptr.vmem [resolvable:$true] %s306_s16 }
  0x19   : > { %s316_s19 = sshll.u32 %s5878_s18, 4  ;;  %s7768_s2 = sld [smem:[#allocation29_spill]]  ;;  %s6012_s19 = int_to_ptr.vmem [resolvable:$true] %s316_s19 }
  0x1a   : > { %s7766_s14 = scalar_select %p5998_p7, 1, 0 }
  0x1b   : > { %p5018_p8 = pneg %p5998_p7 }
  0x1d   : > { %p6006_p9 = pnand %p5018_p8, %p7750_p4 }
  0x1f   : > { %s7767_s17 = scalar_select %p6006_p9, 1, 0 }
  0x20   : > { %s5529_s22 = scalar_lea.hbm %s7768_s2, 2048  ;;  %p6022_p11 = pneg %p6006_p9 }
  0x21   : > { %p5530_p10 = scmp.ne.s32.totalorder %s7768_s2, %s5529_s22  ;;  %p5536_p0 = scmp.lt.u32.totalorder %s5529_s22, %s7768_s2 }
  0x23   : > { %p5532_p12 = pnand %p6022_p11, %p5530_p10 }
  0x25   : > { %p5533_p13 = pneg %p5532_p12 }
  0x27   : > { %p5538_p1 = pnand %p5536_p0, %p5533_p13 }
  0x29   : > { %5541 = shalt.err (!%p5538_p1)
}
  0x2a   : > { %s5542_s15 = scalar_lea.vmem %s5996_s12, 2048  ;;  %p5550_p8 = scmp.lt.s32.totalorder %s5996_s12, %s5996_s12 }
  0x2b   : > { %p5543_p2 = scmp.ne.s32.totalorder %s5996_s12, %s5542_s15  ;;  %p5551_p6 = scmp.lt.s32.totalorder %s5542_s15, %s5542_s15 }
  0x2d   : > { %p5545_p3 = pnand %p5543_p2, %p6022_p11  ;;  %p5552_p10 = por %p5551_p6, %p5550_p8 }
  0x2f   : > { %p5546_p5 = pneg %p5545_p3 }
  0x31   : > { %p5553_p12 = pnand %p5552_p10, %p5546_p5 }
  0x33   : > { %5556 = shalt.err (!%p5553_p12)
}
  0x34   : > { %s5879_s18 = smov 128   ;;  %s5880_s20 = smov 8  }
  0x35   : > { %5021 = dma.hbm_to_vmem [thread:$0]  (!%p6006_p9), %s7768_s2, 2048, %s5996_s12, [#allocation6], %s5879_s18, %s5879_s18, %s5880_s20  }
  0x36   : > { %s7770_s3 = sld [smem:[#allocation30_spill]] }
  0x3c   : > { %s5557_s26 = scalar_lea.hbm %s7770_s3, 16 }
  0x3d   : > { %p5558_p6 = scmp.ne.s32.totalorder %s7770_s3, %s5557_s26  ;;  %p5564_p1 = scmp.lt.u32.totalorder %s5557_s26, %s7770_s3 }
  0x3f   : > { %p5560_p13 = pnand %p5558_p6, %p6022_p11 }
  0x41   : > { %p5561_p0 = pneg %p5560_p13 }
  0x43   : > { %p5566_p2 = pnand %p5564_p1, %p5561_p0 }
  0x45   : > { %5569 = shalt.err (!%p5566_p2)
}
  0x46   : > { %s5570_s12 = scalar_lea.vmem %s6010_s16, 16  ;;  %s5577_s21 = scalar_lea.vmem %s6010_s16, 32 }
  0x47   : > { %p5571_p3 = scmp.ne.s32.totalorder %s6010_s16, %s5570_s12  ;;  %p5578_p10 = scmp.lt.s32.totalorder %s6010_s16, %s6010_s16 }
  0x48   : > { %p5579_p12 = scmp.lt.s32.totalorder %s5577_s21, %s5570_s12 }
  0x49   : > { %p5573_p5 = pnand %p5571_p3, %p6022_p11 }
  0x4a   : > { %p5580_p6 = por %p5579_p12, %p5578_p10 }
  0x4b   : > { %p5574_p8 = pneg %p5573_p5 }
  0x4d   : > { %p5581_p13 = pnand %p5580_p6, %p5574_p8 }
  0x4f   : > { %5584 = shalt.err (!%p5581_p13)
}
  0x50   : > { %5024 = dma.hbm_to_vmem [thread:$0]  (!%p6006_p9), %s7770_s3, 16, %s6010_s16, [#allocation9]  }
  0x51   : > { %s7771_s4 = sld [smem:[#allocation31_spill]] }
  0x57   : > { %s5585_s24 = scalar_lea.hbm %s7771_s4, 2048 }
  0x58   : > { %p5586_p0 = scmp.ne.s32.totalorder %s7771_s4, %s5585_s24  ;;  %p5592_p3 = scmp.lt.u32.totalorder %s5585_s24, %s7771_s4 }
  0x5a   : > { %p5588_p1 = pnand %p5586_p0, %p6022_p11 }
  0x5c   : > { %p5589_p2 = pneg %p5588_p1 }
  0x5e   : > { %p5594_p5 = pnand %p5592_p3, %p5589_p2 }
  0x60   : > { %5597 = shalt.err (!%p5594_p5)
}
  0x61   : > { %s5598_s16 = scalar_lea.vmem %s6012_s19, 2048  ;;  %p5606_p6 = scmp.lt.s32.totalorder %s6012_s19, %s6012_s19 }
  0x62   : > { %p5599_p8 = scmp.ne.s32.totalorder %s6012_s19, %s5598_s16  ;;  %p5607_p13 = scmp.lt.s32.totalorder %s5598_s16, %s5598_s16 }
  0x64   : > { %p5601_p10 = pnand %p5599_p8, %p6022_p11  ;;  %p5608_p0 = por %p5607_p13, %p5606_p6 }
  0x66   : > { %p5602_p12 = pneg %p5601_p10 }
  0x68   : > { %p5609_p1 = pnand %p5608_p0, %p5602_p12 }
  0x6a   : > { %5612 = shalt.err (!%p5609_p1)
}
  0x6b   : > { %5027 = dma.hbm_to_vmem [thread:$0]  (!%p6006_p9), %s7771_s4, 2048, %s6012_s19, [#allocation9], %s5879_s18, %s5879_s18, %s5880_s20  }
  0x6c   : > { %s5881_s11 = smov [#allocation11]   ;;  %s7772_s5 = sld [smem:[#allocation32_spill]] }
  0x6d   : > { %s330_s22 = sshll.u32 %s5881_s11, 4  ;;  %s331_s22 = int_to_ptr.vmem [resolvable:$true] %s330_s22 }
  0x72   : > { %s5613_s26 = scalar_lea.hbm %s7772_s5, 16 }
  0x73   : > { %p5614_p2 = scmp.ne.s32.totalorder %s7772_s5, %s5613_s26  ;;  %p5620_p8 = scmp.lt.u32.totalorder %s5613_s26, %s7772_s5 }
  0x75   : > { %p5616_p3 = pnand %p5614_p2, %p6022_p11 }
  0x77   : > { %p5617_p5 = pneg %p5616_p3 }
  0x79   : > { %p5622_p10 = pnand %p5620_p8, %p5617_p5 }
  0x7b   : > { %5625 = shalt.err (!%p5622_p10)
}
  0x7c   : > { %s5626_s19 = scalar_lea.vmem %s331_s22, 16  ;;  %s5633_s18 = scalar_lea.vmem %s331_s22, 32 }
  0x7d   : > { %p5627_p12 = scmp.ne.s32.totalorder %s331_s22, %s5626_s19  ;;  %p5634_p0 = scmp.lt.s32.totalorder %s331_s22, %s331_s22 }
  0x7e   : > { %p5635_p1 = scmp.lt.s32.totalorder %s5633_s18, %s5626_s19 }
  0x7f   : > { %p5629_p6 = pnand %p5627_p12, %p6022_p11 }
  0x80   : > { %p5636_p4 = por %p5635_p1, %p5634_p0 }
  0x81   : > { %p5630_p13 = pneg %p5629_p6 }
  0x83   : > { %p5637_p7 = pnand %p5636_p4, %p5630_p13 }
  0x85   : > { %5640 = shalt.err (!%p5637_p7)
}
  0x86   : > { %5030 = dma.hbm_to_vmem [thread:$0]  (!%p6006_p9), %s7772_s5, 16, %s331_s22, [#allocation12]  }
  0x87   : > { %s6115_s10 = sadd.s32 1, %s5873_s30   ;;  %s143_s11 = sadd.s32 1, %s5869_s29 }
  0x88   : > { %s140_s23 = ssub.s32 %s5873_s30, %s6115_s10  ;;  %p150_p4 = scmp.ne.s32.totalorder %s5869_s29, %s5865_s28 }
  0x89   : > { %p141_p7 = scmp.eq.s32.totalorder %s140_s23, 0  ;;  %p151_p2 = scmp.eq.s32.totalorder %s5873_s30, 0 }
  0x8a   : > { %p156_p3 = scmp.ne.s32.totalorder %s5865_s28, %s5861_s27  ;;  %p7773_p8 = scmp.eq.s32.totalorder %s5990_s13, 0 }
  0x8b   : > { %s6126_s24 = scalar_select %p141_p7, %s5869_s29, %s143_s11  }
  0x8c   : > { %p152_p5 = por %p151_p2, %p150_p4  ;;  %p6130_p10 = por %p7773_p8, %p156_p3 }
  0x8d   : > { %p5050_p12 = scmp.lt.s32.totalorder %s5873_s30, 10  ;;  %s367_s0 = sand.u32 1, %s5873_s30  }
  0x8e   : > { %s7774_s26 = scalar_select %p6130_p10, 1, 0 }
  0x8f   : > { %s7752_s22 = sand.u32 1, %s5869_s29   ;;  %s4980_s12 = smul.u32 12288, %s5873_s30 }
  0x90   : > { %s4979_s15 = smul.u32 768, %s7752_s22  ;;  %p6140_p6 = pnand %p5050_p12, %p152_p5 }
  0x91   : > { %s7776_s6 = sld [smem:[#allocation33_spill]]  ;;  %s6151_s11 = scalar_lea.sflag [#allocation6], %s367_s0 }
  0x92   : > { %s7775_s16 = scalar_select %p6140_p6, 1, 0 }
  0x93   : > { %s371_s20 = scalar_lea.vmem [#allocation13], %s4979_s15  ;;  %p7756_p0 = pneg %p6140_p6 }
  0x94   : > { %s378_s21 = sshll.u32 %s371_s20, 4  ;;  %s6149_s21 = int_to_ptr.vmem [resolvable:$true] %s378_s21 }
  0x97   : > { %s6147_s18 = scalar_lea.hbm %s7776_s6, %s4980_s12  ;;  %s5646_s27 = scalar_lea.hbm %s7776_s6, 122880 }
  0x98   : > { %s5641_s23 = scalar_lea.hbm %s6147_s18, 12288  ;;  %p5647_p7 = scmp.lt.u32.totalorder %s6147_s18, %s7776_s6 }
  0x99   : > { %p5642_p13 = scmp.ne.s32.totalorder %s6147_s18, %s5641_s23  ;;  %p5648_p2 = scmp.lt.u32.totalorder %s5646_s27, %s5641_s23 }
  0x9a   : > { %p5650_p5 = scmp.lt.u32.totalorder %s5641_s23, %s6147_s18 }
  0x9b   : > { %p5644_p1 = pnand %p7756_p0, %p5642_p13  ;;  %p5649_p3 = por %p5648_p2, %p5647_p7 }
  0x9d   : > { %p5645_p4 = pneg %p5644_p1  ;;  %p5651_p8 = por %p5650_p5, %p5649_p3 }
  0x9f   : > { %p5652_p12 = pnand %p5651_p8, %p5645_p4 }
  0xa1   : > { %5655 = shalt.err (!%p5652_p12)
}
  0xa2   : > { %s5656_s0 = scalar_lea.vmem %s6149_s21, 12288  ;;  %s5882_s15 = smov [#allocation13]  }
  0xa3   : > { %p5657_p13 = scmp.ne.s32.totalorder %s6149_s21, %s5656_s0  ;;  %s5661_s20 = sshll.u32 %s5882_s15, 4  ;;  %s5662_s20 = int_to_ptr.vmem [resolvable:$false] %s5661_s20 }
  0xa4   : > { %s5663_s2 = scalar_lea.vmem %s5662_s20, 24576  ;;  %p5664_p9 = scmp.lt.s32.totalorder %s6149_s21, %s5662_s20 }
  0xa5   : > { %p5659_p1 = pnand %p5657_p13, %p7756_p0  ;;  %p5665_p7 = scmp.lt.s32.totalorder %s5663_s2, %s5656_s0 }
  0xa7   : > { %p5660_p10 = pneg %p5659_p1  ;;  %p5666_p2 = por %p5665_p7, %p5664_p9 }
  0xa9   : > { %p5667_p3 = pnand %p5666_p2, %p5660_p10 }
  0xab   : > { %5670 = shalt.err (!%p5667_p3)
}
  0xac   : > { %s5883_s22 = smov 256   ;;  %s5884_s23 = smov 16  }
  0xad   : > { %5040 = dma.hbm_to_vmem [thread:$0]  (!%p6140_p6), %s6147_s18, 12288, %s6149_s21, %s6151_s11, %s5883_s22, %s5883_s22, %s5884_s23  }
  0xae   : > { %s5885_s12 = smov [#allocation15]   ;;  %s5886_s27 = smov [#allocation16]  }
  0xaf   : > { %s340_s19 = sshll.u32 %s5885_s12, 4  ;;  %s353_s15 = sshll.u32 %s5886_s27, 4  ;;  %s341_s19 = int_to_ptr.vmem [resolvable:$true] %s340_s19  ;;  %s354_s15 = int_to_ptr.vmem [resolvable:$true] %s353_s15 }
  0xb0   : > { %s5671_s0 = scalar_lea.hbm %s7744_s8, 8192 }
  0xb1   : > { %p5672_p9 = scmp.ne.s32.totalorder %s7744_s8, %s5671_s0  ;;  %p5678_p5 = scmp.lt.u32.totalorder %s5671_s0, %s7744_s8 }
  0xb3   : > { %p5674_p10 = pnand %p5672_p9, %p6022_p11 }
  0xb5   : > { %p5675_p4 = pneg %p5674_p10 }
  0xb7   : > { %p5680_p8 = pnand %p5678_p5, %p5675_p4 }
  0xb9   : > { %5683 = shalt.err (!%p5680_p8)
}
  0xba   : > { %s5684_s18 = scalar_lea.vmem %s341_s19, 8192  ;;  %p5692_p7 = scmp.lt.s32.totalorder %s341_s19, %s341_s19 }
  0xbb   : > { %p5685_p12 = scmp.ne.s32.totalorder %s341_s19, %s5684_s18  ;;  %p5693_p2 = scmp.lt.s32.totalorder %s5684_s18, %s5684_s18 }
  0xbd   : > { %p5687_p13 = pnand %p5685_p12, %p6022_p11  ;;  %p5694_p3 = por %p5693_p2, %p5692_p7 }
  0xbf   : > { %p5688_p1 = pneg %p5687_p13 }
  0xc1   : > { %p5695_p0 = pnand %p5694_p3, %p5688_p1 }
  0xc3   : > { %5698 = shalt.err (!%p5695_p0)
}
  0xc4   : > { %p7777_p9 = scmp.ne.s32.totalorder %s7767_s17, 0  ;;  %s7778_s5 = sand.u32 1, %s5869_s29  }
  0xc5   : > { %s4141_s6 = sshll.u32 %s7778_s5, 1  ;;  %s5699_s27 = scalar_lea.hbm %s7745_s9, 64 }
  0xc6   : > { %5033 = dma.hbm_to_vmem [thread:$0]  (!%p7777_p9), %s7744_s8, 8192, %s341_s19, [#allocation9], %s5883_s22, %s5883_s22, %s5884_s23  }
  0xc7   : > { %p5700_p10 = scmp.ne.s32.totalorder %s7745_s9, %s5699_s27  ;;  %p5706_p5 = scmp.lt.u32.totalorder %s5699_s27, %s7745_s9 }
  0xc9   : > { %p5702_p0 = pnand %p5700_p10, %p6022_p11 }
  0xcb   : > { %p5703_p4 = pneg %p5702_p0 }
  0xcd   : > { %p5708_p8 = pnand %p5706_p5, %p5703_p4 }
  0xcf   : > { %5711 = shalt.err (!%p5708_p8)
}
  0xd0   : > { %s5712_s22 = scalar_lea.vmem %s354_s15, 64  ;;  %p5720_p7 = scmp.lt.s32.totalorder %s354_s15, %s354_s15 }
  0xd1   : > { %p5713_p12 = scmp.ne.s32.totalorder %s354_s15, %s5712_s22  ;;  %p5721_p2 = scmp.lt.s32.totalorder %s5712_s22, %s5712_s22 }
  0xd3   : > { %p5715_p13 = pnand %p5713_p12, %p6022_p11  ;;  %p5722_p3 = por %p5721_p2, %p5720_p7 }
  0xd5   : > { %p5716_p1 = pneg %p5715_p13 }
  0xd7   : > { %p5723_p6 = pnand %p5722_p3, %p5716_p1 }
  0xd9   : > { %5726 = shalt.err (!%p5723_p6)
}
  0xda   : > { %s5887_s23 = smov 32   ;;  %s5888_s19 = smov 2  }
  0xdb   : > { %5036 = dma.hbm_to_vmem [thread:$0]  (!%p7777_p9), %s7745_s9, 64, %s354_s15, [#allocation12], %s5887_s23, %s5887_s23, %s5888_s19  }
  0xdc   : > { %s4354_s5 = sshll.u32 %s5873_s30, 5  ;;  %s392_s27 = scalar_lea.vmem [#allocation14], %s4141_s6 }
  0xdd   : > { %s6221_s12 = scalar_lea.hbm %s7743_s7, %s4354_s5  ;;  %s400_s20 = sshll.u32 %s392_s27, 4  ;;  %s401_s20 = int_to_ptr.vmem [resolvable:$true] %s400_s20 }
  0xde   : > { %s5727_s0 = scalar_lea.hbm %s6221_s12, 32  ;;  %p7779_p6 = scmp.ne.s32.totalorder %s7775_s16, 0 }
  0xdf   : > { %p5728_p11 = scmp.ne.s32.totalorder %s6221_s12, %s5727_s0  ;;  %s5732_s15 = scalar_lea.hbm %s7743_s7, 320 }
  0xe0   : > { %p7780_p10 = pneg %p7779_p6  ;;  %p5733_p9 = scmp.lt.u32.totalorder %s6221_s12, %s7743_s7 }
  0xe1   : > { %p5734_p5 = scmp.lt.u32.totalorder %s5732_s15, %s5727_s0  ;;  %p5736_p12 = scmp.lt.u32.totalorder %s5727_s0, %s6221_s12 }
  0xe2   : > { %p5730_p0 = pnand %p5728_p11, %p7780_p10 }
  0xe3   : > { %p5735_p8 = por %p5734_p5, %p5733_p9 }
  0xe4   : > { %p5731_p4 = pneg %p5730_p0 }
  0xe5   : > { %p5737_p13 = por %p5736_p12, %p5735_p8 }
  0xe7   : > { %p5738_p1 = pnand %p5737_p13, %p5731_p4 }
  0xe9   : > { %5741 = shalt.err (!%p5738_p1)
}
  0xea   : > { %s5742_s6 = scalar_lea.vmem %s401_s20, 32  ;;  %p7781_p2 = pmov %p7780_p10 }
  0xeb   : > { %p5743_p7 = scmp.ne.s32.totalorder %s401_s20, %s5742_s6  ;;  %s5889_s22 = smov [#allocation14]  }
  0xec   : > { %s5747_s23 = sshll.u32 %s5889_s22, 4  ;;  %s5748_s23 = int_to_ptr.vmem [resolvable:$false] %s5747_s23 }
  0xed   : > { %p5745_p3 = pnand %p5743_p7, %p7781_p2  ;;  %s5749_s19 = scalar_lea.vmem %s5748_s23, 64 }
  0xee   : > { %p5750_p10 = scmp.lt.s32.totalorder %s401_s20, %s5748_s23  ;;  %p5751_p0 = scmp.lt.s32.totalorder %s5749_s19, %s5742_s6 }
  0xef   : > { %p5746_p11 = pneg %p5745_p3 }
  0xf0   : > { %p5752_p5 = por %p5751_p0, %p5750_p10 }
  0xf2   : > { %p5753_p9 = pnand %p5752_p5, %p5746_p11 }
  0xf4   : > { %5756 = shalt.err (!%p5753_p9)
}
  0xf5   : > { %5043 = dma.hbm_to_vmem [thread:$0]  (!%p7779_p6), %s6221_s12, 32, %s401_s20, %s6151_s11  }
  0xf6   : > { %p7782_p4 = scmp.ne.s32.totalorder %s7766_s14, 0 }
  0xf7   : > { %p7783_p8 = scmp.eq.s32.totalorder (!%p7782_p4), %s5990_s13, 0 }
  0xf8   : > { %409 = sbr.rel (%p7782_p4) target bundleno = 2094 (0x82e), region = 56 }
  0xff   : > { %5828 = dma.done.wait (%p7783_p8), [#allocation6], 2048   ;;  %p7784_p12 = pmov %p7783_p8 }
 0x100   : > { %p7785_p13 = pmov %p7783_p8 }
 0x101   : > { %5830 = vsyncadd (%p7784_p12), [#allocation6], 4294965248 }
 0x102   : > { %5832 = dma.done.wait (%p7785_p13), [#allocation9], 2064   ;;  %p7786_p1 = pmov %p7783_p8 }
 0x104   : > { %5834 = vsyncadd (%p7786_p1), [#allocation9], 4294965232  ;;  %p7787_p7 = pmov %p7786_p1 }
 0x105   : > { %p7788_p6 = pmov %p7786_p1 }
 0x106   : > { %5836 = dma.done.wait (%p7787_p7), [#allocation12], 16  }
 0x107   : > { %5838 = vsyncadd (%p7788_p6), [#allocation12], 4294967280  ;;  %s427_s14 = sand.u32 1, %s5990_s13   ;;  %s429_s16 = sand.u32 1, %s5865_s28  }
 0x108   : > { %s4981_s11 = smul.u32 768, %s429_s16  ;;  %s428_s3 = scalar_lea.sflag [#allocation6], %s427_s14 }
 0x109   : > { %p7789_p2 = scmp.ne.s32.totalorder %s7774_s26, 0 }
 0x10a   : > { %s6259_s4 = scalar_lea.vmem [#allocation13], %s4981_s11 }
 0x10b   : > { %5840 = dma.done.wait (%p7789_p2), %s428_s3, 12320  }
 0x10c   : > { %5842 = vsyncadd (%p7789_p2), %s428_s3, 4294954976  ;;  %s6265_s5 = sshll.u32 %s429_s16, 1  ;;  %p7790_p3 = pmov %p7786_p1 }
 0x10d   : > { %s440_s21 = scalar_lea.vmem [#allocation14], %s6265_s5 }
 0x10e   : > { %5844 = dma.done.wait (%p7790_p3), [#allocation9], 8192   ;;  %p7791_p11 = pmov %p7786_p1 }
 0x10f   : > { %p7792_p10 = pmov %p7786_p1 }
 0x110   : > { %5846 = vsyncadd (%p7791_p11), [#allocation9], 4294959104 }
 0x111   : > { %5848 = dma.done.wait (%p7792_p10), [#allocation12], 64   ;;  %p7793_p0 = pmov %p7786_p1 }
 0x112   : > { %p7794_p5 = scmp.ne.s32.totalorder %s5990_s13, 0 }
 0x113   : > { %5850 = vsyncadd (%p7793_p0), [#allocation12], 4294967232  ;;  %v569_v0 = vld [vmem:[#allocation5] sm:$0xff] (!%p7794_p5)  ;;  %v570_v1 = vld [vmem:[#allocation5 + $0x8] sm:$0xff] (!%p7794_p5) }
 0x114   : > { %488 = sbr.rel (%p7794_p5) target bundleno = 804 (0x324), region = 92  ;;  %v571_v2 = vld [vmem:[#allocation5 + $0x10] sm:$0xff] (!%p7794_p5)  ;;  %v4611_v3 = vpack.c.bf16 (!%p7794_p5), %v570_v1, %v569_v0  ;;  %v572_v4 = vld [vmem:[#allocation5 + $0x18] sm:$0xff] (!%p7794_p5)  ;;  %v573_v6 = vld [vmem:[#allocation5 + $0x20] sm:$0xff] (!%p7794_p5) }
 0x115   : > { %v4615_v5 = vpack.c.bf16 (!%p7794_p5), %v572_v4, %v571_v2  ;;  %v574_v7 = vld [vmem:[#allocation5 + $0x28] sm:$0xff] (!%p7794_p5)  ;;  %v537_v9 = vld [vmem:[%s7737_s1] sm:$0xff] (!%p7794_p5)  ;;  %v575_v10 = vld [vmem:[#allocation5 + $0x30] sm:$0xff] (!%p7794_p5) }
 0x116   : > { %4612 = vmatprep.subr.bf16.mxu0 (!%p7794_p5), %v4611_v3  ;;  %v4619_v8 = vpack.c.bf16 (!%p7794_p5), %v574_v7, %v573_v6  ;;  %v576_v11 = vld [vmem:[#allocation5 + $0x38] sm:$0xff] (!%p7794_p5)  ;;  %4483 = vmatprep.mubr.f32.mxu0 (!%p7794_p5), %v537_v9  ;;  %v577_v13 = vld [vmem:[#allocation5 + $0x40] sm:$0xff] (!%p7794_p5)  ;;  %v578_v14 = vld [vmem:[#allocation5 + $0x48] sm:$0xff] (!%p7794_p5) }
 0x117   : > { %4614 = vmatpush3.bf16.msra.mxu0 (!%p7794_p5), %v4611_v3  ;;  %v4623_v12 = vpack.c.bf16 (!%p7794_p5), %v576_v11, %v575_v10  ;;  %v4627_v15 = vpack.c.bf16 (!%p7794_p5), %v578_v14, %v577_v13  ;;  %v579_v16 = vld [vmem:[#allocation5 + $0x50] sm:$0xff] (!%p7794_p5)  ;;  %v580_v17 = vld [vmem:[#allocation5 + $0x58] sm:$0xff] (!%p7794_p5)  ;;  %v849_v18 = vld [vmem:[#allocation10] sm:$0xff] (!%p7794_p5) }
 0x118   : > { %4616 = vmatprep.subr.bf16.mxu0 (!%p7794_p5), %v4615_v5  ;;  %v850_v19 = vld [vmem:[#allocation10 + $0x8] sm:$0xff] (!%p7794_p5)  ;;  %v851_v20 = vld [vmem:[#allocation10 + $0x10] sm:$0xff] (!%p7794_p5)  ;;  %v4631_v21 = vpack.c.bf16 (!%p7794_p5), %v580_v17, %v579_v16  ;;  %v581_v22 = vld [vmem:[#allocation5 + $0x60] sm:$0xff] (!%p7794_p5)  ;;  %v5890_v16 = vmov (!%p7794_p5), 0.0  }
 0x119   : > { %v4643_v23 = vpack.c.bf16 (!%p7794_p5), %v850_v19, %v849_v18  ;;  %v852_v24 = vld [vmem:[#allocation10 + $0x18] sm:$0xff] (!%p7794_p5)  ;;  %v582_v25 = vld [vmem:[#allocation5 + $0x68] sm:$0xff] (!%p7794_p5)  ;;  %v583_v30 = vld [vmem:[#allocation5 + $0x70] sm:$0xff] (!%p7794_p5)  ;;  %489 = vst [vmem:[#allocation2] sm:$0xff] (!%p7794_p5), %v5890_v16 }
 0x11a   : > { %v4647_v26 = vpack.c.bf16 (!%p7794_p5), %v852_v24, %v851_v20  ;;  %v853_v27 = vld [vmem:[#allocation10 + $0x20] sm:$0xff] (!%p7794_p5)  ;;  %v854_v28 = vld [vmem:[#allocation10 + $0x28] sm:$0xff] (!%p7794_p5)  ;;  %v4635_v29 = vpack.c.bf16 (!%p7794_p5), %v582_v25, %v581_v22  ;;  %v584_v32 = vld [vmem:[#allocation5 + $0x78] sm:$0xff] (!%p7794_p5)  ;;  %490 = vst [vmem:[#allocation2 + $0x8] sm:$0xff] (!%p7794_p5), %v5890_v16 }
 0x11b   : > { %4618 = vmatpush3.bf16.msra.mxu0 %v4615_v5  ;;  %4644 = vmatprep.subr.bf16.mxu1 %v4643_v23  ;;  %v4651_v31 = vpack.c.bf16 %v854_v28, %v853_v27  ;;  %v855_v33 = vld [vmem:[#allocation10 + $0x30] sm:$0xff]  ;;  %v856_v34 = vld [vmem:[#allocation10 + $0x38] sm:$0xff]  ;;  %v4639_v35 = vpack.c.bf16 %v584_v32, %v583_v30  ;;  %v857_v37 = vld [vmem:[#allocation10 + $0x40] sm:$0xff]  ;;  %491 = vst [vmem:[#allocation2 + $0x10] sm:$0xff] %v5890_v16 }
 0x11c   : > { %4620 = vmatprep.subr.bf16.mxu0 %v4619_v8  ;;  %4646 = vmatpush3.bf16.msra.mxu1 %v4643_v23  ;;  %v4655_v36 = vpack.c.bf16 %v856_v34, %v855_v33  ;;  %v858_v38 = vld [vmem:[#allocation10 + $0x48] sm:$0xff]  ;;  %v859_v40 = vld [vmem:[#allocation10 + $0x50] sm:$0xff]  ;;  %v860_v41 = vld [vmem:[#allocation10 + $0x58] sm:$0xff]  ;;  %492 = vst [vmem:[#allocation2 + $0x18] sm:$0xff] %v5890_v16 }
 0x11d   : > { %4648 = vmatprep.subr.bf16.mxu1 %v4647_v26  ;;  %v4659_v39 = vpack.c.bf16 %v858_v38, %v857_v37  ;;  %v538_v42 = vld [vmem:[%s7737_s1 + $0x8] sm:$0xff]  ;;  %v539_v43 = vld [vmem:[%s7737_s1 + $0x10] sm:$0xff]  ;;  %v4663_v44 = vpack.c.bf16 %v860_v41, %v859_v40  ;;  %v540_v47 = vld [vmem:[%s7737_s1 + $0x18] sm:$0xff]  ;;  %509 = vst [vmem:[#allocation2 + $0xa0] sm:$0xff] %v5890_v16 }
 0x11e   : > { %v861_v45 = vld [vmem:[#allocation10 + $0x60] sm:$0xff]  ;;  %v862_v46 = vld [vmem:[#allocation10 + $0x68] sm:$0xff]  ;;  %v544_v52 = vld [vmem:[%s7737_s1 + $0x38] sm:$0xff]  ;;  %510 = vst [vmem:[#allocation2 + $0xa8] sm:$0xff] %v5890_v16 }
 0x11f   : > { %4622 = vmatpush3.bf16.msra.mxu0 %v4619_v8  ;;  %v541_v48 = vld [vmem:[%s7737_s1 + $0x20] sm:$0xff]  ;;  %v4667_v49 = vpack.c.bf16 %v862_v46, %v861_v45  ;;  %v542_v50 = vld [vmem:[%s7737_s1 + $0x28] sm:$0xff]  ;;  %v543_v51 = vld [vmem:[%s7737_s1 + $0x30] sm:$0xff]  ;;  %511 = vst [vmem:[#allocation2 + $0xb0] sm:$0xff] %v5890_v16 }
 0x120   : > { %4624 = vmatprep.subr.bf16.mxu0 %v4623_v12  ;;  %4650 = vmatpush3.bf16.msra.mxu1 %v4647_v26  ;;  %v545_v53 = vld [vmem:[%s7737_s1 + $0x40] sm:$0xff]  ;;  %v546_v54 = vld [vmem:[%s7737_s1 + $0x48] sm:$0xff]  ;;  %v547_v55 = vld [vmem:[%s7737_s1 + $0x50] sm:$0xff]  ;;  %512 = vst [vmem:[#allocation2 + $0xb8] sm:$0xff] %v5890_v16 }
 0x121   : > { %4652 = vmatprep.subr.bf16.mxu1 %v4651_v31  ;;  %v548_v56 = vld [vmem:[%s7737_s1 + $0x58] sm:$0xff]  ;;  %v549_v57 = vld [vmem:[%s7737_s1 + $0x60] sm:$0xff]  ;;  %v550_v58 = vld [vmem:[%s7737_s1 + $0x68] sm:$0xff]  ;;  %513 = vst [vmem:[#allocation2 + $0xc0] sm:$0xff] %v5890_v16 }
 0x122   : > { %v551_v59 = vld [vmem:[%s7737_s1 + $0x70] sm:$0xff]  ;;  %v552_v60 = vld [vmem:[%s7737_s1 + $0x78] sm:$0xff]  ;;  %v553_v61 = vld [vmem:[%s7737_s1 + $0x80] sm:$0xff]  ;;  %514 = vst [vmem:[#allocation2 + $0xc8] sm:$0xff] %v5890_v16 }
 0x123   : > { %4626 = vmatpush3.bf16.msra.mxu0 %v4623_v12  ;;  %v554_v62 = vld [vmem:[%s7737_s1 + $0x88] sm:$0xff]  ;;  %v555_v63 = vld [vmem:[%s7737_s1 + $0x90] sm:$0xff]  ;;  %v556_v0 = vld [vmem:[%s7737_s1 + $0x98] sm:$0xff]  ;;  %515 = vst [vmem:[#allocation2 + $0xd0] sm:$0xff] %v5890_v16 }
 0x124   : > { %4628 = vmatprep.subr.bf16.mxu0 %v4627_v15  ;;  %4654 = vmatpush3.bf16.msra.mxu1 %v4651_v31  ;;  %v557_v1 = vld [vmem:[%s7737_s1 + $0xa0] sm:$0xff]  ;;  %v558_v2 = vld [vmem:[%s7737_s1 + $0xa8] sm:$0xff]  ;;  %v559_v3 = vld [vmem:[%s7737_s1 + $0xb0] sm:$0xff]  ;;  %516 = vst [vmem:[#allocation2 + $0xd8] sm:$0xff] %v5890_v16 }
 0x125   : > { %4656 = vmatprep.subr.bf16.mxu1 %v4655_v36  ;;  %v560_v4 = vld [vmem:[%s7737_s1 + $0xb8] sm:$0xff]  ;;  %v561_v5 = vld [vmem:[%s7737_s1 + $0xc0] sm:$0xff]  ;;  %v562_v6 = vld [vmem:[%s7737_s1 + $0xc8] sm:$0xff]  ;;  %533 = vst [vmem:[#allocation2 + $0x160] sm:$0xff] %v5890_v16 }
 0x126   : > { %v563_v7 = vld [vmem:[%s7737_s1 + $0xd0] sm:$0xff]  ;;  %v564_v8 = vld [vmem:[%s7737_s1 + $0xd8] sm:$0xff]  ;;  %v565_v9 = vld [vmem:[%s7737_s1 + $0xe0] sm:$0xff]  ;;  %534 = vst [vmem:[#allocation2 + $0x168] sm:$0xff] %v5890_v16 }
 0x127   : > { %4630 = vmatpush3.bf16.msra.mxu0 %v4627_v15  ;;  %v566_v10 = vld [vmem:[%s7737_s1 + $0xe8] sm:$0xff]  ;;  %v567_v11 = vld [vmem:[%s7737_s1 + $0xf0] sm:$0xff]  ;;  %v568_v12 = vld [vmem:[%s7737_s1 + $0xf8] sm:$0xff]  ;;  %535 = vst [vmem:[#allocation2 + $0x170] sm:$0xff] %v5890_v16 }
 0x128   : > { %4632 = vmatprep.subr.bf16.mxu0 %v4631_v21  ;;  %4658 = vmatpush3.bf16.msra.mxu1 %v4655_v36  ;;  %v863_v13 = vld [vmem:[#allocation10 + $0x70] sm:$0xff]  ;;  %v864_v14 = vld [vmem:[#allocation10 + $0x78] sm:$0xff]  ;;  %536 = vst [vmem:[#allocation2 + $0x178] sm:$0xff] %v5890_v16 }
 0x129   : > { %4660 = vmatprep.subr.bf16.mxu1 %v4659_v39  ;;  %v4671_v15 = vpack.c.bf16 %v864_v14, %v863_v13  ;;  %v6374_v17 = vld [vmem:[#allocation8] ss:$0 sm:$0xff] }
 0x12b   : > { %4634 = vmatpush3.bf16.msra.mxu0 %v4631_v21 }
 0x12c   : > { %4636 = vmatprep.subr.bf16.mxu0 %v4635_v29  ;;  %4662 = vmatpush3.bf16.msra.mxu1 %v4659_v39 }
 0x12d   : > { %4664 = vmatprep.subr.bf16.mxu1 %v4663_v44 }
 0x12f   : > { %4638 = vmatpush3.bf16.msra.mxu0 %v4635_v29 }
 0x130   : > { %4640 = vmatprep.subr.bf16.mxu0 %v4639_v35  ;;  %4666 = vmatpush3.bf16.msra.mxu1 %v4663_v44 }
 0x131   : > { %4668 = vmatprep.subr.bf16.mxu1 %v4667_v49 }
 0x133   : > { %4642 = vmatpush3.bf16.msra.mxu0 %v4639_v35 }
 0x134   : > { %4670 = vmatpush3.bf16.msra.mxu1 %v4667_v49 }
 0x135   : > { %4672 = vmatprep.subr.bf16.mxu1 %v4671_v15 }
 0x136   : > { %4484 = vmatmul.mubr.f32.vlgmr.msra.gmra.mrb[0].mxu0 %v538_v42 }
 0x137   : > { %4486 = vmatprep.mubr.f32.mxu0 %v539_v43 }
 0x138   : > { %4674 = vmatpush3.bf16.msra.mxu1 %v4671_v15 }
 0x13a   : > { %4487 = vmatmul.mubr.f32.gmra.mrb[2].mxu0 %v540_v47 }
 0x13b   : > { %4489 = vmatprep.mubr.f32.mxu0 %v541_v48 }
 0x13e   : > { %4490 = vmatmul.mubr.f32.gmra.mrb[4].mxu0 %v542_v50 }
 0x13f   : > { %4492 = vmatprep.mubr.f32.mxu0 %v543_v51 }
 0x142   : > { %4493 = vmatmul.mubr.f32.gmra.mrb[6].mxu0 %v544_v52 }
 0x143   : > { %4495 = vmatprep.mubr.f32.mxu0 %v545_v53 }
 0x146   : > { %4496 = vmatmul.mubr.f32.gmra.mrb[8].mxu0 %v546_v54 }
 0x147   : > { %4498 = vmatprep.mubr.f32.mxu0 %v547_v55 }
 0x14a   : > { %4499 = vmatmul.mubr.f32.gmra.mrb[10].mxu0 %v548_v56 }
 0x14b   : > { %4501 = vmatprep.mubr.f32.mxu0 %v549_v57 }
 0x14e   : > { %4502 = vmatmul.mubr.f32.gmra.mrb[12].mxu0 %v550_v58 }
 0x14f   : > { %4504 = vmatprep.mubr.f32.mxu0 %v551_v59 }
 0x152   : > { %4505 = vmatmul.mubr.f32.gmra.mrb[14].mxu0 %v552_v60 }
 0x153   : > { %4507 = vmatprep.mubr.f32.mxu0 %v553_v61 }
 0x156   : > { %4508 = vmatmul.mubr.f32.gmra.mrb[16].mxu0 %v554_v62 }
 0x157   : > { %4510 = vmatprep.mubr.f32.mxu0 %v555_v63 }
 0x15a   : > { %4511 = vmatmul.mubr.f32.gmra.mrb[18].mxu0 %v556_v0 }
 0x15b   : > { %4513 = vmatprep.mubr.f32.mxu0 %v557_v1 }
 0x15e   : > { %4514 = vmatmul.mubr.f32.gmra.mrb[20].mxu0 %v558_v2 }
 0x15f   : > { %4516 = vmatprep.mubr.f32.mxu0 %v559_v3 }
 0x162   : > { %4517 = vmatmul.mubr.f32.gmra.mrb[22].mxu0 %v560_v4 }
 0x163   : > { %4519 = vmatprep.mubr.f32.mxu0 %v561_v5 }
 0x166   : > { %4520 = vmatmul.mubr.f32.gmra.mrb[24].mxu0 %v562_v6 }
 0x167   : > { %4522 = vmatprep.mubr.f32.mxu0 %v563_v7 }
 0x16a   : > { %4523 = vmatmul.mubr.f32.gmra.mrb[26].mxu0 %v564_v8 }
 0x16b   : > { %4525 = vmatprep.mubr.f32.mxu0 %v565_v9 }
 0x16e   : > { %4526 = vmatmul.mubr.f32.gmra.mrb[28].mxu0 %v566_v10 }
 0x16f   : > { %4528 = vmatprep.mubr.f32.mxu0 %v567_v11 }
 0x172   : > { %4529 = vmatmul.mubr.f32.gmra.mrb[30].mxu0 %v568_v12 }
 0x209   : > { %v4485_v18 = vpop.f32.mrb[0].mxu0 }
 0x20a   : > { %v664_v19 = vadd.f32 %v4485_v18, %v6374_v17  ;;  %v658_v20 = vpop.f32.mrb[1].mxu0 }
 0x20b   : > { %v659_v21 = vadd.f32 %v6374_v17, %v658_v20 }
 0x20c   : > { %v818_v24 = vmax.f32 %v664_v19, 0.0 }
 0x20d   : > { %v4488_v22 = vpop.f32.mrb[2].mxu0  ;;  %v817_v23 = vmax.f32 %v659_v21, 0.0 }
 0x20e   : > { %v674_v25 = vadd.f32 %v4488_v22, %v6374_v17  ;;  %v668_v26 = vpop.f32.mrb[3].mxu0 }
 0x20f   : > { %v669_v27 = vadd.f32 %v6374_v17, %v668_v26  ;;  %4563 = vmatprep.mubr.f32.mxu1 %v817_v23 }
 0x210   : > { %4564 = vmatmul.mubr.f32.vlgmr.msra.gmra.mrb[0].mxu1 %v818_v24  ;;  %v820_v30 = vmax.f32 %v674_v25, 0.0 }
 0x211   : > { %v819_v28 = vmax.f32 %v669_v27, 0.0  ;;  %v4491_v29 = vpop.f32.mrb[4].mxu0 }
 0x212   : > { %v684_v31 = vadd.f32 %v4491_v29, %v6374_v17  ;;  %v678_v32 = vpop.f32.mrb[5].mxu0 }
 0x213   : > { %v679_v33 = vadd.f32 %v6374_v17, %v678_v32  ;;  %4566 = vmatprep.mubr.f32.mxu1 %v819_v28 }
 0x214   : > { %4567 = vmatmul.mubr.f32.gmra.mrb[2].mxu1 %v820_v30  ;;  %v822_v36 = vmax.f32 %v684_v31, 0.0 }
 0x215   : > { %v821_v34 = vmax.f32 %v679_v33, 0.0  ;;  %v4494_v35 = vpop.f32.mrb[6].mxu0 }
 0x216   : > { %v694_v37 = vadd.f32 %v4494_v35, %v6374_v17  ;;  %v688_v38 = vpop.f32.mrb[7].mxu0 }
 0x217   : > { %v689_v39 = vadd.f32 %v6374_v17, %v688_v38  ;;  %4569 = vmatprep.mubr.f32.mxu1 %v821_v34 }
 0x218   : > { %4570 = vmatmul.mubr.f32.gmra.mrb[4].mxu1 %v822_v36  ;;  %v824_v42 = vmax.f32 %v694_v37, 0.0 }
 0x219   : > { %v823_v40 = vmax.f32 %v689_v39, 0.0  ;;  %v4497_v41 = vpop.f32.mrb[8].mxu0 }
 0x21a   : > { %v704_v43 = vadd.f32 %v4497_v41, %v6374_v17  ;;  %v698_v44 = vpop.f32.mrb[9].mxu0 }
 0x21b   : > { %v699_v45 = vadd.f32 %v6374_v17, %v698_v44  ;;  %4572 = vmatprep.mubr.f32.mxu1 %v823_v40 }
 0x21c   : > { %4573 = vmatmul.mubr.f32.gmra.mrb[6].mxu1 %v824_v42  ;;  %v826_v48 = vmax.f32 %v704_v43, 0.0 }
 0x21d   : > { %v825_v46 = vmax.f32 %v699_v45, 0.0  ;;  %v4500_v47 = vpop.f32.mrb[10].mxu0 }
 0x21e   : > { %v714_v49 = vadd.f32 %v4500_v47, %v6374_v17  ;;  %v708_v50 = vpop.f32.mrb[11].mxu0 }
 0x21f   : > { %v709_v51 = vadd.f32 %v6374_v17, %v708_v50  ;;  %4575 = vmatprep.mubr.f32.mxu1 %v825_v46 }
 0x220   : > { %4576 = vmatmul.mubr.f32.gmra.mrb[8].mxu1 %v826_v48  ;;  %v828_v54 = vmax.f32 %v714_v49, 0.0 }
 0x221   : > { %v827_v52 = vmax.f32 %v709_v51, 0.0  ;;  %v4503_v53 = vpop.f32.mrb[12].mxu0  ;;  %v6408_v51 = vld [vmem:[#allocation11] ss:$0 sm:$0xff] }
 0x222   : > { %v724_v55 = vadd.f32 %v4503_v53, %v6374_v17  ;;  %v718_v56 = vpop.f32.mrb[13].mxu0 }
 0x223   : > { %v719_v57 = vadd.f32 %v6374_v17, %v718_v56  ;;  %4578 = vmatprep.mubr.f32.mxu1 %v827_v52 }
 0x224   : > { %4579 = vmatmul.mubr.f32.gmra.mrb[10].mxu1 %v828_v54  ;;  %v830_v60 = vmax.f32 %v724_v55, 0.0 }
 0x225   : > { %v829_v58 = vmax.f32 %v719_v57, 0.0  ;;  %v4506_v59 = vpop.f32.mrb[14].mxu0 }
 0x226   : > { %v734_v61 = vadd.f32 %v4506_v59, %v6374_v17  ;;  %v728_v62 = vpop.f32.mrb[15].mxu0 }
 0x227   : > { %v729_v63 = vadd.f32 %v6374_v17, %v728_v62  ;;  %4581 = vmatprep.mubr.f32.mxu1 %v829_v58 }
 0x228   : > { %4582 = vmatmul.mubr.f32.gmra.mrb[12].mxu1 %v830_v60  ;;  %v832_v2 = vmax.f32 %v734_v61, 0.0 }
 0x229   : > { %v831_v0 = vmax.f32 %v729_v63, 0.0  ;;  %v4509_v1 = vpop.f32.mrb[16].mxu0 }
 0x22a   : > { %v744_v3 = vadd.f32 %v4509_v1, %v6374_v17  ;;  %v738_v4 = vpop.f32.mrb[17].mxu0 }
 0x22b   : > { %v739_v5 = vadd.f32 %v6374_v17, %v738_v4  ;;  %4584 = vmatprep.mubr.f32.mxu1 %v831_v0 }
 0x22c   : > { %4585 = vmatmul.mubr.f32.gmra.mrb[14].mxu1 %v832_v2  ;;  %v834_v8 = vmax.f32 %v744_v3, 0.0 }
 0x22d   : > { %v833_v6 = vmax.f32 %v739_v5, 0.0  ;;  %v4512_v7 = vpop.f32.mrb[18].mxu0 }
 0x22e   : > { %v754_v9 = vadd.f32 %v4512_v7, %v6374_v17  ;;  %v748_v10 = vpop.f32.mrb[19].mxu0 }
 0x22f   : > { %v749_v11 = vadd.f32 %v6374_v17, %v748_v10  ;;  %4587 = vmatprep.mubr.f32.mxu1 %v833_v6 }
 0x230   : > { %4588 = vmatmul.mubr.f32.gmra.mrb[16].mxu1 %v834_v8  ;;  %v836_v14 = vmax.f32 %v754_v9, 0.0 }
 0x231   : > { %v835_v12 = vmax.f32 %v749_v11, 0.0  ;;  %v4515_v13 = vpop.f32.mrb[20].mxu0 }
 0x232   : > { %v764_v15 = vadd.f32 %v4515_v13, %v6374_v17  ;;  %v758_v16 = vpop.f32.mrb[21].mxu0 }
 0x233   : > { %v759_v18 = vadd.f32 %v6374_v17, %v758_v16  ;;  %4590 = vmatprep.mubr.f32.mxu1 %v835_v12 }
 0x234   : > { %4591 = vmatmul.mubr.f32.gmra.mrb[18].mxu1 %v836_v14  ;;  %v838_v21 = vmax.f32 %v764_v15, 0.0 }
 0x235   : > { %v837_v19 = vmax.f32 %v759_v18, 0.0  ;;  %v4518_v20 = vpop.f32.mrb[22].mxu0 }
 0x236   : > { %v774_v22 = vadd.f32 %v4518_v20, %v6374_v17  ;;  %v768_v23 = vpop.f32.mrb[23].mxu0 }
 0x237   : > { %v769_v24 = vadd.f32 %v6374_v17, %v768_v23  ;;  %4593 = vmatprep.mubr.f32.mxu1 %v837_v19 }
 0x238   : > { %4594 = vmatmul.mubr.f32.gmra.mrb[20].mxu1 %v838_v21  ;;  %v840_v27 = vmax.f32 %v774_v22, 0.0 }
 0x239   : > { %v839_v25 = vmax.f32 %v769_v24, 0.0  ;;  %v4521_v26 = vpop.f32.mrb[24].mxu0 }
 0x23a   : > { %v784_v28 = vadd.f32 %v4521_v26, %v6374_v17  ;;  %v778_v29 = vpop.f32.mrb[25].mxu0 }
 0x23b   : > { %v779_v30 = vadd.f32 %v6374_v17, %v778_v29  ;;  %4596 = vmatprep.mubr.f32.mxu1 %v839_v25 }
 0x23c   : > { %4597 = vmatmul.mubr.f32.gmra.mrb[22].mxu1 %v840_v27  ;;  %v842_v33 = vmax.f32 %v784_v28, 0.0 }
 0x23d   : > { %v841_v31 = vmax.f32 %v779_v30, 0.0  ;;  %v4524_v32 = vpop.f32.mrb[26].mxu0 }
 0x23e   : > { %v794_v34 = vadd.f32 %v4524_v32, %v6374_v17  ;;  %v788_v35 = vpop.f32.mrb[27].mxu0 }
 0x23f   : > { %v789_v36 = vadd.f32 %v6374_v17, %v788_v35  ;;  %4599 = vmatprep.mubr.f32.mxu1 %v841_v31 }
 0x240   : > { %4600 = vmatmul.mubr.f32.gmra.mrb[24].mxu1 %v842_v33  ;;  %v844_v39 = vmax.f32 %v794_v34, 0.0 }
 0x241   : > { %v843_v37 = vmax.f32 %v789_v36, 0.0  ;;  %v4527_v38 = vpop.f32.mrb[28].mxu0 }
 0x242   : > { %v804_v40 = vadd.f32 %v4527_v38, %v6374_v17  ;;  %v798_v41 = vpop.f32.mrb[29].mxu0 }
 0x243   : > { %v799_v42 = vadd.f32 %v6374_v17, %v798_v41  ;;  %4602 = vmatprep.mubr.f32.mxu1 %v843_v37 }
 0x244   : > { %4603 = vmatmul.mubr.f32.gmra.mrb[26].mxu1 %v844_v39  ;;  %v846_v45 = vmax.f32 %v804_v40, 0.0 }
 0x245   : > { %v845_v43 = vmax.f32 %v799_v42, 0.0  ;;  %v4530_v44 = vpop.f32.mrb[30].mxu0 }
 0x246   : > { %v814_v46 = vadd.f32 %v4530_v44, %v6374_v17  ;;  %v808_v47 = vpop.f32.mrb[31].mxu0 }
 0x247   : > { %v809_v48 = vadd.f32 %v6374_v17, %v808_v47  ;;  %4605 = vmatprep.mubr.f32.mxu1 %v845_v43 }
 0x248   : > { %4606 = vmatmul.mubr.f32.gmra.mrb[28].mxu1 %v846_v45  ;;  %v848_v50 = vmax.f32 %v814_v46, 0.0 }
 0x249   : > { %v847_v49 = vmax.f32 %v809_v48, 0.0 }
 0x24b   : > { %4608 = vmatprep.mubr.f32.mxu1 %v847_v49 }
 0x24c   : > { %4609 = vmatmul.mubr.f32.gmra.mrb[30].mxu1 %v848_v50 }
 0x2e3   : > { %v4565_v52 = vpop.f32.mrb[0].mxu1 }
 0x2e4   : > { %v944_v53 = vadd.f32 %v4565_v52, %v6408_v51  ;;  %v938_v54 = vpop.f32.mrb[1].mxu1 }
 0x2e5   : > { %v939_v55 = vadd.f32 %v6408_v51, %v938_v54 }
 0x2e6   : > { %1098 = vst [vmem:[#allocation2 + $0x28] sm:$0xff] %v944_v53 }
 0x2e7   : > { %1097 = vst [vmem:[#allocation2 + $0x20] sm:$0xff] %v939_v55  ;;  %v4568_v56 = vpop.f32.mrb[2].mxu1 }
 0x2e8   : > { %v954_v57 = vadd.f32 %v4568_v56, %v6408_v51  ;;  %v948_v17 = vpop.f32.mrb[3].mxu1 }
 0x2e9   : > { %v949_v58 = vadd.f32 %v6408_v51, %v948_v17 }
 0x2ea   : > { %1100 = vst [vmem:[#allocation2 + $0x38] sm:$0xff] %v954_v57 }
 0x2eb   : > { %1099 = vst [vmem:[#allocation2 + $0x30] sm:$0xff] %v949_v58  ;;  %v4571_v59 = vpop.f32.mrb[4].mxu1 }
 0x2ec   : > { %v964_v60 = vadd.f32 %v4571_v59, %v6408_v51  ;;  %v958_v61 = vpop.f32.mrb[5].mxu1 }
 0x2ed   : > { %v959_v62 = vadd.f32 %v6408_v51, %v958_v61 }
 0x2ee   : > { %1102 = vst [vmem:[#allocation2 + $0x48] sm:$0xff] %v964_v60 }
 0x2ef   : > { %1101 = vst [vmem:[#allocation2 + $0x40] sm:$0xff] %v959_v62  ;;  %v4574_v63 = vpop.f32.mrb[6].mxu1 }
 0x2f0   : > { %v974_v0 = vadd.f32 %v4574_v63, %v6408_v51  ;;  %v968_v1 = vpop.f32.mrb[7].mxu1 }
 0x2f1   : > { %v969_v2 = vadd.f32 %v6408_v51, %v968_v1 }
 0x2f2   : > { %1104 = vst [vmem:[#allocation2 + $0x58] sm:$0xff] %v974_v0 }
 0x2f3   : > { %1103 = vst [vmem:[#allocation2 + $0x50] sm:$0xff] %v969_v2  ;;  %v4577_v3 = vpop.f32.mrb[8].mxu1 }
 0x2f4   : > { %v984_v4 = vadd.f32 %v4577_v3, %v6408_v51  ;;  %v978_v5 = vpop.f32.mrb[9].mxu1 }
 0x2f5   : > { %v979_v6 = vadd.f32 %v6408_v51, %v978_v5 }
 0x2f6   : > { %1106 = vst [vmem:[#allocation2 + $0x68] sm:$0xff] %v984_v4 }
 0x2f7   : > { %1105 = vst [vmem:[#allocation2 + $0x60] sm:$0xff] %v979_v6  ;;  %v4580_v7 = vpop.f32.mrb[10].mxu1 }
 0x2f8   : > { %v994_v8 = vadd.f32 %v4580_v7, %v6408_v51  ;;  %v988_v9 = vpop.f32.mrb[11].mxu1 }
 0x2f9   : > { %v989_v10 = vadd.f32 %v6408_v51, %v988_v9 }
 0x2fa   : > { %1108 = vst [vmem:[#allocation2 + $0x78] sm:$0xff] %v994_v8 }
 0x2fb   : > { %1107 = vst [vmem:[#allocation2 + $0x70] sm:$0xff] %v989_v10  ;;  %v4583_v11 = vpop.f32.mrb[12].mxu1 }
 0x2fc   : > { %v1004_v12 = vadd.f32 %v4583_v11, %v6408_v51  ;;  %v998_v13 = vpop.f32.mrb[13].mxu1 }
 0x2fd   : > { %v999_v14 = vadd.f32 %v6408_v51, %v998_v13 }
 0x2fe   : > { %1110 = vst [vmem:[#allocation2 + $0x88] sm:$0xff] %v1004_v12 }
 0x2ff   : > { %1109 = vst [vmem:[#allocation2 + $0x80] sm:$0xff] %v999_v14  ;;  %v4586_v15 = vpop.f32.mrb[14].mxu1 }
 0x300   : > { %v1014_v16 = vadd.f32 %v4586_v15, %v6408_v51  ;;  %v1008_v18 = vpop.f32.mrb[15].mxu1 }
 0x301   : > { %v1009_v19 = vadd.f32 %v6408_v51, %v1008_v18 }
 0x302   : > { %1112 = vst [vmem:[#allocation2 + $0x98] sm:$0xff] %v1014_v16 }
 0x303   : > { %1111 = vst [vmem:[#allocation2 + $0x90] sm:$0xff] %v1009_v19  ;;  %v4589_v20 = vpop.f32.mrb[16].mxu1 }
 0x304   : > { %v1024_v21 = vadd.f32 %v4589_v20, %v6408_v51  ;;  %v1018_v22 = vpop.f32.mrb[17].mxu1 }
 0x305   : > { %v1019_v23 = vadd.f32 %v6408_v51, %v1018_v22 }
 0x306   : > { %1114 = vst [vmem:[#allocation2 + $0xe8] sm:$0xff] %v1024_v21 }
 0x307   : > { %1113 = vst [vmem:[#allocation2 + $0xe0] sm:$0xff] %v1019_v23  ;;  %v4592_v24 = vpop.f32.mrb[18].mxu1 }
 0x308   : > { %v1034_v25 = vadd.f32 %v4592_v24, %v6408_v51  ;;  %v1028_v26 = vpop.f32.mrb[19].mxu1 }
 0x309   : > { %v1029_v27 = vadd.f32 %v6408_v51, %v1028_v26 }
 0x30a   : > { %1116 = vst [vmem:[#allocation2 + $0xf8] sm:$0xff] %v1034_v25 }
 0x30b   : > { %1115 = vst [vmem:[#allocation2 + $0xf0] sm:$0xff] %v1029_v27  ;;  %v4595_v28 = vpop.f32.mrb[20].mxu1 }
 0x30c   : > { %v1044_v29 = vadd.f32 %v4595_v28, %v6408_v51  ;;  %v1038_v30 = vpop.f32.mrb[21].mxu1 }
 0x30d   : > { %v1039_v31 = vadd.f32 %v6408_v51, %v1038_v30 }
 0x30e   : > { %1118 = vst [vmem:[#allocation2 + $0x108] sm:$0xff] %v1044_v29 }
 0x30f   : > { %1117 = vst [vmem:[#allocation2 + $0x100] sm:$0xff] %v1039_v31  ;;  %v4598_v32 = vpop.f32.mrb[22].mxu1 }
 0x310   : > { %v1054_v33 = vadd.f32 %v4598_v32, %v6408_v51  ;;  %v1048_v34 = vpop.f32.mrb[23].mxu1 }
 0x311   : > { %v1049_v35 = vadd.f32 %v6408_v51, %v1048_v34 }
 0x312   : > { %1120 = vst [vmem:[#allocation2 + $0x118] sm:$0xff] %v1054_v33 }
 0x313   : > { %1119 = vst [vmem:[#allocation2 + $0x110] sm:$0xff] %v1049_v35  ;;  %v4601_v36 = vpop.f32.mrb[24].mxu1 }
 0x314   : > { %v1064_v37 = vadd.f32 %v4601_v36, %v6408_v51  ;;  %v1058_v38 = vpop.f32.mrb[25].mxu1 }
 0x315   : > { %v1059_v39 = vadd.f32 %v6408_v51, %v1058_v38 }
 0x316   : > { %1122 = vst [vmem:[#allocation2 + $0x128] sm:$0xff] %v1064_v37 }
 0x317   : > { %1121 = vst [vmem:[#allocation2 + $0x120] sm:$0xff] %v1059_v39  ;;  %v4604_v40 = vpop.f32.mrb[26].mxu1 }
 0x318   : > { %v1074_v41 = vadd.f32 %v4604_v40, %v6408_v51  ;;  %v1068_v42 = vpop.f32.mrb[27].mxu1 }
 0x319   : > { %v1069_v43 = vadd.f32 %v6408_v51, %v1068_v42 }
 0x31a   : > { %1124 = vst [vmem:[#allocation2 + $0x138] sm:$0xff] %v1074_v41 }
 0x31b   : > { %1123 = vst [vmem:[#allocation2 + $0x130] sm:$0xff] %v1069_v43  ;;  %v4607_v44 = vpop.f32.mrb[28].mxu1 }
 0x31c   : > { %v1084_v45 = vadd.f32 %v4607_v44, %v6408_v51  ;;  %v1078_v46 = vpop.f32.mrb[29].mxu1 }
 0x31d   : > { %v1079_v47 = vadd.f32 %v6408_v51, %v1078_v46 }
 0x31e   : > { %1126 = vst [vmem:[#allocation2 + $0x148] sm:$0xff] %v1084_v45 }
 0x31f   : > { %1125 = vst [vmem:[#allocation2 + $0x140] sm:$0xff] %v1079_v47  ;;  %v4610_v48 = vpop.f32.mrb[30].mxu1 }
 0x320   : > { %v1094_v49 = vadd.f32 %v4610_v48, %v6408_v51  ;;  %v1088_v50 = vpop.f32.mrb[31].mxu1 }
 0x321   : > { %v1089_v52 = vadd.f32 %v6408_v51, %v1088_v50 }
 0x322   : > { %1128 = vst [vmem:[#allocation2 + $0x158] sm:$0xff] %v1094_v49 }
 0x323   : > { %1127 = vst [vmem:[#allocation2 + $0x150] sm:$0xff] %v1089_v52 }
 0x324 PF: > { %v4156_v53 = vld [vmem:[%s6259_s4 + $0x108] sm:$0xff]  ;;  %v4158_v54 = vld [vmem:[%s6259_s4 + $0x118] sm:$0xff]  ;;  %v4155_v57 = vld [vmem:[%s6259_s4 + $0x100] sm:$0xff]  ;;  %v5891_v58 = vmov 0.0   ;;  %s6528_s30 = sld [smem:[#allocation4 + %s5990_s13]]  ;;  %p4283_p9 = scmp.ne.s32.totalorder %s5990_s13, 9 }
 0x325   : > { %v1197_v55 = vld [vmem:[%s6259_s4 + $0x8] sm:$0xff]  ;;  %v4675_v56 = vpack.c.bf16 %v4158_v54, %v4156_v53  ;;  %v1199_v51 = vld [vmem:[%s6259_s4 + $0x18] sm:$0xff]  ;;  %v4157_v17 = vld [vmem:[%s6259_s4 + $0x110] sm:$0xff]  ;;  %1325 = vmatprep.mubr.f32.mxu1 %v5891_v58  ;;  %1582 = vmatprep.mubr.f32.mxu0 %v5891_v58 }
 0x326   : > { %v6450_v59 = vpack.c.bf16 %v1199_v51, %v1197_v55  ;;  %v4677_v60 = vpack.c.bf16 %v4157_v17, %v4155_v57  ;;  %v1196_v61 = vld [vmem:[%s6259_s4] sm:$0xff]  ;;  %v1198_v62 = vld [vmem:[%s6259_s4 + $0x10] sm:$0xff]  ;;  %v4160_v63 = vld [vmem:[%s6259_s4 + $0x128] sm:$0xff] }
 0x327   : > { %4676 = vmatprep.subr.bf16.mxu1 %v4675_v56  ;;  %v6455_v0 = vpack.c.bf16 %v1198_v62, %v1196_v61  ;;  %v4162_v1 = vld [vmem:[%s6259_s4 + $0x138] sm:$0xff]  ;;  %v1201_v2 = vld [vmem:[%s6259_s4 + $0x28] sm:$0xff]  ;;  %v4159_v6 = vld [vmem:[%s6259_s4 + $0x120] sm:$0xff] }
 0x328   : > { %v1203_v3 = vld [vmem:[%s6259_s4 + $0x38] sm:$0xff]  ;;  %4708 = vmatprep.subr.bf16.mxu0 %v6450_v59  ;;  %4678 = vmatpush1.bf16.msra.mxu1 %v4677_v60  ;;  %v4679_v4 = vpack.c.bf16 %v4162_v1, %v4160_v63  ;;  %v4161_v7 = vld [vmem:[%s6259_s4 + $0x130] sm:$0xff]  ;;  %v1200_v8 = vld [vmem:[%s6259_s4 + $0x20] sm:$0xff] }
 0x329   : > { %v6461_v5 = vpack.c.bf16 %v1203_v3, %v1201_v2  ;;  %4710 = vmatpush1.bf16.msra.mxu0 %v6455_v0  ;;  %v4681_v9 = vpack.c.bf16 %v4161_v7, %v4159_v6  ;;  %v1202_v10 = vld [vmem:[%s6259_s4 + $0x30] sm:$0xff]  ;;  %v4164_v11 = vld [vmem:[%s6259_s4 + $0x148] sm:$0xff]  ;;  %v4166_v12 = vld [vmem:[%s6259_s4 + $0x158] sm:$0xff] }
 0x32a   : > { %4680 = vmatprep.subr.bf16.mxu1 %v4679_v4  ;;  %v6471_v13 = vpack.c.bf16 %v1202_v10, %v1200_v8  ;;  %v4683_v14 = vpack.c.bf16 %v4166_v12, %v4164_v11  ;;  %v1205_v15 = vld [vmem:[%s6259_s4 + $0x48] sm:$0xff]  ;;  %v1207_v16 = vld [vmem:[%s6259_s4 + $0x58] sm:$0xff]  ;;  %v4163_v18 = vld [vmem:[%s6259_s4 + $0x140] sm:$0xff]  ;;  %s1162_s15 = ssub.s32 32, %s6528_s30 }
 0x32b   : > { %4712 = vmatprep.subr.bf16.mxu0 %v6461_v5  ;;  %v6476_v19 = vpack.c.bf16 %v1207_v16, %v1205_v15  ;;  %v4165_v20 = vld [vmem:[%s6259_s4 + $0x150] sm:$0xff]  ;;  %v1204_v21 = vld [vmem:[%s6259_s4 + $0x40] sm:$0xff]  ;;  %v4168_v24 = vld [vmem:[%s6259_s4 + $0x168] sm:$0xff]  ;;  %s6569_s2 = scalar_lea.vmem [#allocation2], %s1162_s15 }
 0x32c   : > { %v1206_v22 = vld [vmem:[%s6259_s4 + $0x50] sm:$0xff]  ;;  %4682 = vmatpush1.bf16.msra.mxu1 %v4681_v9  ;;  %v4685_v23 = vpack.c.bf16 %v4165_v20, %v4163_v18  ;;  %v4170_v25 = vld [vmem:[%s6259_s4 + $0x178] sm:$0xff]  ;;  %v1209_v26 = vld [vmem:[%s6259_s4 + $0x68] sm:$0xff] }
 0x32d   : > { %4714 = vmatpush1.bf16.msra.mxu0 %v6471_v13  ;;  %4684 = vmatprep.subr.bf16.mxu1 %v4683_v14  ;;  %v6485_v27 = vpack.c.bf16 %v1206_v22, %v1204_v21  ;;  %v4687_v28 = vpack.c.bf16 %v4170_v25, %v4168_v24  ;;  %v1211_v29 = vld [vmem:[%s6259_s4 + $0x78] sm:$0xff]  ;;  %v4167_v30 = vld [vmem:[%s6259_s4 + $0x160] sm:$0xff]  ;;  %v4169_v31 = vld [vmem:[%s6259_s4 + $0x170] sm:$0xff] }
 0x32e   : > { %4716 = vmatprep.subr.bf16.mxu0 %v6476_v19  ;;  %v6491_v32 = vpack.c.bf16 %v1211_v29, %v1209_v26  ;;  %v1208_v33 = vld [vmem:[%s6259_s4 + $0x60] sm:$0xff]  ;;  %v1210_v34 = vld [vmem:[%s6259_s4 + $0x70] sm:$0xff]  ;;  %v4172_v35 = vld [vmem:[%s6259_s4 + $0x188] sm:$0xff]  ;;  %v4689_v39 = vpack.c.bf16 %v4169_v31, %v4167_v30 }
 0x32f   : > { %v4174_v36 = vld [vmem:[%s6259_s4 + $0x198] sm:$0xff]  ;;  %v1213_v37 = vld [vmem:[%s6259_s4 + $0x88] sm:$0xff]  ;;  %v6500_v40 = vpack.c.bf16 %v1210_v34, %v1208_v33  ;;  %v4171_v42 = vld [vmem:[%s6259_s4 + $0x180] sm:$0xff] }
 0x330   : > { %v1215_v38 = vld [vmem:[%s6259_s4 + $0x98] sm:$0xff]  ;;  %4686 = vmatpush1.bf16.msra.mxu1 %v4685_v23  ;;  %v4691_v41 = vpack.c.bf16 %v4174_v36, %v4172_v35  ;;  %v4173_v43 = vld [vmem:[%s6259_s4 + $0x190] sm:$0xff]  ;;  %v1212_v44 = vld [vmem:[%s6259_s4 + $0x80] sm:$0xff] }
 0x331   : > { %4718 = vmatpush1.bf16.msra.mxu0 %v6485_v27  ;;  %4688 = vmatprep.subr.bf16.mxu1 %v4687_v28  ;;  %v6506_v45 = vpack.c.bf16 %v1215_v38, %v1213_v37  ;;  %v1214_v46 = vld [vmem:[%s6259_s4 + $0x90] sm:$0xff]  ;;  %v4176_v47 = vld [vmem:[%s6259_s4 + $0x1a8] sm:$0xff]  ;;  %v4178_v48 = vld [vmem:[%s6259_s4 + $0x1b8] sm:$0xff]  ;;  %v4693_v52 = vpack.c.bf16 %v4173_v43, %v4171_v42 }
 0x332   : > { %4720 = vmatprep.subr.bf16.mxu0 %v6491_v32  ;;  %v1217_v49 = vld [vmem:[%s6259_s4 + $0xa8] sm:$0xff]  ;;  %v1219_v50 = vld [vmem:[%s6259_s4 + $0xb8] sm:$0xff]  ;;  %v6514_v53 = vpack.c.bf16 %v1214_v46, %v1212_v44  ;;  %v4695_v54 = vpack.c.bf16 %v4178_v48, %v4176_v47  ;;  %v4175_v55 = vld [vmem:[%s6259_s4 + $0x1a0] sm:$0xff] }
 0x333   : > { %v4177_v56 = vld [vmem:[%s6259_s4 + $0x1b0] sm:$0xff]  ;;  %v1216_v51 = vld [vmem:[%s6259_s4 + $0xa0] sm:$0xff]  ;;  %v6520_v57 = vpack.c.bf16 %v1219_v50, %v1217_v49  ;;  %v4180_v60 = vld [vmem:[%s6259_s4 + $0x1c8] sm:$0xff] }
 0x334   : > { %4690 = vmatpush1.bf16.msra.mxu1 %v4689_v39  ;;  %v1218_v17 = vld [vmem:[%s6259_s4 + $0xb0] sm:$0xff]  ;;  %v4182_v61 = vld [vmem:[%s6259_s4 + $0x1d8] sm:$0xff]  ;;  %v1221_v62 = vld [vmem:[%s6259_s4 + $0xc8] sm:$0xff]  ;;  %v4697_v1 = vpack.c.bf16 %v4177_v56, %v4175_v55 }
 0x335   : > { %4722 = vmatpush1.bf16.msra.mxu0 %v6500_v40  ;;  %4692 = vmatprep.subr.bf16.mxu1 %v4691_v41  ;;  %v1223_v63 = vld [vmem:[%s6259_s4 + $0xd8] sm:$0xff]  ;;  %v6531_v2 = vpack.c.bf16 %v1218_v17, %v1216_v51  ;;  %v4699_v3 = vpack.c.bf16 %v4182_v61, %v4180_v60  ;;  %v4179_v4 = vld [vmem:[%s6259_s4 + $0x1c0] sm:$0xff]  ;;  %v4181_v6 = vld [vmem:[%s6259_s4 + $0x1d0] sm:$0xff] }
 0x336   : > { %4724 = vmatprep.subr.bf16.mxu0 %v6506_v45  ;;  %v1220_v7 = vld [vmem:[%s6259_s4 + $0xc0] sm:$0xff]  ;;  %v6537_v8 = vpack.c.bf16 %v1223_v63, %v1221_v62  ;;  %v1222_v9 = vld [vmem:[%s6259_s4 + $0xd0] sm:$0xff]  ;;  %v4184_v10 = vld [vmem:[%s6259_s4 + $0x1e8] sm:$0xff]  ;;  %v4701_v15 = vpack.c.bf16 %v4181_v6, %v4179_v4 }
 0x337   : > { %v4186_v11 = vld [vmem:[%s6259_s4 + $0x1f8] sm:$0xff]  ;;  %v1225_v12 = vld [vmem:[%s6259_s4 + $0xe8] sm:$0xff]  ;;  %v6545_v16 = vpack.c.bf16 %v1222_v9, %v1220_v7  ;;  %v4183_v20 = vld [vmem:[%s6259_s4 + $0x1e0] sm:$0xff] }
 0x338   : > { %4694 = vmatpush1.bf16.msra.mxu1 %v4693_v52  ;;  %v1227_v14 = vld [vmem:[%s6259_s4 + $0xf8] sm:$0xff]  ;;  %v4703_v18 = vpack.c.bf16 %v4186_v11, %v4184_v10  ;;  %v4185_v21 = vld [vmem:[%s6259_s4 + $0x1f0] sm:$0xff]  ;;  %v1224_v23 = vld [vmem:[%s6259_s4 + $0xe0] sm:$0xff] }
 0x339   : > { %4726 = vmatpush1.bf16.msra.mxu0 %v6514_v53  ;;  %4696 = vmatprep.subr.bf16.mxu1 %v4695_v54  ;;  %v6550_v22 = vpack.c.bf16 %v1227_v14, %v1225_v12  ;;  %v1226_v24 = vld [vmem:[%s6259_s4 + $0xf0] sm:$0xff]  ;;  %v4220_v25 = vld [vmem:[%s6259_s4 + $0x208] sm:$0xff]  ;;  %v4222_v26 = vld [vmem:[%s6259_s4 + $0x218] sm:$0xff]  ;;  %v4705_v28 = vpack.c.bf16 %v4185_v21, %v4183_v20 }
 0x33a   : > { %4728 = vmatprep.subr.bf16.mxu0 %v6520_v57  ;;  %v6558_v29 = vpack.c.bf16 %v1226_v24, %v1224_v23  ;;  %v4739_v30 = vpack.c.bf16 %v4222_v26, %v4220_v25  ;;  %v4219_v31 = vld [vmem:[%s6259_s4 + $0x200] sm:$0xff]  ;;  %v4221_v33 = vld [vmem:[%s6259_s4 + $0x210] sm:$0xff]  ;;  %v4224_v34 = vld [vmem:[%s6259_s4 + $0x228] sm:$0xff] }
 0x33b   : > { %v4226_v35 = vld [vmem:[%s6259_s4 + $0x238] sm:$0xff]  ;;  %v4741_v38 = vpack.c.bf16 %v4221_v33, %v4219_v31  ;;  %v4223_v41 = vld [vmem:[%s6259_s4 + $0x220] sm:$0xff]  ;;  %v4225_v42 = vld [vmem:[%s6259_s4 + $0x230] sm:$0xff] }
 0x33c   : > { %4698 = vmatpush1.bf16.msra.mxu1 %v4697_v1  ;;  %v6565_v36 = vld [vmem:[#allocation2 + $0x20] sm:$0xff]  ;;  %v4743_v39 = vpack.c.bf16 %v4226_v35, %v4224_v34  ;;  %v4228_v43 = vld [vmem:[%s6259_s4 + $0x248] sm:$0xff]  ;;  %v4745_v47 = vpack.c.bf16 %v4225_v42, %v4223_v41  ;;  %v4229_v50 = vld [vmem:[%s6259_s4 + $0x250] sm:$0xff] }
 0x33d   : > { %4730 = vmatpush1.bf16.msra.mxu0 %v6531_v2  ;;  %4700 = vmatprep.subr.bf16.mxu1 %v4699_v3  ;;  %v1164_v37 = vld [vmem:[%s6569_s2] sm:$0xff]  ;;  %v1165_v46 = vld [vmem:[%s6569_s2 + $0x8] sm:$0xff]  ;;  %v6590_v54 = vld [vmem:[#allocation2 + $0x30] sm:$0xff] }
 0x33e   : > { %4732 = vmatprep.subr.bf16.mxu0 %v6537_v8  ;;  %v4230_v44 = vld [vmem:[%s6259_s4 + $0x258] sm:$0xff]  ;;  %v4227_v49 = vld [vmem:[%s6259_s4 + $0x240] sm:$0xff]  ;;  %v1166_v55 = vld [vmem:[%s6569_s2 + $0x10] sm:$0xff] }
 0x33f   : > { %v4747_v48 = vpack.c.bf16 %v4230_v44, %v4228_v43  ;;  %v4234_v52 = vld [vmem:[%s6259_s4 + $0x278] sm:$0xff]  ;;  %v4749_v56 = vpack.c.bf16 %v4229_v50, %v4227_v49  ;;  %v4233_v17 = vld [vmem:[%s6259_s4 + $0x270] sm:$0xff]  ;;  %v4236_v60 = vld [vmem:[%s6259_s4 + $0x288] sm:$0xff] }
 0x340   : > { %4702 = vmatpush1.bf16.msra.mxu1 %v4701_v15  ;;  %v4238_v61 = vld [vmem:[%s6259_s4 + $0x298] sm:$0xff]  ;;  %v4237_v3 = vld [vmem:[%s6259_s4 + $0x290] sm:$0xff]  ;;  %v4240_v4 = vld [vmem:[%s6259_s4 + $0x2a8] sm:$0xff] }
 0x341   : > { %4734 = vmatpush1.bf16.msra.mxu0 %v6545_v16  ;;  %4704 = vmatprep.subr.bf16.mxu1 %v4703_v18  ;;  %v6602_v62 = vld [vmem:[#allocation2 + $0x38] sm:$0xff]  ;;  %v4755_v1 = vpack.c.bf16 %v4238_v61, %v4236_v60  ;;  %v6614_v7 = vld [vmem:[#allocation2 + $0x40] sm:$0xff]  ;;  %v6626_v15 = vld [vmem:[#allocation2 + $0x48] sm:$0xff] }
 0x342   : > { %4736 = vmatprep.subr.bf16.mxu0 %v6550_v22  ;;  %v4242_v6 = vld [vmem:[%s6259_s4 + $0x2b8] sm:$0xff]  ;;  %v4239_v11 = vld [vmem:[%s6259_s4 + $0x2a0] sm:$0xff]  ;;  %v4241_v12 = vld [vmem:[%s6259_s4 + $0x2b0] sm:$0xff] }
 0x343   : > { %v4759_v10 = vpack.c.bf16 %v4242_v6, %v4240_v4  ;;  %v4246_v14 = vld [vmem:[%s6259_s4 + $0x2d8] sm:$0xff]  ;;  %v1169_v18 = vld [vmem:[%s6569_s2 + $0x28] sm:$0xff]  ;;  %v4761_v20 = vpack.c.bf16 %v4241_v12, %v4239_v11  ;;  %v4245_v23 = vld [vmem:[%s6259_s4 + $0x2d0] sm:$0xff] }
 0x344   : > { %4706 = vmatpush1.bf16.msra.mxu1 %v4705_v28  ;;  %v4243_v21 = vld [vmem:[%s6259_s4 + $0x2c0] sm:$0xff]  ;;  %v4250_v24 = vld [vmem:[%s6259_s4 + $0x2f8] sm:$0xff]  ;;  %v6638_v25 = vld [vmem:[#allocation2 + $0x50] sm:$0xff] }
 0x345   : > { %4738 = vmatpush1.bf16.msra.mxu0 %v6558_v29  ;;  %4835 = vmatprep.subr.bf16.mxu1 %v6450_v59  ;;  %v6578_v59 = vld [vmem:[#allocation2 + $0x28] sm:$0xff]  ;;  %v1170_v26 = vld [vmem:[%s6569_s2 + $0x30] sm:$0xff]  ;;  %v4765_v28 = vpack.c.bf16 %v4245_v23, %v4243_v21  ;;  %v1171_v33 = vld [vmem:[%s6569_s2 + $0x38] sm:$0xff] }
 0x346   : > { %4740 = vmatprep.subr.bf16.mxu0 %v4739_v30  ;;  %v4249_v31 = vld [vmem:[%s6259_s4 + $0x2f0] sm:$0xff]  ;;  %v1176_v41 = vld [vmem:[%s6569_s2 + $0x60] sm:$0xff]  ;;  %v1143_v42 = vld [vmem:[#allocation2 + $0x88] sm:$0xff] }
 0x347   : > { %1326 = vmatmul.mubr.f32.vlgmr.msra.gmra.mrb[0].mxu1 %v6565_v36  ;;  %v1140_v35 = vld [vmem:[#allocation2 + $0x70] sm:$0xff]  ;;  %v1177_v43 = vld [vmem:[%s6569_s2 + $0x68] sm:$0xff]  ;;  %v1146_v49 = vld [vmem:[#allocation2 + $0xe0] sm:$0xff] }
 0x348   : > { %1583 = vmatmul.mubr.f32.vlgmr.msra.gmra.mrb[0].mxu0 %v1164_v37  ;;  %4843 = vmatpush1.bf16.msra.mxu1 %v6455_v0  ;;  %v4232_v0 = vld [vmem:[%s6259_s4 + $0x268] sm:$0xff]  ;;  %v1141_v37 = vld [vmem:[#allocation2 + $0x78] sm:$0xff]  ;;  %v1154_v4 = vld [vmem:[#allocation2 + $0x120] sm:$0xff] }
 0x349   : > { %4742 = vmatpush1.bf16.msra.mxu0 %v4741_v38  ;;  %1331 = vmatprep.mubr.f32.mxu1 %v5891_v58  ;;  %v4751_v51 = vpack.c.bf16 %v4234_v52, %v4232_v0  ;;  %v1175_v38 = vld [vmem:[%s6569_s2 + $0x58] sm:$0xff]  ;;  %v1144_v44 = vld [vmem:[#allocation2 + $0x90] sm:$0xff]  ;;  %v1147_v0 = vld [vmem:[#allocation2 + $0xe8] sm:$0xff] }
 0x34a   : > { %1588 = vmatprep.mubr.f32.mxu0 %v5891_v58  ;;  %4744 = vmatprep.subr.bf16.mxu0 %v4743_v39  ;;  %v1142_v39 = vld [vmem:[#allocation2 + $0x80] sm:$0xff]  ;;  %v1151_v61 = vld [vmem:[#allocation2 + $0x108] sm:$0xff]  ;;  %v1157_v12 = vld [vmem:[#allocation2 + $0x138] sm:$0xff] }
 0x34b   : > { %1332 = vmatmul.mubr.f32.gmra.mrb[2].mxu1 %v6578_v59  ;;  %4836 = vmatprep.subr.bf16.mxu1 %v6461_v5  ;;  %v4231_v5 = vld [vmem:[%s6259_s4 + $0x260] sm:$0xff]  ;;  %v1160_v21 = vld [vmem:[#allocation2 + $0x150] sm:$0xff] }
 0x34c   : > { %1589 = vmatmul.mubr.f32.gmra.mrb[2].mxu0 %v1165_v46  ;;  %1337 = vmatprep.mubr.f32.mxu1 %v5891_v58  ;;  %v4753_v63 = vpack.c.bf16 %v4233_v17, %v4231_v5  ;;  %v1178_v46 = vld [vmem:[%s6569_s2 + $0x70] sm:$0xff]  ;;  %v1150_v17 = vld [vmem:[#allocation2 + $0x100] sm:$0xff] }
 0x34d   : > { %1594 = vmatprep.mubr.f32.mxu0 %v5891_v58  ;;  %4746 = vmatpush1.bf16.msra.mxu0 %v4745_v47  ;;  %v1145_v47 = vld [vmem:[#allocation2 + $0x98] sm:$0xff] }
 0x34e   : > { %4748 = vmatprep.subr.bf16.mxu0 %v4747_v48  ;;  %4844 = vmatpush1.bf16.msra.mxu1 %v6471_v13  ;;  %v1167_v13 = vld [vmem:[%s6569_s2 + $0x18] sm:$0xff] }
 0x34f   : > { %1338 = vmatmul.mubr.f32.gmra.mrb[4].mxu1 %v6590_v54  ;;  %4837 = vmatprep.subr.bf16.mxu1 %v6476_v19  ;;  %v4235_v19 = vld [vmem:[%s6259_s4 + $0x280] sm:$0xff]  ;;  %v1179_v48 = vld [vmem:[%s6569_s2 + $0x78] sm:$0xff] }
 0x350   : > { %1595 = vmatmul.mubr.f32.gmra.mrb[4].mxu0 %v1166_v55  ;;  %1343 = vmatprep.mubr.f32.mxu1 %v5891_v58  ;;  %v4757_v9 = vpack.c.bf16 %v4237_v3, %v4235_v19  ;;  %v1148_v55 = vld [vmem:[#allocation2 + $0xf0] sm:$0xff]  ;;  %v1153_v19 = vld [vmem:[#allocation2 + $0x118] sm:$0xff] }
 0x351   : > { %1600 = vmatprep.mubr.f32.mxu0 %v5891_v58  ;;  %4750 = vmatpush1.bf16.msra.mxu0 %v4749_v56 }
 0x352   : > { %4752 = vmatprep.subr.bf16.mxu0 %v4751_v51  ;;  %4845 = vmatpush1.bf16.msra.mxu1 %v6485_v27  ;;  %v1168_v27 = vld [vmem:[%s6569_s2 + $0x20] sm:$0xff]  ;;  %v1149_v51 = vld [vmem:[#allocation2 + $0xf8] sm:$0xff] }
 0x353   : > { %1344 = vmatmul.mubr.f32.gmra.mrb[6].mxu1 %v6602_v62  ;;  %4838 = vmatprep.subr.bf16.mxu1 %v6491_v32  ;;  %v4244_v32 = vld [vmem:[%s6259_s4 + $0x2c8] sm:$0xff] }
 0x354   : > { %1601 = vmatmul.mubr.f32.gmra.mrb[6].mxu0 %v1167_v13  ;;  %1349 = vmatprep.mubr.f32.mxu1 %v5891_v58 }
 0x355   : > { %1606 = vmatprep.mubr.f32.mxu0 %v5891_v58  ;;  %4754 = vmatpush1.bf16.msra.mxu0 %v4753_v63  ;;  %v1152_v63 = vld [vmem:[#allocation2 + $0x110] sm:$0xff] }
 0x356   : > { %4756 = vmatprep.subr.bf16.mxu0 %v4755_v1  ;;  %4846 = vmatpush1.bf16.msra.mxu1 %v6500_v40  ;;  %v4763_v40 = vpack.c.bf16 %v4246_v14, %v4244_v32  ;;  %v1158_v14 = vld [vmem:[#allocation2 + $0x140] sm:$0xff] }
 0x357   : > { %1350 = vmatmul.mubr.f32.gmra.mrb[8].mxu1 %v6614_v7  ;;  %4839 = vmatprep.subr.bf16.mxu1 %v6506_v45  ;;  %v4248_v45 = vld [vmem:[%s6259_s4 + $0x2e8] sm:$0xff] }
 0x358   : > { %1607 = vmatmul.mubr.f32.gmra.mrb[8].mxu0 %v1168_v27  ;;  %1355 = vmatprep.mubr.f32.mxu1 %v5891_v58  ;;  %v4767_v30 = vpack.c.bf16 %v4250_v24, %v4248_v45  ;;  %v1155_v27 = vld [vmem:[#allocation2 + $0x128] sm:$0xff]  ;;  %v1161_v45 = vld [vmem:[#allocation2 + $0x158] sm:$0xff] }
 0x359   : > { %1612 = vmatprep.mubr.f32.mxu0 %v5891_v58  ;;  %4758 = vmatpush1.bf16.msra.mxu0 %v4757_v9 }
 0x35a   : > { %4760 = vmatprep.subr.bf16.mxu0 %v4759_v10  ;;  %4847 = vmatpush1.bf16.msra.mxu1 %v6514_v53  ;;  %v4247_v53 = vld [vmem:[%s6259_s4 + $0x2e0] sm:$0xff]  ;;  %s6689_s4 = scalar_lea.vmem [#allocation2], %s6528_s30  ;;  %v1156_v10 = vld [vmem:[#allocation2 + $0x130] sm:$0xff] }
 0x35b   : > { %1356 = vmatmul.mubr.f32.gmra.mrb[10].mxu1 %v6626_v15  ;;  %4840 = vmatprep.subr.bf16.mxu1 %v6520_v57  ;;  %v6648_v57 = vld [vmem:[#allocation2 + $0x58] sm:$0xff]  ;;  %v4769_v34 = vpack.c.bf16 %v4249_v31, %v4247_v53  ;;  %v4187_v50 = vld [vmem:[%s6689_s4 + $0x20] sm:$0xff]  ;;  %v4188_v52 = vld [vmem:[%s6689_s4 + $0x28] sm:$0xff] }
 0x35c   : > { %1613 = vmatmul.mubr.f32.gmra.mrb[10].mxu0 %v1169_v18  ;;  %1361 = vmatprep.mubr.f32.mxu1 %v5891_v58  ;;  %v4189_v56 = vld [vmem:[%s6689_s4 + $0x30] sm:$0xff]  ;;  %v4190_v5 = vld [vmem:[%s6689_s4 + $0x38] sm:$0xff]  ;;  %v4191_v60 = vld [vmem:[%s6689_s4 + $0x40] sm:$0xff] }
 0x35d   : > { %1618 = vmatprep.mubr.f32.mxu0 %v5891_v58  ;;  %4762 = vmatpush1.bf16.msra.mxu0 %v4761_v20  ;;  %v4192_v13 = vld [vmem:[%s6689_s4 + $0x48] sm:$0xff]  ;;  %v4193_v1 = vld [vmem:[%s6689_s4 + $0x50] sm:$0xff]  ;;  %v4194_v3 = vld [vmem:[%s6689_s4 + $0x58] sm:$0xff] }
 0x35e   : > { %4764 = vmatprep.subr.bf16.mxu0 %v4763_v40  ;;  %4848 = vmatpush1.bf16.msra.mxu1 %v6531_v2  ;;  %v6656_v2 = vld [vmem:[#allocation2 + $0x60] sm:$0xff]  ;;  %v4196_v9 = vld [vmem:[%s6689_s4 + $0x68] sm:$0xff]  ;;  %v4197_v11 = vld [vmem:[%s6689_s4 + $0x70] sm:$0xff] }
 0x35f   : > { %1362 = vmatmul.mubr.f32.gmra.mrb[12].mxu1 %v6638_v25  ;;  %4841 = vmatprep.subr.bf16.mxu1 %v6537_v8  ;;  %v1172_v8 = vld [vmem:[%s6569_s2 + $0x40] sm:$0xff]  ;;  %v4198_v32 = vld [vmem:[%s6689_s4 + $0x78] sm:$0xff]  ;;  %v1159_v20 = vld [vmem:[#allocation2 + $0x148] sm:$0xff] }
 0x360   : > { %1619 = vmatmul.mubr.f32.gmra.mrb[12].mxu0 %v1170_v26  ;;  %1367 = vmatprep.mubr.f32.mxu1 %v5891_v58  ;;  %v4195_v6 = vld [vmem:[%s6689_s4 + $0x60] sm:$0xff]  ;;  %v4200_v40 = vld [vmem:[%s6689_s4 + $0x88] sm:$0xff]  ;;  %v4201_v23 = vld [vmem:[%s6689_s4 + $0x90] sm:$0xff] }
 0x361   : > { %1624 = vmatprep.mubr.f32.mxu0 %v5891_v58  ;;  %4766 = vmatpush1.bf16.msra.mxu0 %v4765_v28  ;;  %v4199_v18 = vld [vmem:[%s6689_s4 + $0x80] sm:$0xff]  ;;  %v4202_v24 = vld [vmem:[%s6689_s4 + $0x98] sm:$0xff]  ;;  %v4204_v53 = vld [vmem:[%s6689_s4 + $0xe8] sm:$0xff] }
 0x362   : > { %4768 = vmatprep.subr.bf16.mxu0 %v4767_v30  ;;  %4849 = vmatpush1.bf16.msra.mxu1 %v6545_v16  ;;  %v6663_v16 = vld [vmem:[#allocation2 + $0x68] sm:$0xff]  ;;  %v1180_v26 = vld [vmem:[%s6569_s2 + $0xc0] sm:$0xff]  ;;  %v1182_v31 = vld [vmem:[%s6569_s2 + $0xd0] sm:$0xff] }
 0x363   : > { %1368 = vmatmul.mubr.f32.gmra.mrb[14].mxu1 %v6648_v57  ;;  %4842 = vmatprep.subr.bf16.mxu1 %v6550_v22  ;;  %v1173_v22 = vld [vmem:[%s6569_s2 + $0x48] sm:$0xff]  ;;  %v4203_v28 = vld [vmem:[%s6689_s4 + $0xe0] sm:$0xff] }
 0x364   : > { %1625 = vmatmul.mubr.f32.gmra.mrb[14].mxu0 %v1171_v33  ;;  %1373 = vmatprep.mubr.f32.mxu1 %v5891_v58  ;;  %v1181_v30 = vld [vmem:[%s6569_s2 + $0xc8] sm:$0xff]  ;;  %v4205_v33 = vld [vmem:[%s6689_s4 + $0xf0] sm:$0xff] }
 0x365   : > { %1630 = vmatprep.mubr.f32.mxu0 %v5891_v58  ;;  %4770 = vmatpush1.bf16.msra.mxu0 %v4769_v34  ;;  %v1183_v34 = vld [vmem:[%s6569_s2 + $0xd8] sm:$0xff] }
 0x366   : > { %4850 = vmatpush1.bf16.msra.mxu1 %v6558_v29  ;;  %v1174_v29 = vld [vmem:[%s6569_s2 + $0x50] sm:$0xff] }
 0x367   : > { %1374 = vmatmul.mubr.f32.gmra.mrb[16].mxu1 %v6656_v2 }
 0x368   : > { %1631 = vmatmul.mubr.f32.gmra.mrb[16].mxu0 %v1172_v8  ;;  %1379 = vmatprep.mubr.f32.mxu1 %v5891_v58  ;;  %v4206_v8 = vld [vmem:[%s6689_s4 + $0xf8] sm:$0xff] }
 0x369   : > { %1636 = vmatprep.mubr.f32.mxu0 %v5891_v58 }
 0x36b   : > { %1380 = vmatmul.mubr.f32.gmra.mrb[18].mxu1 %v6663_v16 }
 0x36c   : > { %1637 = vmatmul.mubr.f32.gmra.mrb[18].mxu0 %v1173_v22  ;;  %1385 = vmatprep.mubr.f32.mxu1 %v5891_v58  ;;  %v1184_v22 = vld [vmem:[%s6569_s2 + $0xe0] sm:$0xff] }
 0x36d   : > { %1642 = vmatprep.mubr.f32.mxu0 %v5891_v58 }
 0x36f   : > { %1386 = vmatmul.mubr.f32.gmra.mrb[20].mxu1 %v1140_v35  ;;  %v4207_v35 = vld [vmem:[%s6689_s4 + $0x100] sm:$0xff] }
 0x370   : > { %1643 = vmatmul.mubr.f32.gmra.mrb[20].mxu0 %v1174_v29  ;;  %1391 = vmatprep.mubr.f32.mxu1 %v5891_v58  ;;  %v1185_v29 = vld [vmem:[%s6569_s2 + $0xe8] sm:$0xff] }
 0x371   : > { %1648 = vmatprep.mubr.f32.mxu0 %v5891_v58 }
 0x373   : > { %1392 = vmatmul.mubr.f32.gmra.mrb[22].mxu1 %v1141_v37  ;;  %v4208_v37 = vld [vmem:[%s6689_s4 + $0x108] sm:$0xff] }
 0x374   : > { %1649 = vmatmul.mubr.f32.gmra.mrb[22].mxu0 %v1175_v38  ;;  %1397 = vmatprep.mubr.f32.mxu1 %v5891_v58  ;;  %v1186_v38 = vld [vmem:[%s6569_s2 + $0xf0] sm:$0xff] }
 0x375   : > { %1654 = vmatprep.mubr.f32.mxu0 %v5891_v58 }
 0x377   : > { %1398 = vmatmul.mubr.f32.gmra.mrb[24].mxu1 %v1142_v39  ;;  %v4209_v39 = vld [vmem:[%s6689_s4 + $0x110] sm:$0xff] }
 0x378   : > { %1655 = vmatmul.mubr.f32.gmra.mrb[24].mxu0 %v1176_v41  ;;  %1403 = vmatprep.mubr.f32.mxu1 %v5891_v58  ;;  %v1187_v41 = vld [vmem:[%s6569_s2 + $0xf8] sm:$0xff] }
 0x379   : > { %1660 = vmatprep.mubr.f32.mxu0 %v5891_v58 }
 0x37b   : > { %1404 = vmatmul.mubr.f32.gmra.mrb[26].mxu1 %v1143_v42  ;;  %v4210_v42 = vld [vmem:[%s6689_s4 + $0x118] sm:$0xff] }
 0x37c   : > { %1661 = vmatmul.mubr.f32.gmra.mrb[26].mxu0 %v1177_v43  ;;  %1409 = vmatprep.mubr.f32.mxu1 %v5891_v58  ;;  %v1188_v43 = vld [vmem:[%s6569_s2 + $0x100] sm:$0xff] }
 0x37d   : > { %1666 = vmatprep.mubr.f32.mxu0 %v5891_v58 }
 0x37f   : > { %1410 = vmatmul.mubr.f32.gmra.mrb[28].mxu1 %v1144_v44  ;;  %v4211_v44 = vld [vmem:[%s6689_s4 + $0x120] sm:$0xff] }
 0x380   : > { %1667 = vmatmul.mubr.f32.gmra.mrb[28].mxu0 %v1178_v46  ;;  %1415 = vmatprep.mubr.f32.mxu1 %v5891_v58  ;;  %v1189_v46 = vld [vmem:[%s6569_s2 + $0x108] sm:$0xff] }
 0x381   : > { %1672 = vmatprep.mubr.f32.mxu0 %v5891_v58 }
 0x383   : > { %1416 = vmatmul.mubr.f32.gmra.mrb[30].mxu1 %v1145_v47  ;;  %v4212_v47 = vld [vmem:[%s6689_s4 + $0x128] sm:$0xff] }
 0x384   : > { %1673 = vmatmul.mubr.f32.gmra.mrb[30].mxu0 %v1179_v48  ;;  %1421 = vmatprep.mubr.f32.mxu1 %v5891_v58  ;;  %v1190_v48 = vld [vmem:[%s6569_s2 + $0x110] sm:$0xff] }
 0x385   : > { %1906 = vmatprep.mubr.f32.mxu0 %v5891_v58 }
 0x387   : > { %1422 = vmatmul.mubr.f32.gmra.mrb[32].mxu1 %v1146_v49  ;;  %v4213_v49 = vld [vmem:[%s6689_s4 + $0x130] sm:$0xff] }
 0x388   : > { %1907 = vmatmul.mubr.f32.vlgmr.msra.gmra.mrb[0].mxu0 %v4187_v50  ;;  %1427 = vmatprep.mubr.f32.mxu1 %v5891_v58  ;;  %v1191_v50 = vld [vmem:[%s6569_s2 + $0x118] sm:$0xff] }
 0x389   : > { %1912 = vmatprep.mubr.f32.mxu0 %v5891_v58 }
 0x38b   : > { %1428 = vmatmul.mubr.f32.gmra.mrb[34].mxu1 %v1147_v0  ;;  %v4214_v0 = vld [vmem:[%s6689_s4 + $0x138] sm:$0xff] }
 0x38c   : > { %1913 = vmatmul.mubr.f32.gmra.mrb[2].mxu0 %v4188_v52  ;;  %1433 = vmatprep.mubr.f32.mxu1 %v5891_v58  ;;  %v1192_v52 = vld [vmem:[%s6569_s2 + $0x120] sm:$0xff] }
 0x38d   : > { %1918 = vmatprep.mubr.f32.mxu0 %v5891_v58 }
 0x38f   : > { %1434 = vmatmul.mubr.f32.gmra.mrb[36].mxu1 %v1148_v55  ;;  %v4215_v55 = vld [vmem:[%s6689_s4 + $0x140] sm:$0xff] }
 0x390   : > { %1919 = vmatmul.mubr.f32.gmra.mrb[4].mxu0 %v4189_v56  ;;  %1439 = vmatprep.mubr.f32.mxu1 %v5891_v58  ;;  %v1193_v56 = vld [vmem:[%s6569_s2 + $0x128] sm:$0xff] }
 0x391   : > { %1924 = vmatprep.mubr.f32.mxu0 %v5891_v58 }
 0x393   : > { %1440 = vmatmul.mubr.f32.gmra.mrb[38].mxu1 %v1149_v51  ;;  %v4216_v51 = vld [vmem:[%s6689_s4 + $0x148] sm:$0xff] }
 0x394   : > { %1925 = vmatmul.mubr.f32.gmra.mrb[6].mxu0 %v4190_v5  ;;  %1445 = vmatprep.mubr.f32.mxu1 %v5891_v58  ;;  %v1194_v5 = vld [vmem:[%s6569_s2 + $0x130] sm:$0xff] }
 0x395   : > { %1930 = vmatprep.mubr.f32.mxu0 %v5891_v58 }
 0x397   : > { %1446 = vmatmul.mubr.f32.gmra.mrb[40].mxu1 %v1150_v17  ;;  %v4217_v17 = vld [vmem:[%s6689_s4 + $0x150] sm:$0xff] }
 0x398   : > { %1931 = vmatmul.mubr.f32.gmra.mrb[8].mxu0 %v4191_v60  ;;  %1451 = vmatprep.mubr.f32.mxu1 %v5891_v58  ;;  %v1195_v60 = vld [vmem:[%s6569_s2 + $0x138] sm:$0xff] }
 0x399   : > { %1936 = vmatprep.mubr.f32.mxu0 %v5891_v58 }
 0x39b   : > { %1452 = vmatmul.mubr.f32.gmra.mrb[42].mxu1 %v1151_v61  ;;  %v4218_v61 = vld [vmem:[%s6689_s4 + $0x158] sm:$0xff] }
 0x39c   : > { %1937 = vmatmul.mubr.f32.gmra.mrb[10].mxu0 %v4192_v13  ;;  %1457 = vmatprep.mubr.f32.mxu1 %v5891_v58 }
 0x39d   : > { %1942 = vmatprep.mubr.f32.mxu0 %v5891_v58 }
 0x39f   : > { %1458 = vmatmul.mubr.f32.gmra.mrb[44].mxu1 %v1152_v63 }
 0x3a0   : > { %1943 = vmatmul.mubr.f32.gmra.mrb[12].mxu0 %v4193_v1  ;;  %1463 = vmatprep.mubr.f32.mxu1 %v5891_v58 }
 0x3a1   : > { %1948 = vmatprep.mubr.f32.mxu0 %v5891_v58 }
 0x3a3   : > { %1464 = vmatmul.mubr.f32.gmra.mrb[46].mxu1 %v1153_v19 }
 0x3a4   : > { %1949 = vmatmul.mubr.f32.gmra.mrb[14].mxu0 %v4194_v3  ;;  %1469 = vmatprep.mubr.f32.mxu1 %v5891_v58 }
 0x3a5   : > { %1954 = vmatprep.mubr.f32.mxu0 %v5891_v58 }
 0x3a7   : > { %1470 = vmatmul.mubr.f32.gmra.mrb[48].mxu1 %v1154_v4 }
 0x3a8   : > { %1955 = vmatmul.mubr.f32.gmra.mrb[16].mxu0 %v4195_v6  ;;  %1475 = vmatprep.mubr.f32.mxu1 %v5891_v58 }
 0x3a9   : > { %1960 = vmatprep.mubr.f32.mxu0 %v5891_v58 }
 0x3ab   : > { %1476 = vmatmul.mubr.f32.gmra.mrb[50].mxu1 %v1155_v27 }
 0x3ac   : > { %1961 = vmatmul.mubr.f32.gmra.mrb[18].mxu0 %v4196_v9  ;;  %1481 = vmatprep.mubr.f32.mxu1 %v5891_v58 }
 0x3ad   : > { %1966 = vmatprep.mubr.f32.mxu0 %v5891_v58 }
 0x3af   : > { %1482 = vmatmul.mubr.f32.gmra.mrb[52].mxu1 %v1156_v10 }
 0x3b0   : > { %1967 = vmatmul.mubr.f32.gmra.mrb[20].mxu0 %v4197_v11  ;;  %1487 = vmatprep.mubr.f32.mxu1 %v5891_v58 }
 0x3b1   : > { %1972 = vmatprep.mubr.f32.mxu0 %v5891_v58 }
 0x3b3   : > { %1488 = vmatmul.mubr.f32.gmra.mrb[54].mxu1 %v1157_v12 }
 0x3b4   : > { %1973 = vmatmul.mubr.f32.gmra.mrb[22].mxu0 %v4198_v32  ;;  %1493 = vmatprep.mubr.f32.mxu1 %v5891_v58 }
 0x3b5   : > { %1978 = vmatprep.mubr.f32.mxu0 %v5891_v58 }
 0x3b7   : > { %1494 = vmatmul.mubr.f32.gmra.mrb[56].mxu1 %v1158_v14 }
 0x3b8   : > { %1979 = vmatmul.mubr.f32.gmra.mrb[24].mxu0 %v4199_v18  ;;  %1499 = vmatprep.mubr.f32.mxu1 %v5891_v58 }
 0x3b9   : > { %1984 = vmatprep.mubr.f32.mxu0 %v5891_v58 }
 0x3bb   : > { %1500 = vmatmul.mubr.f32.gmra.mrb[58].mxu1 %v1159_v20 }
 0x3bc   : > { %1985 = vmatmul.mubr.f32.gmra.mrb[26].mxu0 %v4200_v40  ;;  %1505 = vmatprep.mubr.f32.mxu1 %v5891_v58 }
 0x3bd   : > { %1990 = vmatprep.mubr.f32.mxu0 %v5891_v58 }
 0x3bf   : > { %1506 = vmatmul.mubr.f32.gmra.mrb[60].mxu1 %v1160_v21 }
 0x3c0   : > { %1991 = vmatmul.mubr.f32.gmra.mrb[28].mxu0 %v4201_v23  ;;  %1511 = vmatprep.mubr.f32.mxu1 %v5891_v58 }
 0x3c1   : > { %1996 = vmatprep.mubr.f32.mxu0 %v5891_v58 }
 0x3c3   : > { %1512 = vmatmul.mubr.f32.gmra.mrb[62].mxu1 %v1161_v45 }
 0x3c4   : > { %1997 = vmatmul.mubr.f32.gmra.mrb[30].mxu0 %v4202_v24  ;;  %1678 = vmatprep.mubr.f32.mxu1 %v5891_v58 }
 0x3c5   : > { %2002 = vmatprep.mubr.f32.mxu0 %v5891_v58 }
 0x3c7   : > { %1679 = vmatmul.mubr.f32.vlgmr.msra.gmra.mrb[32].mxu1 %v1180_v26 }
 0x3c8   : > { %2003 = vmatmul.mubr.f32.gmra.mrb[32].mxu0 %v4203_v28  ;;  %1684 = vmatprep.mubr.f32.mxu1 %v5891_v58 }
 0x3c9   : > { %2008 = vmatprep.mubr.f32.mxu0 %v5891_v58 }
 0x3cb   : > { %1685 = vmatmul.mubr.f32.gmra.mrb[34].mxu1 %v1181_v30 }
 0x3cc   : > { %2009 = vmatmul.mubr.f32.gmra.mrb[34].mxu0 %v4204_v53  ;;  %1690 = vmatprep.mubr.f32.mxu1 %v5891_v58 }
 0x3cd   : > { %2014 = vmatprep.mubr.f32.mxu0 %v5891_v58 }
 0x3cf   : > { %1691 = vmatmul.mubr.f32.gmra.mrb[36].mxu1 %v1182_v31 }
 0x3d0   : > { %2015 = vmatmul.mubr.f32.gmra.mrb[36].mxu0 %v4205_v33  ;;  %1696 = vmatprep.mubr.f32.mxu1 %v5891_v58  ;;  %v2165_v33 = vlaneseq }
 0x3d1   : > { %2020 = vmatprep.mubr.f32.mxu0 %v5891_v58 }
 0x3d3   : > { %1697 = vmatmul.mubr.f32.gmra.mrb[38].mxu1 %v1183_v34 }
 0x3d4   : > { %2021 = vmatmul.mubr.f32.gmra.mrb[38].mxu0 %v4206_v8  ;;  %1702 = vmatprep.mubr.f32.mxu1 %v5891_v58 }
 0x3d5   : > { %2026 = vmatprep.mubr.f32.mxu0 %v5891_v58 }
 0x3d7   : > { %1703 = vmatmul.mubr.f32.gmra.mrb[40].mxu1 %v1184_v22  ;;  %v2166_v22 = vshrl.u32 %v2165_v33, 7 }
 0x3d8   : > { %2027 = vmatmul.mubr.f32.gmra.mrb[40].mxu0 %v4207_v35  ;;  %1708 = vmatprep.mubr.f32.mxu1 %v5891_v58 }
 0x3d9   : > { %2032 = vmatprep.mubr.f32.mxu0 %v5891_v58 }
 0x3db   : > { %1709 = vmatmul.mubr.f32.gmra.mrb[42].mxu1 %v1185_v29 }
 0x3dc   : > { %2033 = vmatmul.mubr.f32.gmra.mrb[42].mxu0 %v4208_v37  ;;  %1714 = vmatprep.mubr.f32.mxu1 %v5891_v58  ;;  %v6843_v37 = vsub.s32 0, %v2166_v22 }
 0x3dd   : > { %2038 = vmatprep.mubr.f32.mxu0 %v5891_v58 }
 0x3df   : > { %1715 = vmatmul.mubr.f32.gmra.mrb[44].mxu1 %v1186_v38 }
 0x3e0   : > { %2039 = vmatmul.mubr.f32.gmra.mrb[44].mxu0 %v4209_v39  ;;  %1720 = vmatprep.mubr.f32.mxu1 %v5891_v58  ;;  %v2163_v39 = vld [vmem:[%s440_s21] sm:$0x3] }
 0x3e1   : > { %2044 = vmatprep.mubr.f32.mxu0 %v5891_v58 }
 0x3e3   : > { %1721 = vmatmul.mubr.f32.gmra.mrb[46].mxu1 %v1187_v41  ;;  %v6850_v41 = vrot.slane %v2163_v39, %v6843_v37 }
 0x3e4   : > { %2045 = vmatmul.mubr.f32.gmra.mrb[46].mxu0 %v4210_v42  ;;  %1726 = vmatprep.mubr.f32.mxu1 %v5891_v58 }
 0x3e5   : > { %2050 = vmatprep.mubr.f32.mxu0 %v5891_v58 }
 0x3e7   : > { %1727 = vmatmul.mubr.f32.gmra.mrb[48].mxu1 %v1188_v43 }
 0x3e8   : > { %2051 = vmatmul.mubr.f32.gmra.mrb[48].mxu0 %v4211_v44  ;;  %1732 = vmatprep.mubr.f32.mxu1 %v5891_v58 }
 0x3e9   : > { %2056 = vmatprep.mubr.f32.mxu0 %v5891_v58 }
 0x3eb   : > { %1733 = vmatmul.mubr.f32.gmra.mrb[50].mxu1 %v1189_v46 }
 0x3ec   : > { %2057 = vmatmul.mubr.f32.gmra.mrb[50].mxu0 %v4212_v47  ;;  %1738 = vmatprep.mubr.f32.mxu1 %v5891_v58 }
 0x3ed   : > { %2062 = vmatprep.mubr.f32.mxu0 %v5891_v58 }
 0x3ef   : > { %1739 = vmatmul.mubr.f32.gmra.mrb[52].mxu1 %v1190_v48 }
 0x3f0   : > { %2063 = vmatmul.mubr.f32.gmra.mrb[52].mxu0 %v4213_v49  ;;  %1744 = vmatprep.mubr.f32.mxu1 %v5891_v58 }
 0x3f1   : > { %2068 = vmatprep.mubr.f32.mxu0 %v5891_v58 }
 0x3f3   : > { %1745 = vmatmul.mubr.f32.gmra.mrb[54].mxu1 %v1191_v50 }
 0x3f4   : > { %2069 = vmatmul.mubr.f32.gmra.mrb[54].mxu0 %v4214_v0  ;;  %1750 = vmatprep.mubr.f32.mxu1 %v5891_v58 }
 0x3f5   : > { %2074 = vmatprep.mubr.f32.mxu0 %v5891_v58 }
 0x3f7   : > { %1751 = vmatmul.mubr.f32.gmra.mrb[56].mxu1 %v1192_v52 }
 0x3f8   : > { %2075 = vmatmul.mubr.f32.gmra.mrb[56].mxu0 %v4215_v55  ;;  %1756 = vmatprep.mubr.f32.mxu1 %v5891_v58 }
 0x3f9   : > { %2080 = vmatprep.mubr.f32.mxu0 %v5891_v58 }
 0x3fb   : > { %1757 = vmatmul.mubr.f32.gmra.mrb[58].mxu1 %v1193_v56 }
 0x3fc   : > { %2081 = vmatmul.mubr.f32.gmra.mrb[58].mxu0 %v4216_v51  ;;  %1762 = vmatprep.mubr.f32.mxu1 %v5891_v58 }
 0x3fd   : > { %2086 = vmatprep.mubr.f32.mxu0 %v5891_v58 }
 0x3ff   : > { %1763 = vmatmul.mubr.f32.gmra.mrb[60].mxu1 %v1194_v5 }
 0x400   : > { %2087 = vmatmul.mubr.f32.gmra.mrb[60].mxu0 %v4217_v17  ;;  %1768 = vmatprep.mubr.f32.mxu1 %v5891_v58 }
 0x401   : > { %2092 = vmatprep.mubr.f32.mxu0 %v5891_v58 }
 0x403   : > { %1769 = vmatmul.mubr.f32.gmra.mrb[62].mxu1 %v1195_v60 }
 0x404   : > { %2093 = vmatmul.mubr.f32.gmra.mrb[62].mxu0 %v4218_v61 }
 0x41a   : > { %v1327_v13 = vpop.f32.mrb[0].mxu1 }
 0x41b   : > { %v1329_v63 = vpop.f32.mrb[1].mxu1 }
 0x41e   : > { %v1333_v1 = vpop.f32.mrb[2].mxu1 }
 0x41f   : > { %v1335_v19 = vpop.f32.mrb[3].mxu1 }
 0x422   : > { %v1339_v3 = vpop.f32.mrb[4].mxu1 }
 0x423   : > { %v1341_v4 = vpop.f32.mrb[5].mxu1 }
 0x426   : > { %v1345_v6 = vpop.f32.mrb[6].mxu1 }
 0x427   : > { %v1347_v27 = vpop.f32.mrb[7].mxu1 }
 0x42a   : > { %v1351_v9 = vpop.f32.mrb[8].mxu1 }
 0x42b   : > { %v1353_v10 = vpop.f32.mrb[9].mxu1 }
 0x42e   : > { %v6801_v11 = vpop.f32.mrb[10].mxu1 }
 0x42f   : > { %v6803_v12 = vpop.f32.mrb[11].mxu1 }
 0x432   : > { %v6805_v32 = vpop.f32.mrb[12].mxu1 }
 0x433   : > { %v6807_v58 = vpop.f32.mrb[13].mxu1 }
 0x436   : > { %v6809_v14 = vpop.f32.mrb[14].mxu1 }
 0x437   : > { %v6811_v18 = vpop.f32.mrb[15].mxu1 }
 0x43a   : > { %v6813_v20 = vpop.f32.mrb[16].mxu1 }
 0x43b   : > { %v6815_v40 = vpop.f32.mrb[17].mxu1 }
 0x43e   : > { %v6817_v21 = vpop.f32.mrb[18].mxu1 }
 0x43f   : > { %v6819_v23 = vpop.f32.mrb[19].mxu1 }
 0x442   : > { %v6821_v45 = vpop.f32.mrb[20].mxu1 }
 0x443   : > { %v6823_v24 = vpop.f32.mrb[21].mxu1 }
 0x446   : > { %v6825_v26 = vpop.f32.mrb[22].mxu1 }
 0x447   : > { %v6827_v28 = vpop.f32.mrb[23].mxu1 }
 0x44a   : > { %v6829_v30 = vpop.f32.mrb[24].mxu1 }
 0x44b   : > { %v6831_v53 = vpop.f32.mrb[25].mxu1 }
 0x44e   : > { %v6833_v31 = vpop.f32.mrb[26].mxu1 }
 0x44f   : > { %v6835_v34 = vpop.f32.mrb[27].mxu1 }
 0x452   : > { %v6837_v8 = vpop.f32.mrb[28].mxu1 }
 0x453   : > { %v6839_v35 = vpop.f32.mrb[29].mxu1 }
 0x456   : > { %v6841_v29 = vpop.f32.mrb[30].mxu1 }
 0x457   : > { %v6845_v38 = vpop.f32.mrb[31].mxu1 }
 0x45b   : > { %v1908_v42 = vpop.f32.mrb[0].mxu0 }
 0x45c   : > { %v4851_v43 = vadd.f32 %v1908_v42, %v1327_v13  ;;  %v1910_v44 = vpop.f32.mrb[1].mxu0 }
 0x45d   : > { %v4852_v46 = vadd.f32 %v1910_v44, %v1329_v63 }
 0x45e   : > { %v2175_v47 = vadd.f32 %v4851_v43, %v6850_v41 }
 0x45f   : > { %v1914_v48 = vpop.f32.mrb[2].mxu0 }
 0x460   : > { %v4251_v49 = vmul.f32 -1.442695, %v2175_v47  ;;  %v4853_v50 = vadd.f32 %v1914_v48, %v1333_v1  ;;  %v1916_v0 = vpop.f32.mrb[3].mxu0 }
 0x461   : > { %v6853_v52 = vadd.f32 %v1916_v0, %v1335_v19 }
 0x462   : > { %5113 = vpow2.f32 %v4251_v49  ;;  %v2177_v55 = vadd.f32 %v4853_v50, %v6850_v41 }
 0x463   : > { %v1920_v56 = vpop.f32.mrb[4].mxu0 }
 0x464   : > { %v4252_v51 = vmul.f32 -1.442695, %v2177_v55  ;;  %v4855_v5 = vadd.f32 %v1920_v56, %v1339_v3  ;;  %v1922_v17 = vpop.f32.mrb[5].mxu0  ;;  %v6865_v55 = vsub.s32 1, %v2166_v22 }
 0x465   : > { %v6856_v60 = vadd.f32 %v1922_v17, %v1341_v4 }
 0x466   : > { %5115 = vpow2.f32 %v4252_v51  ;;  %v2179_v61 = vadd.f32 %v4855_v5, %v6850_v41 }
 0x467   : > { %v1926_v13 = vpop.f32.mrb[6].mxu0 }
 0x468   : > { %v4253_v63 = vmul.f32 -1.442695, %v2179_v61  ;;  %v4857_v33 = vadd.f32 %v1926_v13, %v1345_v6  ;;  %v1928_v42 = vpop.f32.mrb[7].mxu0  ;;  %v6873_v13 = vrot.slane %v2163_v39, %v6865_v55 }
 0x469   : > { %v6859_v1 = vadd.f32 %v1928_v42, %v1347_v27 }
 0x46a   : > { %5117 = vpow2.f32 %v4253_v63  ;;  %v2181_v19 = vadd.f32 %v4857_v33, %v6850_v41 }
 0x46b   : > { %v1932_v43 = vpop.f32.mrb[8].mxu0 }
 0x46c   : > { %v5114_v44 = vpop.eup %5113  ;;  %v4254_v47 = vmul.f32 -1.442695, %v2181_v19  ;;  %v4859_v48 = vadd.f32 %v1932_v43, %v1351_v9  ;;  %v1934_v3 = vpop.f32.mrb[9].mxu0 }
 0x46d   : > { %v2335_v49 = vadd.f32 1.0, %v5114_v44  ;;  %v6862_v4 = vadd.f32 %v1934_v3, %v1353_v10  ;;  %v2176_v44 = vadd.f32 %v4852_v46, %v6873_v13  ;;  %v2178_v46 = vadd.f32 %v6853_v52, %v6873_v13 }
 0x46e   : > { %5119 = vpow2.f32 %v4254_v47  ;;  %v2183_v50 = vadd.f32 %v4859_v48, %v6850_v41 }
 0x46f   : > { %5121 = vrcp.f32 %v2335_v49  ;;  %v1938_v0 = vpop.f32.mrb[10].mxu0 }
 0x470   : > { %v5116_v6 = vpop.eup %5115  ;;  %v4255_v27 = vmul.f32 -1.442695, %v2183_v50  ;;  %v4861_v56 = vadd.f32 %v1938_v0, %v6801_v11  ;;  %v1940_v51 = vpop.f32.mrb[11].mxu0 }
 0x471   : > { %v2336_v5 = vadd.f32 1.0, %v5116_v6  ;;  %v6869_v17 = vadd.f32 %v1940_v51, %v6803_v12 }
 0x472   : > { %5123 = vpow2.f32 %v4255_v27  ;;  %v2185_v9 = vadd.f32 %v4861_v56, %v6850_v41 }
 0x473   : > { %5125 = vrcp.f32 %v2336_v5  ;;  %v1944_v10 = vpop.f32.mrb[12].mxu0 }
 0x474   : > { %v5118_v61 = vpop.eup %5117  ;;  %v4256_v63 = vmul.f32 -1.442695, %v2185_v9  ;;  %v4863_v22 = vadd.f32 %v1944_v10, %v6805_v32  ;;  %v1946_v33 = vpop.f32.mrb[13].mxu0 }
 0x475   : > { %v2337_v42 = vadd.f32 1.0, %v5118_v61  ;;  %v6877_v11 = vadd.f32 %v1946_v33, %v6807_v58 }
 0x476   : > { %5127 = vpow2.f32 %v4256_v63  ;;  %v2187_v12 = vadd.f32 %v4863_v22, %v6850_v41 }
 0x477   : > { %5129 = vrcp.f32 %v2337_v42  ;;  %v1950_v19 = vpop.f32.mrb[14].mxu0 }
 0x478   : > { %v5120_v43 = vpop.eup %5119  ;;  %v4257_v47 = vmul.f32 -1.442695, %v2187_v12  ;;  %v4865_v39 = vadd.f32 %v1950_v19, %v6809_v14  ;;  %v1952_v48 = vpop.f32.mrb[15].mxu0 }
 0x479   : > { %v5122_v3 = vpop.eup %5121  ;;  %v2338_v49 = vadd.f32 1.0, %v5120_v43  ;;  %v6883_v32 = vadd.f32 %v1952_v48, %v6811_v18 }
 0x47a   : > { %v2431_v50 = vmul.f32 %v5122_v3, %v2176_v44  ;;  %v2463_v58 = vsub.f32 1.0, %v5122_v3  ;;  %5131 = vpow2.f32 %v4257_v47  ;;  %v2189_v0 = vadd.f32 %v4865_v39, %v6850_v41 }
 0x47b   : > { %5133 = vrcp.f32 %v2338_v49  ;;  %v1956_v6 = vpop.f32.mrb[16].mxu0 }
 0x47c   : > { %v5124_v27 = vpop.eup %5123  ;;  %v2495_v56 = vmul.f32 %v2463_v58, %v6565_v36  ;;  %v4258_v14 = vmul.f32 -1.442695, %v2189_v0  ;;  %v4867_v51 = vadd.f32 %v1956_v6, %v6813_v20  ;;  %v1958_v5 = vpop.f32.mrb[17].mxu0  ;;  %v2180_v20 = vadd.f32 %v6856_v60, %v6873_v13 }
 0x47d   : > { %v5126_v9 = vpop.eup %5125  ;;  %v2339_v18 = vadd.f32 1.0, %v5124_v27  ;;  %v6891_v10 = vadd.f32 %v1958_v5, %v6815_v40 }
 0x47e   : > { %v2527_v61 = vadd.f32 %v2495_v56, %v2431_v50  ;;  %v2432_v63 = vmul.f32 %v5126_v9, %v2178_v46  ;;  %v2464_v22 = vsub.f32 1.0, %v5126_v9  ;;  %5135 = vpow2.f32 %v4258_v14 }
 0x47f   : > { %5137 = vrcp.f32 %v2339_v18  ;;  %v2191_v33 = vadd.f32 %v4867_v51, %v6850_v41  ;;  %v1962_v36 = vpop.f32.mrb[18].mxu0 }
 0x480   : > { %v5128_v42 = vpop.eup %5127  ;;  %2559 = vst [vmem:[#allocation2 + $0x20] sm:$0xff] %v2527_v61  ;;  %v2496_v52 = vmul.f32 %v2464_v22, %v6578_v59  ;;  %v4869_v12 = vadd.f32 %v1962_v36, %v6817_v21  ;;  %v1964_v19 = vpop.f32.mrb[19].mxu0  ;;  %v2182_v59 = vadd.f32 %v6859_v1, %v6873_v13 }
 0x481   : > { %v5130_v40 = vpop.eup %5129  ;;  %v2340_v43 = vadd.f32 1.0, %v5128_v42  ;;  %v4259_v44 = vmul.f32 -1.442695, %v2191_v33  ;;  %v6899_v47 = vadd.f32 %v1964_v19, %v6819_v23 }
 0x482   : > { %v2528_v39 = vadd.f32 %v2496_v52, %v2432_v63  ;;  %v2433_v48 = vmul.f32 %v5130_v40, %v2180_v20  ;;  %v2465_v3 = vsub.f32 1.0, %v5130_v40  ;;  %v2193_v49 = vadd.f32 %v4869_v12, %v6850_v41 }
 0x483   : > { %5139 = vrcp.f32 %v2340_v43  ;;  %v1968_v50 = vpop.f32.mrb[20].mxu0 }
 0x484   : > { %v5132_v60 = vpop.eup %5131  ;;  %2560 = vst [vmem:[#allocation2 + $0x28] sm:$0xff] %v2528_v39  ;;  %v2497_v21 = vmul.f32 %v2465_v3, %v6590_v54  ;;  %5141 = vpow2.f32 %v4259_v44  ;;  %v4260_v58 = vmul.f32 -1.442695, %v2193_v49  ;;  %v4871_v0 = vadd.f32 %v1968_v50, %v6821_v45  ;;  %v1970_v23 = vpop.f32.mrb[21].mxu0 }
 0x485   : > { %v5134_v6 = vpop.eup %5133  ;;  %v2341_v27 = vadd.f32 1.0, %v5132_v60  ;;  %v6907_v56 = vadd.f32 %v1970_v23, %v6823_v24  ;;  %v2184_v45 = vadd.f32 %v6862_v4, %v6873_v13 }
 0x486   : > { %v2529_v46 = vadd.f32 %v2497_v21, %v2433_v48  ;;  %v2434_v14 = vmul.f32 %v5134_v6, %v2182_v59  ;;  %v2466_v51 = vsub.f32 1.0, %v5134_v6  ;;  %5143 = vpow2.f32 %v4260_v58 }
 0x487   : > { %5145 = vrcp.f32 %v2341_v27  ;;  %v2195_v1 = vadd.f32 %v4871_v0, %v6850_v41  ;;  %v1974_v5 = vpop.f32.mrb[22].mxu0 }
 0x488   : > { %v5136_v9 = vpop.eup %5135  ;;  %2561 = vst [vmem:[#allocation2 + $0x30] sm:$0xff] %v2529_v46  ;;  %v2498_v54 = vmul.f32 %v2466_v51, %v6602_v62  ;;  %v4873_v18 = vadd.f32 %v1974_v5, %v6825_v26  ;;  %v1976_v61 = vpop.f32.mrb[23].mxu0  ;;  %v2186_v62 = vadd.f32 %v6869_v17, %v6873_v13 }
 0x489   : > { %v5138_v24 = vpop.eup %5137  ;;  %v2342_v63 = vadd.f32 1.0, %v5136_v9  ;;  %v4261_v22 = vmul.f32 -1.442695, %v2195_v1  ;;  %v6915_v33 = vadd.f32 %v1976_v61, %v6827_v28 }
 0x48a   : > { %v2530_v36 = vadd.f32 %v2498_v54, %v2434_v14  ;;  %v2435_v42 = vmul.f32 %v5138_v24, %v2184_v45  ;;  %v2467_v52 = vsub.f32 1.0, %v5138_v24  ;;  %v2197_v20 = vadd.f32 %v4873_v18, %v6850_v41 }
 0x48b   : > { %5147 = vrcp.f32 %v2342_v63  ;;  %v1980_v12 = vpop.f32.mrb[24].mxu0 }
 0x48c   : > { %2562 = vst [vmem:[#allocation2 + $0x38] sm:$0xff] %v2530_v36  ;;  %v2499_v26 = vmul.f32 %v2467_v52, %v6614_v7  ;;  %5149 = vpow2.f32 %v4261_v22  ;;  %v4262_v4 = vmul.f32 -1.442695, %v2197_v20  ;;  %v4875_v19 = vadd.f32 %v1980_v12, %v6829_v30  ;;  %v1982_v40 = vpop.f32.mrb[25].mxu0 }
 0x48d   : > { %v5140_v28 = vpop.eup %5139  ;;  %v6923_v43 = vadd.f32 %v1982_v40, %v6831_v53  ;;  %v2188_v30 = vadd.f32 %v6877_v11, %v6873_v13 }
 0x48e   : > { %v5142_v44 = vpop.eup %5141  ;;  %v2531_v39 = vadd.f32 %v2499_v26, %v2435_v42  ;;  %v2436_v48 = vmul.f32 %v5140_v28, %v2186_v62  ;;  %v2468_v3 = vsub.f32 1.0, %v5140_v28  ;;  %5151 = vpow2.f32 %v4262_v4 }
 0x48f   : > { %v2343_v17 = vadd.f32 1.0, %v5142_v44  ;;  %v2199_v49 = vadd.f32 %v4875_v19, %v6850_v41  ;;  %v1986_v59 = vpop.f32.mrb[26].mxu0  ;;  %v2192_v62 = vadd.f32 %v6891_v10, %v6873_v13 }
 0x490   : > { %v5144_v50 = vpop.eup %5143  ;;  %2563 = vst [vmem:[#allocation2 + $0x40] sm:$0xff] %v2531_v39  ;;  %v2500_v7 = vmul.f32 %v2468_v3, %v6626_v15  ;;  %v4877_v60 = vadd.f32 %v1986_v59, %v6833_v31  ;;  %v1988_v53 = vpop.f32.mrb[27].mxu0  ;;  %v2190_v15 = vadd.f32 %v6883_v32, %v6873_v13 }
 0x491   : > { %v5146_v21 = vpop.eup %5145  ;;  %5153 = vrcp.f32 %v2343_v17  ;;  %v2344_v58 = vadd.f32 1.0, %v5144_v50  ;;  %v4263_v0 = vmul.f32 -1.442695, %v2199_v49  ;;  %v6931_v23 = vadd.f32 %v1988_v53, %v6835_v34 }
 0x492   : > { %v2532_v6 = vadd.f32 %v2500_v7, %v2436_v48  ;;  %v2437_v27 = vmul.f32 %v5146_v21, %v2188_v30  ;;  %v2469_v46 = vsub.f32 1.0, %v5146_v21  ;;  %v2201_v14 = vadd.f32 %v4877_v60, %v6850_v41 }
 0x493   : > { %5155 = vrcp.f32 %v2344_v58  ;;  %v1992_v11 = vpop.f32.mrb[28].mxu0 }
 0x494   : > { %2564 = vst [vmem:[#allocation2 + $0x48] sm:$0xff] %v2532_v6  ;;  %v2501_v31 = vmul.f32 %v2469_v46, %v6638_v25  ;;  %5157 = vpow2.f32 %v4263_v0  ;;  %v4264_v51 = vmul.f32 -1.442695, %v2201_v14  ;;  %v4879_v1 = vadd.f32 %v1992_v11, %v6837_v8  ;;  %v1994_v5 = vpop.f32.mrb[29].mxu0 }
 0x495   : > { %v5148_v34 = vpop.eup %5147  ;;  %v6939_v9 = vadd.f32 %v1994_v5, %v6839_v35 }
 0x496   : > { %v5150_v54 = vpop.eup %5149  ;;  %v2533_v45 = vadd.f32 %v2501_v31, %v2437_v27  ;;  %v2438_v18 = vmul.f32 %v5148_v34, %v2190_v15  ;;  %v2470_v61 = vsub.f32 1.0, %v5148_v34  ;;  %5159 = vpow2.f32 %v4264_v51 }
 0x497   : > { %v2345_v32 = vadd.f32 1.0, %v5150_v54  ;;  %v2203_v24 = vadd.f32 %v4879_v1, %v6850_v41  ;;  %v1998_v63 = vpop.f32.mrb[30].mxu0  ;;  %v2196_v15 = vadd.f32 %v6907_v56, %v6873_v13  ;;  %v2198_v1 = vadd.f32 %v6915_v33, %v6873_v13 }
 0x498   : > { %v5152_v22 = vpop.eup %5151  ;;  %2565 = vst [vmem:[#allocation2 + $0x50] sm:$0xff] %v2533_v45  ;;  %v2502_v25 = vmul.f32 %v2470_v61, %v6648_v57  ;;  %v4881_v8 = vadd.f32 %v1998_v63, %v6841_v29  ;;  %v2000_v36 = vpop.f32.mrb[31].mxu0  ;;  %v2194_v57 = vadd.f32 %v6899_v47, %v6873_v13  ;;  %v5241_v63 = vld [vmem:[#allocation2 + $0x70] sm:$0xff] }
 0x499   : > { %5161 = vrcp.f32 %v2345_v32  ;;  %v2346_v42 = vadd.f32 1.0, %v5152_v22  ;;  %v4265_v35 = vmul.f32 -1.442695, %v2203_v24  ;;  %v6945_v52 = vadd.f32 %v2000_v36, %v6845_v38 }
 0x49a   : > { %v2534_v20 = vadd.f32 %v2502_v25, %v2438_v18  ;;  %v2205_v12 = vadd.f32 %v4881_v8, %v6850_v41  ;;  %v1680_v26 = vpop.f32.mrb[32].mxu1 }
 0x49b   : > { %v5154_v4 = vpop.eup %5153  ;;  %5163 = vrcp.f32 %v2346_v42  ;;  %v2004_v29 = vpop.f32.mrb[32].mxu0 }
 0x49c   : > { %v1682_v19 = vpop.f32.mrb[33].mxu1  ;;  %2566 = vst [vmem:[#allocation2 + $0x58] sm:$0xff] %v2534_v20  ;;  %v2439_v40 = vmul.f32 %v5154_v4, %v2192_v62  ;;  %v2471_v28 = vsub.f32 1.0, %v5154_v4  ;;  %5165 = vpow2.f32 %v4265_v35  ;;  %v4266_v38 = vmul.f32 -1.442695, %v2205_v12  ;;  %v2006_v44 = vpop.f32.mrb[33].mxu0 }
 0x49d   : > { %v5156_v39 = vpop.eup %5155  ;;  %v4883_v48 = vadd.f32 %v2004_v29, %v1680_v26  ;;  %v6952_v3 = vadd.f32 %v2006_v44, %v1682_v19  ;;  %v5242_v26 = vld [vmem:[#allocation2 + $0x78] sm:$0xff]  ;;  %v2200_v44 = vadd.f32 %v6923_v43, %v6873_v13 }
 0x49e   : > { %v5158_v10 = vpop.eup %5157  ;;  %v2503_v17 = vmul.f32 %v2471_v28, %v6656_v2  ;;  %v2440_v49 = vmul.f32 %v5156_v39, %v2194_v57  ;;  %v2472_v59 = vsub.f32 1.0, %v5156_v39  ;;  %5167 = vpow2.f32 %v4266_v38  ;;  %v1686_v47 = vpop.f32.mrb[34].mxu1 }
 0x49f   : > { %v2347_v50 = vadd.f32 1.0, %v5158_v10  ;;  %v2207_v7 = vadd.f32 %v4883_v48, %v6850_v41  ;;  %v2010_v30 = vpop.f32.mrb[34].mxu0  ;;  %v1688_v60 = vpop.f32.mrb[35].mxu1 }
 0x4a0   : > { %v5160_v53 = vpop.eup %5159  ;;  %v2535_v21 = vadd.f32 %v2503_v17, %v2439_v40  ;;  %v2504_v58 = vmul.f32 %v2472_v59, %v6663_v16  ;;  %v4885_v0 = vadd.f32 %v2010_v30, %v1686_v47  ;;  %v2012_v6 = vpop.f32.mrb[35].mxu0  ;;  %v2202_v17 = vadd.f32 %v6931_v23, %v6873_v13 }
 0x4a1   : > { %5169 = vrcp.f32 %v2347_v50  ;;  %v2348_v27 = vadd.f32 1.0, %v5160_v53  ;;  %v4267_v46 = vmul.f32 -1.442695, %v2207_v7  ;;  %v6957_v14 = vadd.f32 %v2012_v6, %v1688_v60 }
 0x4a2   : > { %2567 = vst [vmem:[#allocation2 + $0x60] sm:$0xff] %v2535_v21  ;;  %v2536_v2 = vadd.f32 %v2504_v58, %v2440_v49  ;;  %v2209_v11 = vadd.f32 %v4885_v0, %v6850_v41  ;;  %v1692_v31 = vpop.f32.mrb[36].mxu1  ;;  %v5243_v58 = vld [vmem:[#allocation2 + $0x80] sm:$0xff] }
 0x4a3   : > { %v5162_v51 = vpop.eup %5161  ;;  %5171 = vrcp.f32 %v2348_v27  ;;  %v2016_v16 = vpop.f32.mrb[36].mxu0 }
 0x4a4   : > { %v1694_v5 = vpop.f32.mrb[37].mxu1  ;;  %2568 = vst [vmem:[#allocation2 + $0x68] sm:$0xff] %v2536_v2  ;;  %v2441_v34 = vmul.f32 %v5162_v51, %v2196_v15  ;;  %v2473_v54 = vsub.f32 1.0, %v5162_v51  ;;  %5173 = vpow2.f32 %v4267_v46  ;;  %v4268_v45 = vmul.f32 -1.442695, %v2209_v11  ;;  %v2018_v18 = vpop.f32.mrb[37].mxu0 }
 0x4a5   : > { %v5164_v61 = vpop.eup %5163  ;;  %v4887_v32 = vadd.f32 %v2016_v16, %v1692_v31  ;;  %v6964_v24 = vadd.f32 %v2018_v18, %v1694_v5 }
 0x4a6   : > { %v5166_v56 = vpop.eup %5165  ;;  %v2505_v22 = vmul.f32 %v5241_v63, %v2473_v54  ;;  %v2442_v25 = vmul.f32 %v5164_v61, %v2198_v1  ;;  %v2474_v8 = vsub.f32 1.0, %v5164_v61  ;;  %5175 = vpow2.f32 %v4268_v45  ;;  %v1698_v33 = vpop.f32.mrb[38].mxu1  ;;  %v5244_v1 = vld [vmem:[#allocation2 + $0x88] sm:$0xff] }
 0x4a7   : > { %v2349_v36 = vadd.f32 1.0, %v5166_v56  ;;  %v2211_v42 = vadd.f32 %v4887_v32, %v6850_v41  ;;  %v2022_v35 = vpop.f32.mrb[38].mxu0  ;;  %v1700_v20 = vpop.f32.mrb[39].mxu1  ;;  %v2204_v32 = vadd.f32 %v6939_v9, %v6873_v13 }
 0x4a8   : > { %v5168_v62 = vpop.eup %5167  ;;  %v2537_v12 = vadd.f32 %v2505_v22, %v2441_v34  ;;  %v2506_v4 = vmul.f32 %v5242_v26, %v2474_v8  ;;  %v4889_v57 = vadd.f32 %v2022_v35, %v1698_v33  ;;  %v2024_v29 = vpop.f32.mrb[39].mxu0 }
 0x4a9   : > { %5177 = vrcp.f32 %v2349_v36  ;;  %v2350_v19 = vadd.f32 1.0, %v5168_v62  ;;  %v4269_v40 = vmul.f32 -1.442695, %v2211_v42  ;;  %v6967_v28 = vadd.f32 %v2024_v29, %v1700_v20 }
 0x4aa   : > { %2569 = vst [vmem:[#allocation2 + $0x70] sm:$0xff] %v2537_v12  ;;  %v2538_v38 = vadd.f32 %v2506_v4, %v2442_v25  ;;  %v2213_v39 = vadd.f32 %v4889_v57, %v6850_v41  ;;  %v1704_v48 = vpop.f32.mrb[40].mxu1  ;;  %v2206_v25 = vadd.f32 %v6945_v52, %v6873_v13  ;;  %v5245_v4 = vld [vmem:[#allocation2 + $0x90] sm:$0xff] }
 0x4ab   : > { %v5170_v10 = vpop.eup %5169  ;;  %5179 = vrcp.f32 %v2350_v19  ;;  %v2028_v49 = vpop.f32.mrb[40].mxu0 }
 0x4ac   : > { %v1706_v59 = vpop.f32.mrb[41].mxu1  ;;  %2570 = vst [vmem:[#allocation2 + $0x78] sm:$0xff] %v2538_v38  ;;  %v2443_v47 = vmul.f32 %v5170_v10, %v2200_v44  ;;  %v2475_v50 = vsub.f32 1.0, %v5170_v10  ;;  %5181 = vpow2.f32 %v4269_v40  ;;  %v4270_v7 = vmul.f32 -1.442695, %v2213_v39  ;;  %v2030_v30 = vpop.f32.mrb[41].mxu0 }
 0x4ad   : > { %v5172_v60 = vpop.eup %5171  ;;  %v4891_v53 = vadd.f32 %v2028_v49, %v1704_v48  ;;  %v6974_v21 = vadd.f32 %v2030_v30, %v1706_v59 }
 0x4ae   : > { %v5174_v43 = vpop.eup %5173  ;;  %v2507_v0 = vmul.f32 %v5243_v58, %v2475_v50  ;;  %v2444_v6 = vmul.f32 %v5172_v60, %v2202_v17  ;;  %v2476_v27 = vsub.f32 1.0, %v5172_v60  ;;  %5183 = vpow2.f32 %v4270_v7  ;;  %v1710_v23 = vpop.f32.mrb[42].mxu1  ;;  %v5246_v17 = vld [vmem:[#allocation2 + $0x98] sm:$0xff] }
 0x4af   : > { %v2351_v46 = vadd.f32 1.0, %v5174_v43  ;;  %v2215_v2 = vadd.f32 %v4891_v53, %v6850_v41  ;;  %v2034_v15 = vpop.f32.mrb[42].mxu0  ;;  %v1712_v11 = vpop.f32.mrb[43].mxu1  ;;  %v2208_v53 = vadd.f32 %v6952_v3, %v6873_v13 }
 0x4b0   : > { %v5176_v31 = vpop.eup %5175  ;;  %v2539_v51 = vadd.f32 %v2507_v0, %v2443_v47  ;;  %v2508_v16 = vmul.f32 %v5244_v1, %v2476_v27  ;;  %v4893_v5 = vadd.f32 %v2034_v15, %v1710_v23  ;;  %v2036_v34 = vpop.f32.mrb[43].mxu0 }
 0x4b1   : > { %5185 = vrcp.f32 %v2351_v46  ;;  %v2352_v54 = vadd.f32 1.0, %v5176_v31  ;;  %v4271_v45 = vmul.f32 -1.442695, %v2215_v2  ;;  %v6977_v18 = vadd.f32 %v2036_v34, %v1712_v11 }
 0x4b2   : > { %2571 = vst [vmem:[#allocation2 + $0x80] sm:$0xff] %v2539_v51  ;;  %v2540_v61 = vadd.f32 %v2508_v16, %v2444_v6  ;;  %v2217_v56 = vadd.f32 %v4893_v5, %v6850_v41  ;;  %v1716_v63 = vpop.f32.mrb[44].mxu1  ;;  %v2210_v6 = vadd.f32 %v6957_v14, %v6873_v13  ;;  %v5247_v16 = vld [vmem:[#allocation2 + $0xe0] sm:$0xff] }
 0x4b3   : > { %v5178_v22 = vpop.eup %5177  ;;  %5187 = vrcp.f32 %v2352_v54  ;;  %v2040_v8 = vpop.f32.mrb[44].mxu0 }
 0x4b4   : > { %v1718_v33 = vpop.f32.mrb[45].mxu1  ;;  %2572 = vst [vmem:[#allocation2 + $0x88] sm:$0xff] %v2540_v61  ;;  %v2445_v36 = vmul.f32 %v5178_v22, %v2204_v32  ;;  %v2477_v42 = vsub.f32 1.0, %v5178_v22  ;;  %5189 = vpow2.f32 %v4271_v45  ;;  %v4272_v35 = vmul.f32 -1.442695, %v2217_v56  ;;  %v2042_v20 = vpop.f32.mrb[45].mxu0 }
 0x4b5   : > { %v5180_v62 = vpop.eup %5179  ;;  %v4895_v12 = vadd.f32 %v2040_v8, %v1716_v63  ;;  %v6984_v26 = vadd.f32 %v2042_v20, %v1718_v33 }
 0x4b6   : > { %v5182_v9 = vpop.eup %5181  ;;  %v2509_v57 = vmul.f32 %v5245_v4, %v2477_v42  ;;  %v2446_v29 = vmul.f32 %v5180_v62, %v2206_v25  ;;  %v2478_v19 = vsub.f32 1.0, %v5180_v62  ;;  %5191 = vpow2.f32 %v4272_v35  ;;  %v1722_v52 = vpop.f32.mrb[46].mxu1  ;;  %v5248_v25 = vld [vmem:[#allocation2 + $0xe8] sm:$0xff] }
 0x4b7   : > { %v2353_v40 = vadd.f32 1.0, %v5182_v9  ;;  %v2219_v38 = vadd.f32 %v4895_v12, %v6850_v41  ;;  %v2046_v44 = vpop.f32.mrb[46].mxu0  ;;  %v1724_v39 = vpop.f32.mrb[47].mxu1  ;;  %v2212_v12 = vadd.f32 %v6964_v24, %v6873_v13 }
 0x4b8   : > { %v5184_v48 = vpop.eup %5183  ;;  %v2541_v10 = vadd.f32 %v2509_v57, %v2445_v36  ;;  %v2510_v49 = vmul.f32 %v5246_v17, %v2478_v19  ;;  %v4897_v59 = vadd.f32 %v2046_v44, %v1722_v52  ;;  %v2048_v47 = vpop.f32.mrb[47].mxu0 }
 0x4b9   : > { %5193 = vrcp.f32 %v2353_v40  ;;  %v2354_v50 = vadd.f32 1.0, %v5184_v48  ;;  %v4273_v7 = vmul.f32 -1.442695, %v2219_v38  ;;  %v6987_v30 = vadd.f32 %v2048_v47, %v1724_v39 }
 0x4ba   : > { %2573 = vst [vmem:[#allocation2 + $0x90] sm:$0xff] %v2541_v10  ;;  %v2542_v60 = vadd.f32 %v2510_v49, %v2446_v29  ;;  %v2221_v43 = vadd.f32 %v4897_v59, %v6850_v41  ;;  %v1728_v58 = vpop.f32.mrb[48].mxu1  ;;  %v2214_v29 = vadd.f32 %v6967_v28, %v6873_v13  ;;  %v5249_v49 = vld [vmem:[#allocation2 + $0xf0] sm:$0xff] }
 0x4bb   : > { %v5186_v0 = vpop.eup %5185  ;;  %5195 = vrcp.f32 %v2354_v50  ;;  %v2052_v27 = vpop.f32.mrb[48].mxu0 }
 0x4bc   : > { %v1730_v23 = vpop.f32.mrb[49].mxu1  ;;  %2574 = vst [vmem:[#allocation2 + $0x98] sm:$0xff] %v2542_v60  ;;  %v2447_v46 = vmul.f32 %v5186_v0, %v2208_v53  ;;  %v2479_v2 = vsub.f32 1.0, %v5186_v0  ;;  %5197 = vpow2.f32 %v4273_v7  ;;  %v4274_v15 = vmul.f32 -1.442695, %v2221_v43  ;;  %v2054_v11 = vpop.f32.mrb[49].mxu0 }
 0x4bd   : > { %v5188_v31 = vpop.eup %5187  ;;  %v4899_v51 = vadd.f32 %v2052_v27, %v1728_v58  ;;  %v6994_v1 = vadd.f32 %v2054_v11, %v1730_v23 }
 0x4be   : > { %v5190_v3 = vpop.eup %5189  ;;  %v2511_v5 = vmul.f32 %v5247_v16, %v2479_v2  ;;  %v2448_v34 = vmul.f32 %v5188_v31, %v2210_v6  ;;  %v2480_v54 = vsub.f32 1.0, %v5188_v31  ;;  %5199 = vpow2.f32 %v4274_v15  ;;  %v1734_v14 = vpop.f32.mrb[50].mxu1  ;;  %v5250_v6 = vld [vmem:[#allocation2 + $0xf8] sm:$0xff] }
 0x4bf   : > { %v2355_v45 = vadd.f32 1.0, %v5190_v3  ;;  %v2223_v61 = vadd.f32 %v4899_v51, %v6850_v41  ;;  %v2058_v32 = vpop.f32.mrb[50].mxu0  ;;  %v1736_v56 = vpop.f32.mrb[51].mxu1  ;;  %v2216_v51 = vadd.f32 %v6974_v21, %v6873_v13 }
 0x4c0   : > { %v5192_v63 = vpop.eup %5191  ;;  %v2543_v22 = vadd.f32 %v2511_v5, %v2447_v46  ;;  %v2512_v8 = vmul.f32 %v5248_v25, %v2480_v54  ;;  %v4901_v33 = vadd.f32 %v2058_v32, %v1734_v14  ;;  %v2060_v36 = vpop.f32.mrb[51].mxu0 }
 0x4c1   : > { %5201 = vrcp.f32 %v2355_v45  ;;  %v2356_v42 = vadd.f32 1.0, %v5192_v63  ;;  %v4275_v35 = vmul.f32 -1.442695, %v2223_v61  ;;  %v6997_v20 = vadd.f32 %v2060_v36, %v1736_v56 }
 0x4c2   : > { %2575 = vst [vmem:[#allocation2 + $0xe0] sm:$0xff] %v2543_v22  ;;  %v2544_v62 = vadd.f32 %v2512_v8, %v2448_v34  ;;  %v2225_v9 = vadd.f32 %v4901_v33, %v6850_v41  ;;  %v1740_v4 = vpop.f32.mrb[52].mxu1  ;;  %v2218_v34 = vadd.f32 %v6977_v18, %v6873_v13  ;;  %v5251_v8 = vld [vmem:[#allocation2 + $0x100] sm:$0xff] }
 0x4c3   : > { %v5194_v57 = vpop.eup %5193  ;;  %5203 = vrcp.f32 %v2356_v42  ;;  %v2064_v19 = vpop.f32.mrb[52].mxu0 }
 0x4c4   : > { %v1742_v52 = vpop.f32.mrb[53].mxu1  ;;  %2576 = vst [vmem:[#allocation2 + $0xe8] sm:$0xff] %v2544_v62  ;;  %v2449_v40 = vmul.f32 %v5194_v57, %v2212_v12  ;;  %v2481_v38 = vsub.f32 1.0, %v5194_v57  ;;  %5205 = vpow2.f32 %v4275_v35  ;;  %v4276_v44 = vmul.f32 -1.442695, %v2225_v9  ;;  %v2066_v39 = vpop.f32.mrb[53].mxu0 }
 0x4c5   : > { %v5196_v48 = vpop.eup %5195  ;;  %v4903_v10 = vadd.f32 %v2064_v19, %v1740_v4  ;;  %v7004_v17 = vadd.f32 %v2066_v39, %v1742_v52 }
 0x4c6   : > { %v5198_v24 = vpop.eup %5197  ;;  %v2513_v59 = vmul.f32 %v5249_v49, %v2481_v38  ;;  %v2450_v47 = vmul.f32 %v5196_v48, %v2214_v29  ;;  %v2482_v50 = vsub.f32 1.0, %v5196_v48  ;;  %5207 = vpow2.f32 %v4276_v44  ;;  %v1746_v28 = vpop.f32.mrb[54].mxu1  ;;  %v5252_v29 = vld [vmem:[#allocation2 + $0x108] sm:$0xff] }
 0x4c7   : > { %v2357_v7 = vadd.f32 1.0, %v5198_v24  ;;  %v2227_v60 = vadd.f32 %v4903_v10, %v6850_v41  ;;  %v2070_v53 = vpop.f32.mrb[54].mxu0  ;;  %v1748_v43 = vpop.f32.mrb[55].mxu1  ;;  %v2220_v10 = vadd.f32 %v6984_v26, %v6873_v13 }
 0x4c8   : > { %v5200_v58 = vpop.eup %5199  ;;  %v2545_v0 = vadd.f32 %v2513_v59, %v2449_v40  ;;  %v2514_v27 = vmul.f32 %v5250_v6, %v2482_v50  ;;  %v4905_v23 = vadd.f32 %v2070_v53, %v1746_v28  ;;  %v2072_v46 = vpop.f32.mrb[55].mxu0 }
 0x4c9   : > { %5209 = vrcp.f32 %v2357_v7  ;;  %v2358_v2 = vadd.f32 1.0, %v5200_v58  ;;  %v4277_v15 = vmul.f32 -1.442695, %v2227_v60  ;;  %v7007_v11 = vadd.f32 %v2072_v46, %v1748_v43 }
 0x4ca   : > { %2577 = vst [vmem:[#allocation2 + $0xf0] sm:$0xff] %v2545_v0  ;;  %v2546_v31 = vadd.f32 %v2514_v27, %v2450_v47  ;;  %v2229_v3 = vadd.f32 %v4905_v23, %v6850_v41  ;;  %v1752_v16 = vpop.f32.mrb[56].mxu1  ;;  %v2222_v47 = vadd.f32 %v6987_v30, %v6873_v13  ;;  %v5253_v27 = vld [vmem:[#allocation2 + $0x110] sm:$0xff] }
 0x4cb   : > { %v5202_v5 = vpop.eup %5201  ;;  %5211 = vrcp.f32 %v2358_v2  ;;  %v2076_v54 = vpop.f32.mrb[56].mxu0 }
 0x4cc   : > { %v1754_v14 = vpop.f32.mrb[57].mxu1  ;;  %2578 = vst [vmem:[#allocation2 + $0xf8] sm:$0xff] %v2546_v31  ;;  %v2451_v45 = vmul.f32 %v5202_v5, %v2216_v51  ;;  %v2483_v61 = vsub.f32 1.0, %v5202_v5  ;;  %5213 = vpow2.f32 %v4277_v15  ;;  %v4278_v32 = vmul.f32 -1.442695, %v2229_v3  ;;  %v2078_v56 = vpop.f32.mrb[57].mxu0 }
 0x4cd   : > { %v5204_v63 = vpop.eup %5203  ;;  %v4907_v22 = vadd.f32 %v2076_v54, %v1752_v16  ;;  %v7014_v25 = vadd.f32 %v2078_v56, %v1754_v14 }
 0x4ce   : > { %v5206_v21 = vpop.eup %5205  ;;  %v2515_v33 = vmul.f32 %v5251_v8, %v2483_v61  ;;  %v2452_v36 = vmul.f32 %v5204_v63, %v2218_v34  ;;  %v2484_v42 = vsub.f32 1.0, %v5204_v63  ;;  %5215 = vpow2.f32 %v4278_v32  ;;  %v1758_v18 = vpop.f32.mrb[58].mxu1  ;;  %v5254_v34 = vld [vmem:[#allocation2 + $0x118] sm:$0xff] }
 0x4cf   : > { %v2359_v35 = vadd.f32 1.0, %v5206_v21  ;;  %v2231_v62 = vadd.f32 %v4907_v22, %v6850_v41  ;;  %v2082_v12 = vpop.f32.mrb[58].mxu0  ;;  %v1760_v9 = vpop.f32.mrb[59].mxu1  ;;  %v2224_v22 = vadd.f32 %v6994_v1, %v6873_v13 }
 0x4d0   : > { %v5208_v4 = vpop.eup %5207  ;;  %v2547_v57 = vadd.f32 %v2515_v33, %v2451_v45  ;;  %v2516_v19 = vmul.f32 %v5252_v29, %v2484_v42  ;;  %v4909_v52 = vadd.f32 %v2082_v12, %v1758_v18  ;;  %v2084_v40 = vpop.f32.mrb[59].mxu0  ;;  %v2226_v33 = vadd.f32 %v6997_v20, %v6873_v13  ;;  %v5255_v12 = vld [vmem:[#allocation2 + $0x120] sm:$0xff] }
 0x4d1   : > { %5217 = vrcp.f32 %v2359_v35  ;;  %v2360_v38 = vadd.f32 1.0, %v5208_v4  ;;  %v4279_v44 = vmul.f32 -1.442695, %v2231_v62  ;;  %v7017_v39 = vadd.f32 %v2084_v40, %v1760_v9 }
 0x4d2   : > { %2579 = vst [vmem:[#allocation2 + $0x100] sm:$0xff] %v2547_v57  ;;  %v2548_v48 = vadd.f32 %v2516_v19, %v2452_v36  ;;  %v2233_v24 = vadd.f32 %v4909_v52, %v6850_v41  ;;  %v1764_v49 = vpop.f32.mrb[60].mxu1  ;;  %v5256_v19 = vld [vmem:[#allocation2 + $0x128] sm:$0xff] }
 0x4d3   : > { %v5210_v59 = vpop.eup %5209  ;;  %5219 = vrcp.f32 %v2360_v38  ;;  %v2088_v50 = vpop.f32.mrb[60].mxu0  ;;  %v2228_v38 = vadd.f32 %v7004_v17, %v6873_v13 }
 0x4d4   : > { %v1766_v28 = vpop.f32.mrb[61].mxu1  ;;  %2580 = vst [vmem:[#allocation2 + $0x108] sm:$0xff] %v2548_v48  ;;  %v2453_v7 = vmul.f32 %v5210_v59, %v2220_v10  ;;  %v2485_v60 = vsub.f32 1.0, %v5210_v59  ;;  %5221 = vpow2.f32 %v4279_v44  ;;  %v4280_v53 = vmul.f32 -1.442695, %v2233_v24  ;;  %v2090_v43 = vpop.f32.mrb[61].mxu0 }
 0x4d5   : > { %v5212_v58 = vpop.eup %5211  ;;  %v4911_v0 = vadd.f32 %v2088_v50, %v1764_v49  ;;  %v7024_v6 = vadd.f32 %v2090_v43, %v1766_v28  ;;  %v2230_v24 = vadd.f32 %v7007_v11, %v6873_v13 }
 0x4d6   : > { %v5214_v26 = vpop.eup %5213  ;;  %v2517_v23 = vmul.f32 %v5253_v27, %v2485_v60  ;;  %v2454_v46 = vmul.f32 %v5212_v58, %v2222_v47  ;;  %v2486_v2 = vsub.f32 1.0, %v5212_v58  ;;  %5223 = vpow2.f32 %v4280_v53  ;;  %v1770_v30 = vpop.f32.mrb[62].mxu1  ;;  %v5257_v47 = vld [vmem:[#allocation2 + $0x130] sm:$0xff]  ;;  %v5258_v58 = vld [vmem:[#allocation2 + $0x138] sm:$0xff] }
 0x4d7   : > { %v2361_v15 = vadd.f32 1.0, %v5214_v26  ;;  %v2235_v31 = vadd.f32 %v4911_v0, %v6850_v41  ;;  %v2094_v51 = vpop.f32.mrb[62].mxu0  ;;  %v1772_v3 = vpop.f32.mrb[63].mxu1  ;;  %v2232_v27 = vadd.f32 %v7014_v25, %v6873_v13  ;;  %v2236_v25 = vadd.f32 %v7024_v6, %v6873_v13  ;;  %v2628_v6 = vld [vmem:[#allocation15 + $0x8] sm:$0xff] (!%p4283_p9) }
 0x4d8   : > { %v5216_v16 = vpop.eup %5215  ;;  %v2549_v5 = vadd.f32 %v2517_v23, %v2453_v7  ;;  %v2518_v54 = vmul.f32 %v5254_v34, %v2486_v2  ;;  %v4913_v14 = vadd.f32 %v2094_v51, %v1770_v30  ;;  %v2096_v45 = vpop.f32.mrb[63].mxu0  ;;  %v2234_v2 = vadd.f32 %v7017_v39, %v6873_v13 }
 0x4d9   : > { %5225 = vrcp.f32 %v2361_v15  ;;  %v2362_v61 = vadd.f32 1.0, %v5216_v16  ;;  %v4281_v32 = vmul.f32 -1.442695, %v2235_v31  ;;  %v7027_v56 = vadd.f32 %v2096_v45, %v1772_v3  ;;  %v5259_v15 = vld [vmem:[#allocation2 + $0x140] sm:$0xff] }
 0x4da   : > { %2581 = vst [vmem:[#allocation2 + $0x110] sm:$0xff] %v2549_v5  ;;  %v2550_v63 = vadd.f32 %v2518_v54, %v2454_v46  ;;  %v2237_v21 = vadd.f32 %v4913_v14, %v6850_v41  ;;  %v5260_v5 = vld [vmem:[#allocation2 + $0x148] sm:$0xff] }
 0x4db   : > { %v5218_v8 = vpop.eup %5217  ;;  %5227 = vrcp.f32 %v2362_v61  ;;  %v2238_v39 = vadd.f32 %v7027_v56, %v6873_v13  ;;  %v2632_v13 = vld [vmem:[#allocation15 + $0x28] sm:$0xff] (!%p4283_p9)  ;;  %v2634_v56 = vld [vmem:[#allocation15 + $0x38] sm:$0xff] (!%p4283_p9) }
 0x4dc   : > { %2582 = vst [vmem:[#allocation2 + $0x118] sm:$0xff] %v2550_v63  ;;  %v2455_v36 = vmul.f32 %v5218_v8, %v2224_v22  ;;  %v2487_v42 = vsub.f32 1.0, %v5218_v8  ;;  %5229 = vpow2.f32 %v4281_v32  ;;  %v4282_v18 = vmul.f32 -1.442695, %v2237_v21  ;;  %v5261_v63 = vld [vmem:[#allocation2 + $0x150] sm:$0xff] }
 0x4dd   : > { %v5220_v35 = vpop.eup %5219 }
 0x4de   : > { %v5222_v62 = vpop.eup %5221  ;;  %v2519_v9 = vmul.f32 %v5255_v12, %v2487_v42  ;;  %v2456_v4 = vmul.f32 %v5220_v35, %v2226_v33  ;;  %v2488_v57 = vsub.f32 1.0, %v5220_v35  ;;  %5231 = vpow2.f32 %v4282_v18  ;;  %v2630_v35 = vld [vmem:[#allocation15 + $0x18] sm:$0xff] (!%p4283_p9) }
 0x4df   : > { %v2363_v1 = vadd.f32 1.0, %v5222_v62  ;;  %v2627_v62 = vld [vmem:[#allocation15] sm:$0xff] (!%p4283_p9)  ;;  %v4771_v12 = vpack.c.bf16 (!%p4283_p9), %v2630_v35, %v2628_v6  ;;  %v7105_v35 = vld [vmem:[#allocation2 + $0x90] sm:$0xff] (!%p4283_p9) }
 0x4e0   : > { %v5224_v29 = vpop.eup %5223  ;;  %v2551_v41 = vadd.f32 %v2519_v9, %v2455_v36  ;;  %v2520_v52 = vmul.f32 %v5256_v19, %v2488_v57  ;;  %v5262_v36 = vld [vmem:[#allocation2 + $0x158] sm:$0xff]  ;;  %v2636_v19 = vld [vmem:[#allocation15 + $0x48] sm:$0xff] (!%p4283_p9)  ;;  %v7101_v6 = vld [vmem:[#allocation2 + $0x88] sm:$0xff] (!%p4283_p9) }
 0x4e1   : > { %5233 = vrcp.f32 %v2363_v1  ;;  %v2364_v20 = vadd.f32 1.0, %v5224_v29  ;;  %v2629_v9 = vld [vmem:[#allocation15 + $0x10] sm:$0xff] (!%p4283_p9)  ;;  %v4775_v1 = vpack.c.bf16 (!%p4283_p9), %v2634_v56, %v2632_v13  ;;  %v2631_v29 = vld [vmem:[#allocation15 + $0x20] sm:$0xff] (!%p4283_p9)  ;;  %4772 = vmatprep.subr.bf16.mxu0 (!%p4283_p9), %v4771_v12  ;;  %v7113_v12 = vld [vmem:[#allocation2 + $0xe0] sm:$0xff] (!%p4283_p9) }
 0x4e2   : > { %2583 = vst [vmem:[#allocation2 + $0x120] sm:$0xff] %v2551_v41  ;;  %v2552_v40 = vadd.f32 %v2520_v52, %v2456_v4  ;;  %v5892_v4 = vmov (!%p4283_p9), 0.0   ;;  %v4773_v57 = vpack.c.bf16 (!%p4283_p9), %v2629_v9, %v2627_v62  ;;  %v2633_v41 = vld [vmem:[#allocation15 + $0x30] sm:$0xff] (!%p4283_p9)  ;;  %v2638_v52 = vld [vmem:[#allocation15 + $0x58] sm:$0xff] (!%p4283_p9)  ;;  %v7117_v9 = vld [vmem:[#allocation2 + $0xe8] sm:$0xff] (!%p4283_p9) }
 0x4e3   : > { %v5226_v44 = vpop.eup %5225  ;;  %5235 = vrcp.f32 %v2364_v20  ;;  %2735 = vmatprep.mubr.f32.mxu0 (!%p4283_p9), %v5892_v4  ;;  %3358 = vmatprep.mubr.f32.mxu1 (!%p4283_p9), %v5892_v4  ;;  %v4777_v20 = vpack.c.bf16 (!%p4283_p9), %v2633_v41, %v2631_v29  ;;  %v7109_v62 = vld [vmem:[#allocation2 + $0x98] sm:$0xff] (!%p4283_p9)  ;;  %v7121_v13 = vld [vmem:[#allocation2 + $0xf0] sm:$0xff] (!%p4283_p9)  ;;  %v3252_v41 = vld [vmem:[#allocation15 + $0x118] sm:$0xff] (!%p4283_p9) }
 0x4e4   : > { %2584 = vst [vmem:[#allocation2 + $0x128] sm:$0xff] %v2552_v40  ;;  %v2457_v48 = vmul.f32 %v5226_v44, %v2228_v38  ;;  %v2489_v10 = vsub.f32 1.0, %v5226_v44  ;;  %4774 = vmatpush1.bf16.msra.mxu0 (!%p4283_p9), %v4773_v57  ;;  %v4779_v40 = vpack.c.bf16 (!%p4283_p9), %v2638_v52, %v2636_v19  ;;  %v2635_v38 = vld [vmem:[#allocation15 + $0x40] sm:$0xff] (!%p4283_p9)  ;;  %v2637_v44 = vld [vmem:[#allocation15 + $0x50] sm:$0xff] (!%p4283_p9)  ;;  %v7129_v57 = vld [vmem:[#allocation2 + $0x100] sm:$0xff] (!%p4283_p9) }
 0x4e5   : > { %v5228_v49 = vpop.eup %5227  ;;  %4776 = vmatprep.subr.bf16.mxu0 (!%p4283_p9), %v4775_v1  ;;  %v7125_v56 = vld [vmem:[#allocation2 + $0xf8] sm:$0xff] (!%p4283_p9)  ;;  %v7133_v1 = vld [vmem:[#allocation2 + $0x108] sm:$0xff] (!%p4283_p9)  ;;  %v3250_v29 = vld [vmem:[#allocation15 + $0x108] sm:$0xff] (!%p4283_p9) }
 0x4e6   : > { %v5230_v59 = vpop.eup %5229  ;;  %v2521_v50 = vmul.f32 %v5257_v47, %v2489_v10  ;;  %v2458_v28 = vmul.f32 %v5228_v49, %v2230_v24  ;;  %v2490_v7 = vsub.f32 1.0, %v5228_v49  ;;  %v2642_v10 = vld [vmem:[#allocation15 + $0x78] sm:$0xff] (!%p4283_p9)  ;;  %v4781_v24 = vpack.c.bf16 (!%p4283_p9), %v2637_v44, %v2635_v38  ;;  %v2641_v47 = vld [vmem:[#allocation15 + $0x70] sm:$0xff] (!%p4283_p9)  ;;  %v3249_v52 = vld [vmem:[#allocation15 + $0x100] sm:$0xff] (!%p4283_p9) }
 0x4e7   : > { %v2365_v60 = vadd.f32 1.0, %v5230_v59  ;;  %v2639_v59 = vld [vmem:[#allocation15 + $0x60] sm:$0xff] (!%p4283_p9)  ;;  %v4803_v19 = vpack.c.bf16 (!%p4283_p9), %v3252_v41, %v3250_v29  ;;  %v3254_v44 = vld [vmem:[#allocation15 + $0x128] sm:$0xff] (!%p4283_p9)  ;;  %v3271_v29 = vld [vmem:[#allocation15 + $0x1b0] sm:$0xff] (!%p4283_p9) }
 0x4e8   : > { %v5232_v53 = vpop.eup %5231  ;;  %v2553_v43 = vadd.f32 %v2521_v50, %v2457_v48  ;;  %v2522_v0 = vmul.f32 %v5258_v58, %v2490_v7  ;;  %v2640_v48 = vld [vmem:[#allocation15 + $0x68] sm:$0xff] (!%p4283_p9)  ;;  %4778 = vmatpush1.bf16.msra.mxu0 (!%p4283_p9), %v4777_v20  ;;  %v4785_v7 = vpack.c.bf16 (!%p4283_p9), %v2641_v47, %v2639_v59  ;;  %v3251_v20 = vld [vmem:[#allocation15 + $0x110] sm:$0xff] (!%p4283_p9) }
 0x4e9   : > { %5237 = vrcp.f32 %v2365_v60  ;;  %v2366_v17 = vadd.f32 1.0, %v5232_v53  ;;  %4780 = vmatprep.subr.bf16.mxu0 (!%p4283_p9), %v4779_v40  ;;  %v4783_v49 = vpack.c.bf16 (!%p4283_p9), %v2642_v10, %v2640_v48  ;;  %v2644_v50 = vld [vmem:[#allocation15 + $0x88] sm:$0xff] (!%p4283_p9)  ;;  %v2643_v53 = vld [vmem:[#allocation15 + $0x80] sm:$0xff] (!%p4283_p9)  ;;  %v4805_v38 = vpack.c.bf16 (!%p4283_p9), %v3251_v20, %v3249_v52  ;;  %4804 = vmatprep.subr.bf16.mxu1 (!%p4283_p9), %v4803_v19  ;;  %v3256_v48 = vld [vmem:[#allocation15 + $0x138] sm:$0xff] (!%p4283_p9) }
 0x4ea   : > { %2585 = vst [vmem:[#allocation2 + $0x130] sm:$0xff] %v2553_v43  ;;  %v2554_v26 = vadd.f32 %v2522_v0, %v2458_v28  ;;  %v2646_v28 = vld [vmem:[#allocation15 + $0x98] sm:$0xff] (!%p4283_p9)  ;;  %v2645_v43 = vld [vmem:[#allocation15 + $0x90] sm:$0xff] (!%p4283_p9)  ;;  %v2648_v58 = vld [vmem:[#allocation15 + $0xa8] sm:$0xff] (!%p4283_p9)  ;;  %v4807_v10 = vpack.c.bf16 (!%p4283_p9), %v3256_v48, %v3254_v44 }
 0x4eb   : > { %v5234_v23 = vpop.eup %5233  ;;  %5239 = vrcp.f32 %v2366_v17  ;;  %v4787_v60 = vpack.c.bf16 (!%p4283_p9), %v2646_v28, %v2644_v50  ;;  %v2650_v0 = vld [vmem:[#allocation15 + $0xb8] sm:$0xff] (!%p4283_p9)  ;;  %v4789_v17 = vpack.c.bf16 (!%p4283_p9), %v2645_v43, %v2643_v53  ;;  %v7137_v40 = vld [vmem:[#allocation2 + $0x110] sm:$0xff] (!%p4283_p9)  ;;  %4806 = vmatpush1.bf16.msra.mxu1 (!%p4283_p9), %v4805_v38  ;;  %v7141_v59 = vld [vmem:[#allocation2 + $0x118] sm:$0xff] (!%p4283_p9) }
 0x4ec   : > { %2586 = vst [vmem:[#allocation2 + $0x138] sm:$0xff] %v2554_v26  ;;  %v2459_v11 = vmul.f32 %v5234_v23, %v2232_v27  ;;  %v2491_v46 = vsub.f32 1.0, %v5234_v23  ;;  %4782 = vmatpush1.bf16.msra.mxu0 (!%p4283_p9), %v4781_v24  ;;  %v4791_v26 = vpack.c.bf16 (!%p4283_p9), %v2650_v0, %v2648_v58  ;;  %v2647_v27 = vld [vmem:[#allocation15 + $0xa0] sm:$0xff] (!%p4283_p9)  ;;  %v2649_v23 = vld [vmem:[#allocation15 + $0xb0] sm:$0xff] (!%p4283_p9)  ;;  %4808 = vmatprep.subr.bf16.mxu1 (!%p4283_p9), %v4807_v10  ;;  %v3258_v50 = vld [vmem:[#allocation15 + $0x148] sm:$0xff] (!%p4283_p9) }
 0x4ed   : > { %v5236_v30 = vpop.eup %5235  ;;  %4784 = vmatprep.subr.bf16.mxu0 (!%p4283_p9), %v4783_v49  ;;  %v3253_v24 = vld [vmem:[#allocation15 + $0x120] sm:$0xff] (!%p4283_p9)  ;;  %v3255_v49 = vld [vmem:[#allocation15 + $0x130] sm:$0xff] (!%p4283_p9)  ;;  %v3260_v28 = vld [vmem:[#allocation15 + $0x158] sm:$0xff] (!%p4283_p9) }
 0x4ee   : > { %v2523_v31 = vmul.f32 %v5259_v15, %v2491_v46  ;;  %v2460_v51 = vmul.f32 %v5236_v30, %v2234_v2  ;;  %v2492_v3 = vsub.f32 1.0, %v5236_v30  ;;  %v2654_v46 = vld [vmem:[#allocation15 + $0xd8] sm:$0xff] (!%p4283_p9)  ;;  %v4793_v2 = vpack.c.bf16 (!%p4283_p9), %v2649_v23, %v2647_v27  ;;  %v2651_v15 = vld [vmem:[#allocation15 + $0xc0] sm:$0xff] (!%p4283_p9)  ;;  %v3259_v53 = vld [vmem:[#allocation15 + $0x150] sm:$0xff] (!%p4283_p9) }
 0x4ef   : > { %v4809_v47 = vpack.c.bf16 (!%p4283_p9), %v3255_v49, %v3253_v24  ;;  %v7145_v43 = vld [vmem:[#allocation2 + $0x120] sm:$0xff] (!%p4283_p9)  ;;  %v3262_v0 = vld [vmem:[#allocation15 + $0x168] sm:$0xff] (!%p4283_p9)  ;;  %v3261_v27 = vld [vmem:[#allocation15 + $0x160] sm:$0xff] (!%p4283_p9) }
 0x4f0   : > { %v2555_v16 = vadd.f32 %v2523_v31, %v2459_v11  ;;  %v2524_v34 = vmul.f32 %v5260_v5, %v2492_v3  ;;  %4786 = vmatpush1.bf16.msra.mxu0 (!%p4283_p9), %v4785_v7  ;;  %v2652_v11 = vld [vmem:[#allocation15 + $0xc8] sm:$0xff] (!%p4283_p9)  ;;  %v2653_v31 = vld [vmem:[#allocation15 + $0xd0] sm:$0xff] (!%p4283_p9)  ;;  %v2658_v3 = vld [vmem:[#allocation15 + $0xf8] sm:$0xff] (!%p4283_p9)  ;;  %v4811_v7 = vpack.c.bf16 (!%p4283_p9), %v3260_v28, %v3258_v50 }
 0x4f1   : > { %4788 = vmatprep.subr.bf16.mxu0 (!%p4283_p9), %v4787_v60  ;;  %v4795_v30 = vpack.c.bf16 (!%p4283_p9), %v2654_v46, %v2652_v11  ;;  %4810 = vmatpush1.bf16.msra.mxu1 (!%p4283_p9), %v4809_v47  ;;  %v3257_v60 = vld [vmem:[#allocation15 + $0x140] sm:$0xff] (!%p4283_p9)  ;;  %v3263_v23 = vld [vmem:[#allocation15 + $0x170] sm:$0xff] (!%p4283_p9)  ;;  %v3274_v52 = vld [vmem:[#allocation15 + $0x1c8] sm:$0xff] (!%p4283_p9) }
 0x4f2   : > { %2587 = vst [vmem:[#allocation2 + $0x140] sm:$0xff] %v2555_v16  ;;  %v2556_v54 = vadd.f32 %v2524_v34, %v2460_v51  ;;  %v2656_v51 = vld [vmem:[#allocation15 + $0xe8] sm:$0xff] (!%p4283_p9)  ;;  %v4797_v16 = vpack.c.bf16 (!%p4283_p9), %v2653_v31, %v2651_v15  ;;  %v2655_v34 = vld [vmem:[#allocation15 + $0xe0] sm:$0xff] (!%p4283_p9)  ;;  %v4813_v58 = vpack.c.bf16 (!%p4283_p9), %v3259_v53, %v3257_v60  ;;  %4812 = vmatprep.subr.bf16.mxu1 (!%p4283_p9), %v4811_v7  ;;  %v3276_v20 = vld [vmem:[#allocation15 + $0x1d8] sm:$0xff] (!%p4283_p9) }
 0x4f3   : > { %v5238_v14 = vpop.eup %5237  ;;  %v4799_v5 = vpack.c.bf16 (!%p4283_p9), %v2658_v3, %v2656_v51  ;;  %v7149_v11 = vld [vmem:[#allocation2 + $0x128] sm:$0xff] (!%p4283_p9)  ;;  %v4817_v46 = vpack.c.bf16 (!%p4283_p9), %v3263_v23, %v3261_v27  ;;  %v3267_v51 = vld [vmem:[#allocation15 + $0x190] sm:$0xff] (!%p4283_p9)  ;;  %v7153_v3 = vld [vmem:[#allocation2 + $0x130] sm:$0xff] (!%p4283_p9)  ;;  %v4827_v38 = vpack.c.bf16 (!%p4283_p9), %v3276_v20, %v3274_v52 }
 0x4f4   : > { %2588 = vst [vmem:[#allocation2 + $0x148] sm:$0xff] %v2556_v54  ;;  %v2461_v45 = vmul.f32 %v5238_v14, %v2236_v25  ;;  %v2493_v61 = vsub.f32 1.0, %v5238_v14  ;;  %4790 = vmatpush1.bf16.msra.mxu0 (!%p4283_p9), %v4789_v17  ;;  %v2657_v54 = vld [vmem:[#allocation15 + $0xf0] sm:$0xff] (!%p4283_p9)  ;;  %v7049_v14 = vld [vmem:[#allocation2 + $0x20] sm:$0xff] (!%p4283_p9)  ;;  %v3265_v31 = vld [vmem:[#allocation15 + $0x180] sm:$0xff] (!%p4283_p9) }
 0x4f5   : > { %v5240_v32 = vpop.eup %5239  ;;  %4792 = vmatprep.subr.bf16.mxu0 (!%p4283_p9), %v4791_v26  ;;  %v4801_v25 = vpack.c.bf16 (!%p4283_p9), %v2657_v54, %v2655_v34  ;;  %4814 = vmatpush1.bf16.msra.mxu1 (!%p4283_p9), %v4813_v58  ;;  %v3264_v17 = vld [vmem:[#allocation15 + $0x178] sm:$0xff] (!%p4283_p9)  ;;  %v7157_v41 = vld [vmem:[#allocation2 + $0x138] sm:$0xff] (!%p4283_p9)  ;;  %v3273_v44 = vld [vmem:[#allocation15 + $0x1c0] sm:$0xff] (!%p4283_p9) }
 0x4f6   : > { %v2525_v22 = vmul.f32 %v5261_v63, %v2493_v61  ;;  %v2462_v21 = vmul.f32 %v5240_v32, %v2238_v39  ;;  %v2494_v8 = vsub.f32 1.0, %v5240_v32  ;;  %2594 = sbr.rel (%p4283_p9) target bundleno = 2031 (0x7ef), region = 96  ;;  %v7057_v61 = vld [vmem:[#allocation2 + $0x30] sm:$0xff] (!%p4283_p9)  ;;  %v7061_v39 = vld [vmem:[#allocation2 + $0x38] sm:$0xff] (!%p4283_p9)  ;;  %v7065_v32 = vld [vmem:[#allocation2 + $0x40] sm:$0xff] (!%p4283_p9)  ;;  %v4815_v26 = vpack.c.bf16 (!%p4283_p9), %v3264_v17, %v3262_v0 }
 0x4f7   : > { %v7069_v63 = vld [vmem:[#allocation2 + $0x48] sm:$0xff] (!%p4283_p9)  ;;  %v3272_v34 = vld [vmem:[#allocation15 + $0x1b8] sm:$0xff] (!%p4283_p9)  ;;  %v3275_v48 = vld [vmem:[#allocation15 + $0x1d0] sm:$0xff] (!%p4283_p9) }
 0x4f8   : > { %v2557_v33 = vadd.f32 %v2525_v22, %v2461_v45  ;;  %v2526_v42 = vmul.f32 %v5262_v36, %v2494_v8  ;;  %4794 = vmatpush1.bf16.msra.mxu0 (!%p4283_p9), %v4793_v2  ;;  %v7053_v45 = vld [vmem:[#allocation2 + $0x28] sm:$0xff] (!%p4283_p9)  ;;  %v7073_v22 = vld [vmem:[#allocation2 + $0x50] sm:$0xff] (!%p4283_p9)  ;;  %v7081_v8 = vld [vmem:[#allocation2 + $0x60] sm:$0xff] (!%p4283_p9)  ;;  %4816 = vmatprep.subr.bf16.mxu1 (!%p4283_p9), %v4815_v26  ;;  %v4829_v24 = vpack.c.bf16 (!%p4283_p9), %v3275_v48, %v3273_v44 }
 0x4f9   : > { %4796 = vmatprep.subr.bf16.mxu0 (!%p4283_p9), %v4795_v30  ;;  %v7089_v36 = vld [vmem:[#allocation2 + $0x70] sm:$0xff] (!%p4283_p9)  ;;  %4818 = vmatpush1.bf16.msra.mxu1 (!%p4283_p9), %v4817_v46  ;;  %v3268_v30 = vld [vmem:[#allocation15 + $0x198] sm:$0xff] (!%p4283_p9)  ;;  %v3277_v28 = vld [vmem:[#allocation15 + $0x1e0] sm:$0xff] (!%p4283_p9) }
 0x4fa   : > { %2589 = vst [vmem:[#allocation2 + $0x150] sm:$0xff] %v2557_v33  ;;  %v2558_v18 = vadd.f32 %v2526_v42, %v2462_v21  ;;  %v7077_v21 = vld [vmem:[#allocation2 + $0x58] sm:$0xff] (!%p4283_p9)  ;;  %v7085_v33 = vld [vmem:[#allocation2 + $0x68] sm:$0xff] (!%p4283_p9)  ;;  %v3266_v2 = vld [vmem:[#allocation15 + $0x188] sm:$0xff] (!%p4283_p9) }
 0x4fb   : > { %v7093_v42 = vld [vmem:[#allocation2 + $0x78] sm:$0xff] (!%p4283_p9)  ;;  %v4819_v15 = vpack.c.bf16 (!%p4283_p9), %v3268_v30, %v3266_v2  ;;  %v7161_v10 = vld [vmem:[#allocation2 + $0x140] sm:$0xff] (!%p4283_p9)  ;;  %v3278_v49 = vld [vmem:[#allocation15 + $0x1e8] sm:$0xff] (!%p4283_p9) }
 0x4fc   : > { %2590 = vst [vmem:[#allocation2 + $0x158] sm:$0xff] %v2558_v18  ;;  %4798 = vmatpush1.bf16.msra.mxu0 (!%p4283_p9), %v4797_v16  ;;  %v7097_v18 = vld [vmem:[#allocation2 + $0x80] sm:$0xff] (!%p4283_p9)  ;;  %v4821_v16 = vpack.c.bf16 (!%p4283_p9), %v3267_v51, %v3265_v31  ;;  %v3279_v7 = vld [vmem:[#allocation15 + $0x1f0] sm:$0xff] (!%p4283_p9)  ;;  %v7165_v60 = vld [vmem:[#allocation2 + $0x148] sm:$0xff] (!%p4283_p9) }
 0x4fd   : > { %4800 = vmatprep.subr.bf16.mxu0 %v4799_v5  ;;  %4820 = vmatprep.subr.bf16.mxu1 %v4819_v15  ;;  %v3270_v5 = vld [vmem:[#allocation15 + $0x1a8] sm:$0xff]  ;;  %v3280_v47 = vld [vmem:[#allocation15 + $0x1f8] sm:$0xff]  ;;  %v4833_v53 = vpack.c.bf16 %v3279_v7, %v3277_v28  ;;  %v2659_v17 = vld [vmem:[#allocation16] sm:$0x3] }
 0x4fe   : > { %4822 = vmatpush1.bf16.msra.mxu1 %v4821_v16  ;;  %v4823_v54 = vpack.c.bf16 %v3272_v34, %v3270_v5  ;;  %v4831_v50 = vpack.c.bf16 %v3280_v47, %v3278_v49  ;;  %v7177_v26 = vrot.slane %v2659_v17, %v6843_v37 }
 0x500   : > { %4802 = vmatpush1.bf16.msra.mxu0 %v4801_v25  ;;  %v3269_v25 = vld [vmem:[#allocation15 + $0x1a0] sm:$0xff]  ;;  %4824 = vmatprep.subr.bf16.mxu1 %v4823_v54 }
 0x501   : > { %v4825_v19 = vpack.c.bf16 %v3271_v29, %v3269_v25  ;;  %v7169_v58 = vld [vmem:[#allocation2 + $0x150] sm:$0xff] }
 0x503   : > { %2736 = vmatmul.mubr.f32.vlgmr.msra.gmra.mrb[0].mxu0 %v7049_v14  ;;  %4826 = vmatpush1.bf16.msra.mxu1 %v4825_v19  ;;  %v7173_v0 = vld [vmem:[#allocation2 + $0x158] sm:$0xff] }
 0x504   : > { %2741 = vmatprep.mubr.f32.mxu0 %v5892_v4  ;;  %4828 = vmatprep.subr.bf16.mxu1 %v4827_v38 }
 0x507   : > { %2742 = vmatmul.mubr.f32.gmra.mrb[2].mxu0 %v7053_v45  ;;  %4830 = vmatpush1.bf16.msra.mxu1 %v4829_v24 }
 0x508   : > { %2747 = vmatprep.mubr.f32.mxu0 %v5892_v4  ;;  %4832 = vmatprep.subr.bf16.mxu1 %v4831_v50 }
 0x50b   : > { %2748 = vmatmul.mubr.f32.gmra.mrb[4].mxu0 %v7057_v61  ;;  %4834 = vmatpush1.bf16.msra.mxu1 %v4833_v53 }
 0x50c   : > { %2753 = vmatprep.mubr.f32.mxu0 %v5892_v4 }
 0x50f   : > { %2754 = vmatmul.mubr.f32.gmra.mrb[6].mxu0 %v7061_v39 }
 0x510   : > { %2759 = vmatprep.mubr.f32.mxu0 %v5892_v4 }
 0x513   : > { %2760 = vmatmul.mubr.f32.gmra.mrb[8].mxu0 %v7065_v32 }
 0x514   : > { %2765 = vmatprep.mubr.f32.mxu0 %v5892_v4 }
 0x517   : > { %2766 = vmatmul.mubr.f32.gmra.mrb[10].mxu0 %v7069_v63 }
 0x518   : > { %2771 = vmatprep.mubr.f32.mxu0 %v5892_v4 }
 0x51b   : > { %2772 = vmatmul.mubr.f32.gmra.mrb[12].mxu0 %v7073_v22 }
 0x51c   : > { %2777 = vmatprep.mubr.f32.mxu0 %v5892_v4 }
 0x51f   : > { %2778 = vmatmul.mubr.f32.gmra.mrb[14].mxu0 %v7077_v21 }
 0x520   : > { %2783 = vmatprep.mubr.f32.mxu0 %v5892_v4 }
 0x523   : > { %2784 = vmatmul.mubr.f32.gmra.mrb[16].mxu0 %v7081_v8 }
 0x524   : > { %2789 = vmatprep.mubr.f32.mxu0 %v5892_v4 }
 0x527   : > { %2790 = vmatmul.mubr.f32.gmra.mrb[18].mxu0 %v7085_v33 }
 0x528   : > { %2795 = vmatprep.mubr.f32.mxu0 %v5892_v4 }
 0x52b   : > { %2796 = vmatmul.mubr.f32.gmra.mrb[20].mxu0 %v7089_v36 }
 0x52c   : > { %2801 = vmatprep.mubr.f32.mxu0 %v5892_v4 }
 0x52f   : > { %2802 = vmatmul.mubr.f32.gmra.mrb[22].mxu0 %v7093_v42 }
 0x530   : > { %2807 = vmatprep.mubr.f32.mxu0 %v5892_v4 }
 0x533   : > { %2808 = vmatmul.mubr.f32.gmra.mrb[24].mxu0 %v7097_v18 }
 0x534   : > { %2813 = vmatprep.mubr.f32.mxu0 %v5892_v4 }
 0x537   : > { %2814 = vmatmul.mubr.f32.gmra.mrb[26].mxu0 %v7101_v6 }
 0x538   : > { %2819 = vmatprep.mubr.f32.mxu0 %v5892_v4 }
 0x53b   : > { %2820 = vmatmul.mubr.f32.gmra.mrb[28].mxu0 %v7105_v35 }
 0x53c   : > { %2825 = vmatprep.mubr.f32.mxu0 %v5892_v4 }
 0x53f   : > { %2826 = vmatmul.mubr.f32.gmra.mrb[30].mxu0 %v7109_v62 }
 0x540   : > { %2831 = vmatprep.mubr.f32.mxu0 %v5892_v4 }
 0x543   : > { %2832 = vmatmul.mubr.f32.gmra.mrb[32].mxu0 %v7113_v12 }
 0x544   : > { %2837 = vmatprep.mubr.f32.mxu0 %v5892_v4 }
 0x547   : > { %2838 = vmatmul.mubr.f32.gmra.mrb[34].mxu0 %v7117_v9 }
 0x548   : > { %2843 = vmatprep.mubr.f32.mxu0 %v5892_v4 }
 0x54b   : > { %2844 = vmatmul.mubr.f32.gmra.mrb[36].mxu0 %v7121_v13 }
 0x54c   : > { %2849 = vmatprep.mubr.f32.mxu0 %v5892_v4 }
 0x54f   : > { %2850 = vmatmul.mubr.f32.gmra.mrb[38].mxu0 %v7125_v56 }
 0x550   : > { %2855 = vmatprep.mubr.f32.mxu0 %v5892_v4 }
 0x553   : > { %2856 = vmatmul.mubr.f32.gmra.mrb[40].mxu0 %v7129_v57 }
 0x554   : > { %2861 = vmatprep.mubr.f32.mxu0 %v5892_v4 }
 0x557   : > { %2862 = vmatmul.mubr.f32.gmra.mrb[42].mxu0 %v7133_v1 }
 0x558   : > { %2867 = vmatprep.mubr.f32.mxu0 %v5892_v4 }
 0x55b   : > { %2868 = vmatmul.mubr.f32.gmra.mrb[44].mxu0 %v7137_v40 }
 0x55c   : > { %2873 = vmatprep.mubr.f32.mxu0 %v5892_v4 }
 0x55f   : > { %2874 = vmatmul.mubr.f32.gmra.mrb[46].mxu0 %v7141_v59 }
 0x560   : > { %2879 = vmatprep.mubr.f32.mxu0 %v5892_v4 }
 0x563   : > { %2880 = vmatmul.mubr.f32.gmra.mrb[48].mxu0 %v7145_v43 }
 0x564   : > { %2885 = vmatprep.mubr.f32.mxu0 %v5892_v4 }
 0x567   : > { %2886 = vmatmul.mubr.f32.gmra.mrb[50].mxu0 %v7149_v11 }
 0x568   : > { %2891 = vmatprep.mubr.f32.mxu0 %v5892_v4 }
 0x56b   : > { %2892 = vmatmul.mubr.f32.gmra.mrb[52].mxu0 %v7153_v3 }
 0x56c   : > { %2897 = vmatprep.mubr.f32.mxu0 %v5892_v4 }
 0x56f   : > { %2898 = vmatmul.mubr.f32.gmra.mrb[54].mxu0 %v7157_v41 }
 0x570   : > { %2903 = vmatprep.mubr.f32.mxu0 %v5892_v4 }
 0x573   : > { %2904 = vmatmul.mubr.f32.gmra.mrb[56].mxu0 %v7161_v10 }
 0x574   : > { %2909 = vmatprep.mubr.f32.mxu0 %v5892_v4 }
 0x577   : > { %2910 = vmatmul.mubr.f32.gmra.mrb[58].mxu0 %v7165_v60 }
 0x578   : > { %2915 = vmatprep.mubr.f32.mxu0 %v5892_v4 }
 0x57b   : > { %2916 = vmatmul.mubr.f32.gmra.mrb[60].mxu0 %v7169_v58 }
 0x57c   : > { %2921 = vmatprep.mubr.f32.mxu0 %v5892_v4 }
 0x57f   : > { %2922 = vmatmul.mubr.f32.gmra.mrb[62].mxu0 %v7173_v0 }
 0x5d6   : > { %v2737_v27 = vpop.f32.mrb[0].mxu0 }
 0x5d7   : > { %v2738_v23 = vadd.f32 %v2737_v27, %v7177_v26  ;;  %v2739_v46 = vpop.f32.mrb[1].mxu0 }
 0x5d9   : > { %v4284_v2 = vmul.f32 -1.442695, %v2738_v23  ;;  %v7192_v23 = vrot.slane %v2659_v17, %v6865_v55 }
 0x5da   : > { %v2743_v30 = vpop.f32.mrb[2].mxu0 }
 0x5db   : > { %5263 = vpow2.f32 %v4284_v2  ;;  %v2744_v15 = vadd.f32 %v2743_v30, %v7177_v26  ;;  %v2745_v31 = vpop.f32.mrb[3].mxu0 }
 0x5dd   : > { %v4285_v51 = vmul.f32 -1.442695, %v2744_v15 }
 0x5de   : > { %v2749_v16 = vpop.f32.mrb[4].mxu0 }
 0x5df   : > { %5265 = vpow2.f32 %v4285_v51  ;;  %v2750_v5 = vadd.f32 %v2749_v16, %v7177_v26  ;;  %v2751_v34 = vpop.f32.mrb[5].mxu0 }
 0x5e1   : > { %v4286_v54 = vmul.f32 -1.442695, %v2750_v5 }
 0x5e2   : > { %v2755_v25 = vpop.f32.mrb[6].mxu0 }
 0x5e3   : > { %5267 = vpow2.f32 %v4286_v54  ;;  %v2756_v29 = vadd.f32 %v2755_v25, %v7177_v26  ;;  %v7183_v19 = vpop.f32.mrb[7].mxu0  ;;  %v2740_v54 = vadd.f32 %v2739_v46, %v7192_v23 }
 0x5e5   : > { %v5264_v52 = vpop.eup %5263  ;;  %v4287_v20 = vmul.f32 -1.442695, %v2756_v29 }
 0x5e6   : > { %v3024_v38 = vadd.f32 1.0, %v5264_v52  ;;  %v2761_v44 = vpop.f32.mrb[8].mxu0 }
 0x5e7   : > { %5269 = vpow2.f32 %v4287_v20  ;;  %v2762_v48 = vadd.f32 %v2761_v44, %v7177_v26  ;;  %v7186_v24 = vpop.f32.mrb[9].mxu0 }
 0x5e8   : > { %5271 = vrcp.f32 %v3024_v38 }
 0x5e9   : > { %v5266_v49 = vpop.eup %5265  ;;  %v4288_v47 = vmul.f32 -1.442695, %v2762_v48 }
 0x5ea   : > { %v3025_v50 = vadd.f32 1.0, %v5266_v49  ;;  %v2767_v28 = vpop.f32.mrb[10].mxu0 }
 0x5eb   : > { %5273 = vpow2.f32 %v4288_v47  ;;  %v2768_v7 = vadd.f32 %v2767_v28, %v7177_v26  ;;  %v7189_v53 = vpop.f32.mrb[11].mxu0  ;;  %v2746_v47 = vadd.f32 %v2745_v31, %v7192_v23 }
 0x5ec   : > { %5275 = vrcp.f32 %v3025_v50 }
 0x5ed   : > { %v5268_v27 = vpop.eup %5267  ;;  %v4289_v2 = vmul.f32 -1.442695, %v2768_v7 }
 0x5ee   : > { %v3026_v30 = vadd.f32 1.0, %v5268_v27  ;;  %v2773_v15 = vpop.f32.mrb[12].mxu0 }
 0x5ef   : > { %5277 = vpow2.f32 %v4289_v2  ;;  %v2774_v51 = vadd.f32 %v2773_v15, %v7177_v26  ;;  %v7195_v16 = vpop.f32.mrb[13].mxu0 }
 0x5f0   : > { %5279 = vrcp.f32 %v3026_v30 }
 0x5f1   : > { %v5270_v5 = vpop.eup %5269  ;;  %v4290_v25 = vmul.f32 -1.442695, %v2774_v51 }
 0x5f2   : > { %v5272_v29 = vpop.eup %5271  ;;  %v3027_v52 = vadd.f32 1.0, %v5270_v5  ;;  %v2779_v20 = vpop.f32.mrb[14].mxu0 }
 0x5f3   : > { %v3120_v38 = vmul.f32 %v5272_v29, %v2740_v54  ;;  %5281 = vpow2.f32 %v4290_v25  ;;  %v2780_v17 = vadd.f32 %v2779_v20, %v7177_v26  ;;  %v7199_v44 = vpop.f32.mrb[15].mxu0  ;;  %v3152_v48 = vsub.f32 1.0, %v5272_v29 }
 0x5f4   : > { %5283 = vrcp.f32 %v3027_v52  ;;  %v2752_v25 = vadd.f32 %v2751_v34, %v7192_v23 }
 0x5f5   : > { %v5274_v49 = vpop.eup %5273  ;;  %v4291_v50 = vmul.f32 -1.442695, %v2780_v17  ;;  %v3184_v28 = vmul.f32 %v3152_v48, %v7049_v14 }
 0x5f6   : > { %v5276_v7 = vpop.eup %5275  ;;  %v3028_v46 = vadd.f32 1.0, %v5274_v49  ;;  %v2785_v27 = vpop.f32.mrb[16].mxu0 }
 0x5f7   : > { %v3121_v2 = vmul.f32 %v5276_v7, %v2746_v47  ;;  %5285 = vpow2.f32 %v4291_v50  ;;  %v2786_v30 = vadd.f32 %v2785_v27, %v7177_v26  ;;  %v7204_v15 = vpop.f32.mrb[17].mxu0  ;;  %v7206_v51 = vadd.f32 %v3184_v28, %v3120_v38 }
 0x5f8   : > { %5287 = vrcp.f32 %v3028_v46  ;;  %v3153_v5 = vsub.f32 1.0, %v5276_v7  ;;  %v2758_v50 = vadd.f32 %v7183_v19, %v7192_v23 }
 0x5f9   : > { %v5278_v54 = vpop.eup %5277  ;;  %v4292_v31 = vmul.f32 -1.442695, %v2786_v30  ;;  %3359 = vmatmul.mubr.f32.vlgmr.msra.gmra.mrb[0].mxu1 %v7206_v51 }
 0x5fa   : > { %v5280_v14 = vpop.eup %5279  ;;  %v3029_v29 = vadd.f32 1.0, %v5278_v54  ;;  %v2791_v52 = vpop.f32.mrb[18].mxu0  ;;  %3364 = vmatprep.mubr.f32.mxu1 %v5892_v4  ;;  %v3185_v20 = vmul.f32 %v3153_v5, %v7053_v45 }
 0x5fb   : > { %v3122_v17 = vmul.f32 %v5280_v14, %v2752_v25  ;;  %5289 = vpow2.f32 %v4292_v31  ;;  %v2792_v38 = vadd.f32 %v2791_v52, %v7177_v26  ;;  %v7213_v48 = vpop.f32.mrb[19].mxu0  ;;  %v3154_v49 = vsub.f32 1.0, %v5280_v14 }
 0x5fc   : > { %5291 = vrcp.f32 %v3029_v29  ;;  %v7215_v47 = vadd.f32 %v3185_v20, %v3121_v2 }
 0x5fd   : > { %v5282_v34 = vpop.eup %5281  ;;  %v4293_v28 = vmul.f32 -1.442695, %v2792_v38  ;;  %v3186_v7 = vmul.f32 %v3154_v49, %v7057_v61  ;;  %v2764_v61 = vadd.f32 %v7186_v24, %v7192_v23 }
 0x5fe   : > { %v5284_v46 = vpop.eup %5283  ;;  %v3030_v27 = vadd.f32 1.0, %v5282_v34  ;;  %3365 = vmatmul.mubr.f32.gmra.mrb[2].mxu1 %v7215_v47  ;;  %v2797_v45 = vpop.f32.mrb[20].mxu0 }
 0x5ff   : > { %v3123_v30 = vmul.f32 %v5284_v46, %v2758_v50  ;;  %5293 = vpow2.f32 %v4293_v28  ;;  %v2798_v5 = vadd.f32 %v2797_v45, %v7177_v26  ;;  %v7222_v54 = vpop.f32.mrb[21].mxu0  ;;  %3370 = vmatprep.mubr.f32.mxu1 %v5892_v4  ;;  %v7225_v2 = vadd.f32 %v3186_v7, %v3122_v17 }
 0x600   : > { %5295 = vrcp.f32 %v3030_v27  ;;  %v3155_v19 = vsub.f32 1.0, %v5284_v46  ;;  %v2770_v28 = vadd.f32 %v7189_v53, %v7192_v23 }
 0x601   : > { %v5286_v25 = vpop.eup %5285  ;;  %v4294_v31 = vmul.f32 -1.442695, %v2798_v5 }
 0x602   : > { %v5288_v14 = vpop.eup %5287  ;;  %v3031_v29 = vadd.f32 1.0, %v5286_v25  ;;  %3371 = vmatmul.mubr.f32.gmra.mrb[4].mxu1 %v7225_v2  ;;  %v2803_v52 = vpop.f32.mrb[22].mxu0  ;;  %v3187_v20 = vmul.f32 %v3155_v19, %v7061_v39 }
 0x603   : > { %v3124_v38 = vmul.f32 %v5288_v14, %v2764_v61  ;;  %5297 = vpow2.f32 %v4294_v31  ;;  %v2804_v49 = vadd.f32 %v2803_v52, %v7177_v26  ;;  %v7232_v17 = vpop.f32.mrb[23].mxu0  ;;  %3376 = vmatprep.mubr.f32.mxu1 %v5892_v4  ;;  %v3156_v34 = vsub.f32 1.0, %v5288_v14 }
 0x604   : > { %5299 = vrcp.f32 %v3031_v29  ;;  %v7235_v50 = vadd.f32 %v3187_v20, %v3123_v30 }
 0x605   : > { %v5290_v24 = vpop.eup %5289  ;;  %v4295_v7 = vmul.f32 -1.442695, %v2804_v49  ;;  %v3188_v46 = vmul.f32 %v3156_v34, %v7065_v32  ;;  %v2776_v32 = vadd.f32 %v7195_v16, %v7192_v23 }
 0x606   : > { %v5292_v39 = vpop.eup %5291  ;;  %v3032_v27 = vadd.f32 1.0, %v5290_v24  ;;  %3377 = vmatmul.mubr.f32.gmra.mrb[6].mxu1 %v7235_v50  ;;  %v2809_v45 = vpop.f32.mrb[24].mxu0 }
 0x607   : > { %v3125_v5 = vmul.f32 %v5292_v39, %v2770_v28  ;;  %5301 = vpow2.f32 %v4295_v7  ;;  %v2810_v19 = vadd.f32 %v2809_v45, %v7177_v26  ;;  %v7242_v25 = vpop.f32.mrb[25].mxu0  ;;  %3382 = vmatprep.mubr.f32.mxu1 %v5892_v4  ;;  %v7245_v30 = vadd.f32 %v3188_v46, %v3124_v38 }
 0x608   : > { %5303 = vrcp.f32 %v3032_v27  ;;  %v3157_v53 = vsub.f32 1.0, %v5292_v39  ;;  %v2782_v7 = vadd.f32 %v7199_v44, %v7192_v23 }
 0x609   : > { %v5294_v61 = vpop.eup %5293  ;;  %v4296_v31 = vmul.f32 -1.442695, %v2810_v19 }
 0x60a   : > { %v5296_v14 = vpop.eup %5295  ;;  %v3033_v29 = vadd.f32 1.0, %v5294_v61  ;;  %3383 = vmatmul.mubr.f32.gmra.mrb[8].mxu1 %v7245_v30  ;;  %v2815_v52 = vpop.f32.mrb[26].mxu0  ;;  %v3189_v20 = vmul.f32 %v3157_v53, %v7069_v63 }
 0x60b   : > { %v3126_v49 = vmul.f32 %v5296_v14, %v2776_v32  ;;  %5305 = vpow2.f32 %v4296_v31  ;;  %v2816_v34 = vadd.f32 %v2815_v52, %v7177_v26  ;;  %v7252_v38 = vpop.f32.mrb[27].mxu0  ;;  %3388 = vmatprep.mubr.f32.mxu1 %v5892_v4  ;;  %v3158_v24 = vsub.f32 1.0, %v5296_v14 }
 0x60c   : > { %5307 = vrcp.f32 %v3033_v29  ;;  %v7255_v28 = vadd.f32 %v3189_v20, %v3125_v5 }
 0x60d   : > { %v5298_v16 = vpop.eup %5297  ;;  %v4297_v46 = vmul.f32 -1.442695, %v2816_v34  ;;  %v3190_v39 = vmul.f32 %v3158_v24, %v7073_v22  ;;  %v2788_v22 = vadd.f32 %v7204_v15, %v7192_v23 }
 0x60e   : > { %v5300_v63 = vpop.eup %5299  ;;  %v3034_v27 = vadd.f32 1.0, %v5298_v16  ;;  %3389 = vmatmul.mubr.f32.gmra.mrb[10].mxu1 %v7255_v28  ;;  %v2821_v45 = vpop.f32.mrb[28].mxu0 }
 0x60f   : > { %v3127_v19 = vmul.f32 %v5300_v63, %v2782_v7  ;;  %5309 = vpow2.f32 %v4297_v46  ;;  %v2822_v53 = vadd.f32 %v2821_v45, %v7177_v26  ;;  %v7262_v61 = vpop.f32.mrb[29].mxu0  ;;  %3394 = vmatprep.mubr.f32.mxu1 %v5892_v4  ;;  %v7265_v5 = vadd.f32 %v3190_v39, %v3126_v49 }
 0x610   : > { %5311 = vrcp.f32 %v3034_v27  ;;  %v3159_v44 = vsub.f32 1.0, %v5300_v63  ;;  %v2794_v46 = vadd.f32 %v7213_v48, %v7192_v23 }
 0x611   : > { %v5302_v32 = vpop.eup %5301  ;;  %v4298_v31 = vmul.f32 -1.442695, %v2822_v53 }
 0x612   : > { %v5304_v14 = vpop.eup %5303  ;;  %v3035_v29 = vadd.f32 1.0, %v5302_v32  ;;  %3395 = vmatmul.mubr.f32.gmra.mrb[12].mxu1 %v7265_v5  ;;  %v2827_v52 = vpop.f32.mrb[30].mxu0  ;;  %v3191_v20 = vmul.f32 %v3159_v44, %v7077_v21 }
 0x613   : > { %v3128_v34 = vmul.f32 %v5304_v14, %v2788_v22  ;;  %5313 = vpow2.f32 %v4298_v31  ;;  %v2828_v24 = vadd.f32 %v2827_v52, %v7177_v26  ;;  %v7272_v49 = vpop.f32.mrb[31].mxu0  ;;  %3400 = vmatprep.mubr.f32.mxu1 %v5892_v4  ;;  %v3160_v16 = vsub.f32 1.0, %v5304_v14 }
 0x614   : > { %5315 = vrcp.f32 %v3035_v29  ;;  %v7275_v7 = vadd.f32 %v3191_v20, %v3127_v19 }
 0x615   : > { %v5306_v15 = vpop.eup %5305  ;;  %v4299_v39 = vmul.f32 -1.442695, %v2828_v24  ;;  %v3192_v63 = vmul.f32 %v3160_v16, %v7081_v8  ;;  %v2800_v8 = vadd.f32 %v7222_v54, %v7192_v23 }
 0x616   : > { %v5308_v21 = vpop.eup %5307  ;;  %v3036_v27 = vadd.f32 1.0, %v5306_v15  ;;  %3401 = vmatmul.mubr.f32.gmra.mrb[14].mxu1 %v7275_v7  ;;  %v2833_v45 = vpop.f32.mrb[32].mxu0 }
 0x617   : > { %v3129_v53 = vmul.f32 %v5308_v21, %v2794_v46  ;;  %5317 = vpow2.f32 %v4299_v39  ;;  %v2834_v44 = vadd.f32 %v2833_v45, %v7177_v26  ;;  %v7282_v32 = vpop.f32.mrb[33].mxu0  ;;  %3406 = vmatprep.mubr.f32.mxu1 %v5892_v4  ;;  %v7285_v19 = vadd.f32 %v3192_v63, %v3128_v34 }
 0x618   : > { %5319 = vrcp.f32 %v3036_v27  ;;  %v3161_v48 = vsub.f32 1.0, %v5308_v21  ;;  %v2806_v39 = vadd.f32 %v7232_v17, %v7192_v23 }
 0x619   : > { %v5310_v22 = vpop.eup %5309  ;;  %v4300_v31 = vmul.f32 -1.442695, %v2834_v44 }
 0x61a   : > { %v5312_v14 = vpop.eup %5311  ;;  %v3037_v29 = vadd.f32 1.0, %v5310_v22  ;;  %3407 = vmatmul.mubr.f32.gmra.mrb[16].mxu1 %v7285_v19  ;;  %v2839_v52 = vpop.f32.mrb[34].mxu0  ;;  %v3193_v20 = vmul.f32 %v3161_v48, %v7085_v33 }
 0x61b   : > { %v3130_v24 = vmul.f32 %v5312_v14, %v2800_v8  ;;  %5321 = vpow2.f32 %v4300_v31  ;;  %v2840_v16 = vadd.f32 %v2839_v52, %v7177_v26  ;;  %v7292_v34 = vpop.f32.mrb[35].mxu0  ;;  %3412 = vmatprep.mubr.f32.mxu1 %v5892_v4  ;;  %v3162_v15 = vsub.f32 1.0, %v5312_v14 }
 0x61c   : > { %5323 = vrcp.f32 %v3037_v29  ;;  %v7295_v46 = vadd.f32 %v3193_v20, %v3129_v53 }
 0x61d   : > { %v5314_v54 = vpop.eup %5313  ;;  %v4301_v63 = vmul.f32 -1.442695, %v2840_v16  ;;  %v3194_v21 = vmul.f32 %v3162_v15, %v7089_v36  ;;  %v2812_v36 = vadd.f32 %v7242_v25, %v7192_v23 }
 0x61e   : > { %v5316_v33 = vpop.eup %5315  ;;  %v3038_v27 = vadd.f32 1.0, %v5314_v54  ;;  %3413 = vmatmul.mubr.f32.gmra.mrb[18].mxu1 %v7295_v46  ;;  %v2845_v45 = vpop.f32.mrb[36].mxu0 }
 0x61f   : > { %v3131_v44 = vmul.f32 %v5316_v33, %v2806_v39  ;;  %5325 = vpow2.f32 %v4301_v63  ;;  %v2846_v48 = vadd.f32 %v2845_v45, %v7177_v26  ;;  %v7302_v22 = vpop.f32.mrb[37].mxu0  ;;  %3418 = vmatprep.mubr.f32.mxu1 %v5892_v4  ;;  %v7305_v53 = vadd.f32 %v3194_v21, %v3130_v24 }
 0x620   : > { %5327 = vrcp.f32 %v3038_v27  ;;  %v3163_v17 = vsub.f32 1.0, %v5316_v33  ;;  %v2818_v63 = vadd.f32 %v7252_v38, %v7192_v23 }
 0x621   : > { %v5318_v8 = vpop.eup %5317  ;;  %v4302_v31 = vmul.f32 -1.442695, %v2846_v48 }
 0x622   : > { %v5320_v14 = vpop.eup %5319  ;;  %v3039_v29 = vadd.f32 1.0, %v5318_v8  ;;  %3419 = vmatmul.mubr.f32.gmra.mrb[20].mxu1 %v7305_v53  ;;  %v2851_v52 = vpop.f32.mrb[38].mxu0  ;;  %v3195_v20 = vmul.f32 %v3163_v17, %v7093_v42 }
 0x623   : > { %v3132_v16 = vmul.f32 %v5320_v14, %v2812_v36  ;;  %5329 = vpow2.f32 %v4302_v31  ;;  %v2852_v15 = vadd.f32 %v2851_v52, %v7177_v26  ;;  %v7312_v24 = vpop.f32.mrb[39].mxu0  ;;  %3424 = vmatprep.mubr.f32.mxu1 %v5892_v4  ;;  %v3164_v54 = vsub.f32 1.0, %v5320_v14 }
 0x624   : > { %5331 = vrcp.f32 %v3039_v29  ;;  %v7315_v39 = vadd.f32 %v3195_v20, %v3131_v44 }
 0x625   : > { %v5322_v25 = vpop.eup %5321  ;;  %v4303_v21 = vmul.f32 -1.442695, %v2852_v15  ;;  %v3196_v33 = vmul.f32 %v3164_v54, %v7097_v18  ;;  %v2824_v18 = vadd.f32 %v7262_v61, %v7192_v23 }
 0x626   : > { %v5324_v42 = vpop.eup %5323  ;;  %v3040_v27 = vadd.f32 1.0, %v5322_v25  ;;  %3425 = vmatmul.mubr.f32.gmra.mrb[22].mxu1 %v7315_v39  ;;  %v2857_v45 = vpop.f32.mrb[40].mxu0 }
 0x627   : > { %v3133_v48 = vmul.f32 %v5324_v42, %v2818_v63  ;;  %5333 = vpow2.f32 %v4303_v21  ;;  %v2858_v17 = vadd.f32 %v2857_v45, %v7177_v26  ;;  %v7322_v8 = vpop.f32.mrb[41].mxu0  ;;  %3430 = vmatprep.mubr.f32.mxu1 %v5892_v4  ;;  %v7325_v44 = vadd.f32 %v3196_v33, %v3132_v16 }
 0x628   : > { %5335 = vrcp.f32 %v3040_v27  ;;  %v3165_v38 = vsub.f32 1.0, %v5324_v42  ;;  %v2830_v21 = vadd.f32 %v7272_v49, %v7192_v23 }
 0x629   : > { %v5326_v36 = vpop.eup %5325  ;;  %v4304_v31 = vmul.f32 -1.442695, %v2858_v17 }
 0x62a   : > { %v5328_v14 = vpop.eup %5327  ;;  %v3041_v29 = vadd.f32 1.0, %v5326_v36  ;;  %3431 = vmatmul.mubr.f32.gmra.mrb[24].mxu1 %v7325_v44  ;;  %v2863_v52 = vpop.f32.mrb[42].mxu0  ;;  %v3197_v20 = vmul.f32 %v3165_v38, %v7101_v6 }
 0x62b   : > { %v3134_v15 = vmul.f32 %v5328_v14, %v2824_v18  ;;  %5337 = vpow2.f32 %v4304_v31  ;;  %v2864_v54 = vadd.f32 %v2863_v52, %v7177_v26  ;;  %v7332_v16 = vpop.f32.mrb[43].mxu0  ;;  %3436 = vmatprep.mubr.f32.mxu1 %v5892_v4  ;;  %v3166_v25 = vsub.f32 1.0, %v5328_v14 }
 0x62c   : > { %5339 = vrcp.f32 %v3041_v29  ;;  %v7335_v63 = vadd.f32 %v3197_v20, %v3133_v48 }
 0x62d   : > { %v5330_v61 = vpop.eup %5329  ;;  %v4305_v33 = vmul.f32 -1.442695, %v2864_v54  ;;  %v3198_v42 = vmul.f32 %v3166_v25, %v7105_v35  ;;  %v2836_v35 = vadd.f32 %v7282_v32, %v7192_v23 }
 0x62e   : > { %v5332_v6 = vpop.eup %5331  ;;  %v3042_v27 = vadd.f32 1.0, %v5330_v61  ;;  %3437 = vmatmul.mubr.f32.gmra.mrb[26].mxu1 %v7335_v63  ;;  %v2869_v45 = vpop.f32.mrb[44].mxu0 }
 0x62f   : > { %v3135_v17 = vmul.f32 %v5332_v6, %v2830_v21  ;;  %5341 = vpow2.f32 %v4305_v33  ;;  %v2870_v38 = vadd.f32 %v2869_v45, %v7177_v26  ;;  %v7342_v36 = vpop.f32.mrb[45].mxu0  ;;  %3442 = vmatprep.mubr.f32.mxu1 %v5892_v4  ;;  %v7345_v48 = vadd.f32 %v3198_v42, %v3134_v15 }
 0x630   : > { %5343 = vrcp.f32 %v3042_v27  ;;  %v3167_v49 = vsub.f32 1.0, %v5332_v6  ;;  %v2842_v33 = vadd.f32 %v7292_v34, %v7192_v23 }
 0x631   : > { %v5334_v18 = vpop.eup %5333  ;;  %v4306_v31 = vmul.f32 -1.442695, %v2870_v38 }
 0x632   : > { %v5336_v14 = vpop.eup %5335  ;;  %v3043_v29 = vadd.f32 1.0, %v5334_v18  ;;  %3443 = vmatmul.mubr.f32.gmra.mrb[28].mxu1 %v7345_v48  ;;  %v2875_v52 = vpop.f32.mrb[46].mxu0  ;;  %v3199_v20 = vmul.f32 %v3167_v49, %v7109_v62 }
 0x633   : > { %v3136_v54 = vmul.f32 %v5336_v14, %v2836_v35  ;;  %5345 = vpow2.f32 %v4306_v31  ;;  %v2876_v25 = vadd.f32 %v2875_v52, %v7177_v26  ;;  %v7352_v15 = vpop.f32.mrb[47].mxu0  ;;  %3448 = vmatprep.mubr.f32.mxu1 %v5892_v4  ;;  %v3168_v61 = vsub.f32 1.0, %v5336_v14 }
 0x634   : > { %5347 = vrcp.f32 %v3043_v29  ;;  %v7355_v21 = vadd.f32 %v3199_v20, %v3135_v17 }
 0x635   : > { %v5338_v32 = vpop.eup %5337  ;;  %v4307_v42 = vmul.f32 -1.442695, %v2876_v25  ;;  %v3200_v6 = vmul.f32 %v3168_v61, %v7113_v12  ;;  %v2848_v12 = vadd.f32 %v7302_v22, %v7192_v23 }
 0x636   : > { %v5340_v62 = vpop.eup %5339  ;;  %v3044_v27 = vadd.f32 1.0, %v5338_v32  ;;  %3449 = vmatmul.mubr.f32.gmra.mrb[30].mxu1 %v7355_v21  ;;  %v2881_v45 = vpop.f32.mrb[48].mxu0 }
 0x637   : > { %v3137_v38 = vmul.f32 %v5340_v62, %v2842_v33  ;;  %5349 = vpow2.f32 %v4307_v42  ;;  %v2882_v49 = vadd.f32 %v2881_v45, %v7177_v26  ;;  %v7362_v18 = vpop.f32.mrb[49].mxu0  ;;  %3454 = vmatprep.mubr.f32.mxu1 %v5892_v4  ;;  %v7365_v17 = vadd.f32 %v3200_v6, %v3136_v54 }
 0x638   : > { %5351 = vrcp.f32 %v3044_v27  ;;  %v3169_v34 = vsub.f32 1.0, %v5340_v62  ;;  %v2854_v42 = vadd.f32 %v7312_v24, %v7192_v23 }
 0x639   : > { %v5342_v35 = vpop.eup %5341  ;;  %v4308_v31 = vmul.f32 -1.442695, %v2882_v49 }
 0x63a   : > { %v5344_v14 = vpop.eup %5343  ;;  %v3045_v29 = vadd.f32 1.0, %v5342_v35  ;;  %3455 = vmatmul.mubr.f32.gmra.mrb[32].mxu1 %v7365_v17  ;;  %v2887_v52 = vpop.f32.mrb[50].mxu0  ;;  %v3201_v20 = vmul.f32 %v3169_v34, %v7117_v9 }
 0x63b   : > { %v3138_v25 = vmul.f32 %v5344_v14, %v2848_v12  ;;  %5353 = vpow2.f32 %v4308_v31  ;;  %v2888_v61 = vadd.f32 %v2887_v52, %v7177_v26  ;;  %v7372_v54 = vpop.f32.mrb[51].mxu0  ;;  %3460 = vmatprep.mubr.f32.mxu1 %v5892_v4  ;;  %v3170_v32 = vsub.f32 1.0, %v5344_v14 }
 0x63c   : > { %5355 = vrcp.f32 %v3045_v29  ;;  %v7375_v33 = vadd.f32 %v3201_v20, %v3137_v38 }
 0x63d   : > { %v5346_v22 = vpop.eup %5345  ;;  %v4309_v6 = vmul.f32 -1.442695, %v2888_v61  ;;  %v3202_v62 = vmul.f32 %v3170_v32, %v7121_v13  ;;  %v2860_v13 = vadd.f32 %v7322_v8, %v7192_v23 }
 0x63e   : > { %v5348_v9 = vpop.eup %5347  ;;  %v3046_v27 = vadd.f32 1.0, %v5346_v22  ;;  %3461 = vmatmul.mubr.f32.gmra.mrb[34].mxu1 %v7375_v33  ;;  %v2893_v45 = vpop.f32.mrb[52].mxu0 }
 0x63f   : > { %v3139_v49 = vmul.f32 %v5348_v9, %v2854_v42  ;;  %5357 = vpow2.f32 %v4309_v6  ;;  %v2894_v34 = vadd.f32 %v2893_v45, %v7177_v26  ;;  %v7382_v35 = vpop.f32.mrb[53].mxu0  ;;  %3466 = vmatprep.mubr.f32.mxu1 %v5892_v4  ;;  %v7385_v38 = vadd.f32 %v3202_v62, %v3138_v25 }
 0x640   : > { %5359 = vrcp.f32 %v3046_v27  ;;  %v3171_v24 = vsub.f32 1.0, %v5348_v9  ;;  %v2866_v6 = vadd.f32 %v7332_v16, %v7192_v23 }
 0x641   : > { %v5350_v12 = vpop.eup %5349  ;;  %v4310_v31 = vmul.f32 -1.442695, %v2894_v34 }
 0x642   : > { %v5352_v14 = vpop.eup %5351  ;;  %v3047_v29 = vadd.f32 1.0, %v5350_v12  ;;  %3467 = vmatmul.mubr.f32.gmra.mrb[36].mxu1 %v7385_v38  ;;  %v2899_v52 = vpop.f32.mrb[54].mxu0  ;;  %v3203_v20 = vmul.f32 %v3171_v24, %v7125_v56 }
 0x643   : > { %v3140_v61 = vmul.f32 %v5352_v14, %v2860_v13  ;;  %5361 = vpow2.f32 %v4310_v31  ;;  %v2900_v32 = vadd.f32 %v2899_v52, %v7177_v26  ;;  %v7392_v25 = vpop.f32.mrb[55].mxu0  ;;  %3472 = vmatprep.mubr.f32.mxu1 %v5892_v4  ;;  %v3172_v22 = vsub.f32 1.0, %v5352_v14 }
 0x644   : > { %5363 = vrcp.f32 %v3047_v29  ;;  %v7395_v42 = vadd.f32 %v3203_v20, %v3139_v49 }
 0x645   : > { %v5354_v8 = vpop.eup %5353  ;;  %v4311_v62 = vmul.f32 -1.442695, %v2900_v32  ;;  %v3204_v9 = vmul.f32 %v3172_v22, %v7129_v57  ;;  %v2872_v57 = vadd.f32 %v7342_v36, %v7192_v23 }
 0x646   : > { %v5356_v56 = vpop.eup %5355  ;;  %v3048_v27 = vadd.f32 1.0, %v5354_v8  ;;  %3473 = vmatmul.mubr.f32.gmra.mrb[38].mxu1 %v7395_v42  ;;  %v2905_v45 = vpop.f32.mrb[56].mxu0 }
 0x647   : > { %v3141_v34 = vmul.f32 %v5356_v56, %v2866_v6  ;;  %5365 = vpow2.f32 %v4311_v62  ;;  %v2906_v24 = vadd.f32 %v2905_v45, %v7177_v26  ;;  %v7402_v12 = vpop.f32.mrb[57].mxu0  ;;  %3478 = vmatprep.mubr.f32.mxu1 %v5892_v4  ;;  %v7405_v49 = vadd.f32 %v3204_v9, %v3140_v61 }
 0x648   : > { %5367 = vrcp.f32 %v3048_v27  ;;  %v3173_v16 = vsub.f32 1.0, %v5356_v56  ;;  %v2878_v62 = vadd.f32 %v7352_v15, %v7192_v23 }
 0x649   : > { %v5358_v13 = vpop.eup %5357  ;;  %v4312_v31 = vmul.f32 -1.442695, %v2906_v24 }
 0x64a   : > { %v5360_v14 = vpop.eup %5359  ;;  %v3049_v29 = vadd.f32 1.0, %v5358_v13  ;;  %3479 = vmatmul.mubr.f32.gmra.mrb[40].mxu1 %v7405_v49  ;;  %v2911_v52 = vpop.f32.mrb[58].mxu0  ;;  %v3205_v20 = vmul.f32 %v3173_v16, %v7133_v1 }
 0x64b   : > { %v3142_v32 = vmul.f32 %v5360_v14, %v2872_v57  ;;  %5369 = vpow2.f32 %v4312_v31  ;;  %v2912_v22 = vadd.f32 %v2911_v52, %v7177_v26  ;;  %v7412_v61 = vpop.f32.mrb[59].mxu0  ;;  %3484 = vmatprep.mubr.f32.mxu1 %v5892_v4  ;;  %v3174_v8 = vsub.f32 1.0, %v5360_v14 }
 0x64c   : > { %5371 = vrcp.f32 %v3049_v29  ;;  %v7415_v6 = vadd.f32 %v3205_v20, %v3141_v34 }
 0x64d   : > { %v5362_v36 = vpop.eup %5361  ;;  %v4313_v9 = vmul.f32 -1.442695, %v2912_v22  ;;  %v3206_v56 = vmul.f32 %v3174_v8, %v7137_v40  ;;  %v2884_v40 = vadd.f32 %v7362_v18, %v7192_v23 }
 0x64e   : > { %v5364_v1 = vpop.eup %5363  ;;  %v3050_v27 = vadd.f32 1.0, %v5362_v36  ;;  %3485 = vmatmul.mubr.f32.gmra.mrb[42].mxu1 %v7415_v6  ;;  %v2917_v45 = vpop.f32.mrb[60].mxu0 }
 0x64f   : > { %v3143_v24 = vmul.f32 %v5364_v1, %v2878_v62  ;;  %5373 = vpow2.f32 %v4313_v9  ;;  %v2918_v16 = vadd.f32 %v2917_v45, %v7177_v26  ;;  %v7422_v13 = vpop.f32.mrb[61].mxu0  ;;  %3490 = vmatprep.mubr.f32.mxu1 %v5892_v4  ;;  %v7425_v34 = vadd.f32 %v3206_v56, %v3142_v32 }
 0x650   : > { %5375 = vrcp.f32 %v3050_v27  ;;  %v3175_v15 = vsub.f32 1.0, %v5364_v1  ;;  %v2890_v9 = vadd.f32 %v7372_v54, %v7192_v23 }
 0x651   : > { %v5366_v57 = vpop.eup %5365  ;;  %v4314_v31 = vmul.f32 -1.442695, %v2918_v16 }
 0x652   : > { %v5368_v14 = vpop.eup %5367  ;;  %v3051_v29 = vadd.f32 1.0, %v5366_v57  ;;  %3491 = vmatmul.mubr.f32.gmra.mrb[44].mxu1 %v7425_v34  ;;  %v2923_v52 = vpop.f32.mrb[62].mxu0  ;;  %v3207_v20 = vmul.f32 %v3175_v15, %v7141_v59  ;;  %v2896_v15 = vadd.f32 %v7382_v35, %v7192_v23 }
 0x653   : > { %v3144_v22 = vmul.f32 %v5368_v14, %v2884_v40  ;;  %5377 = vpow2.f32 %v4314_v31  ;;  %v2924_v8 = vadd.f32 %v2923_v52, %v7177_v26  ;;  %v7432_v32 = vpop.f32.mrb[63].mxu0  ;;  %3496 = vmatprep.mubr.f32.mxu1 %v5892_v4  ;;  %v3176_v36 = vsub.f32 1.0, %v5368_v14 }
 0x654   : > { %5379 = vrcp.f32 %v3051_v29  ;;  %v7435_v62 = vadd.f32 %v3207_v20, %v3143_v24  ;;  %v2902_v52 = vadd.f32 %v7392_v25, %v7192_v23 }
 0x655   : > { %v5370_v18 = vpop.eup %5369  ;;  %v4315_v56 = vmul.f32 -1.442695, %v2924_v8  ;;  %v3208_v1 = vmul.f32 %v3176_v36, %v7145_v43 }
 0x656   : > { %v5372_v59 = vpop.eup %5371  ;;  %v3052_v27 = vadd.f32 1.0, %v5370_v18  ;;  %3497 = vmatmul.mubr.f32.gmra.mrb[46].mxu1 %v7435_v62 }
 0x657   : > { %v3145_v26 = vmul.f32 %v5372_v59, %v2890_v9  ;;  %5381 = vpow2.f32 %v4315_v56  ;;  %3502 = vmatprep.mubr.f32.mxu1 %v5892_v4  ;;  %v7442_v45 = vadd.f32 %v3208_v1, %v3144_v22  ;;  %v3177_v16 = vsub.f32 1.0, %v5372_v59 }
 0x658   : > { %5383 = vrcp.f32 %v3052_v27  ;;  %v2908_v9 = vadd.f32 %v7402_v12, %v7192_v23 }
 0x659   : > { %v5374_v24 = vpop.eup %5373  ;;  %v3209_v54 = vmul.f32 %v3177_v16, %v7149_v11 }
 0x65a   : > { %v5376_v57 = vpop.eup %5375  ;;  %v3053_v43 = vadd.f32 1.0, %v5374_v24  ;;  %3503 = vmatmul.mubr.f32.gmra.mrb[48].mxu1 %v7442_v45 }
 0x65b   : > { %v3146_v40 = vmul.f32 %v5376_v57, %v2896_v15  ;;  %3508 = vmatprep.mubr.f32.mxu1 %v5892_v4  ;;  %v7449_v31 = vadd.f32 %v3209_v54, %v3145_v26  ;;  %v3178_v14 = vsub.f32 1.0, %v5376_v57  ;;  %v2914_v26 = vadd.f32 %v7412_v61, %v7192_v23 }
 0x65c   : > { %5385 = vrcp.f32 %v3053_v43  ;;  %v2920_v54 = vadd.f32 %v7422_v13, %v7192_v23 }
 0x65d   : > { %v5378_v29 = vpop.eup %5377  ;;  %v3210_v20 = vmul.f32 %v3178_v14, %v7153_v3  ;;  %v2926_v14 = vadd.f32 %v7432_v32, %v7192_v23 }
 0x65e   : > { %v5380_v35 = vpop.eup %5379  ;;  %v3054_v22 = vadd.f32 1.0, %v5378_v29  ;;  %3509 = vmatmul.mubr.f32.gmra.mrb[50].mxu1 %v7449_v31 }
 0x65f   : > { %v3147_v11 = vmul.f32 %v5380_v35, %v2902_v52  ;;  %3514 = vmatprep.mubr.f32.mxu1 %v5892_v4  ;;  %v7456_v8 = vadd.f32 %v3210_v20, %v3146_v40  ;;  %v3179_v36 = vsub.f32 1.0, %v5380_v35 }
 0x660   : > { %5387 = vrcp.f32 %v3054_v22 }
 0x661   : > { %v5382_v18 = vpop.eup %5381  ;;  %v3211_v56 = vmul.f32 %v3179_v36, %v7157_v41 }
 0x662   : > { %v5384_v25 = vpop.eup %5383  ;;  %v3055_v1 = vadd.f32 1.0, %v5382_v18  ;;  %3515 = vmatmul.mubr.f32.gmra.mrb[52].mxu1 %v7456_v8 }
 0x663   : > { %v3148_v3 = vmul.f32 %v5384_v25, %v2908_v9  ;;  %3520 = vmatprep.mubr.f32.mxu1 %v5892_v4  ;;  %v7463_v59 = vadd.f32 %v3211_v56, %v3147_v11  ;;  %v3180_v27 = vsub.f32 1.0, %v5384_v25 }
 0x664   : > { %5389 = vrcp.f32 %v3055_v1 }
 0x665   : > { %v3212_v16 = vmul.f32 %v3180_v27, %v7161_v10 }
 0x666   : > { %v5386_v24 = vpop.eup %5385  ;;  %3521 = vmatmul.mubr.f32.gmra.mrb[54].mxu1 %v7463_v59 }
 0x667   : > { %v3149_v41 = vmul.f32 %v5386_v24, %v2914_v26  ;;  %3526 = vmatprep.mubr.f32.mxu1 %v5892_v4  ;;  %v7470_v12 = vadd.f32 %v3212_v16, %v3148_v3  ;;  %v3181_v15 = vsub.f32 1.0, %v5386_v24 }
 0x669   : > { %v3213_v57 = vmul.f32 %v3181_v15, %v7165_v60 }
 0x66a   : > { %v5388_v43 = vpop.eup %5387  ;;  %3527 = vmatmul.mubr.f32.gmra.mrb[56].mxu1 %v7470_v12 }
 0x66b   : > { %v3150_v61 = vmul.f32 %v5388_v43, %v2920_v54  ;;  %3532 = vmatprep.mubr.f32.mxu1 %v5892_v4  ;;  %v7477_v10 = vadd.f32 %v3213_v57, %v3149_v41  ;;  %v3182_v40 = vsub.f32 1.0, %v5388_v43 }
 0x66d   : > { %v3214_v29 = vmul.f32 %v3182_v40, %v7169_v58  ;;  %v3282_v58 = vld [vmem:[#allocation16 + $0x2] sm:$0x3] }
 0x66e   : > { %v5390_v52 = vpop.eup %5389  ;;  %3533 = vmatmul.mubr.f32.gmra.mrb[58].mxu1 %v7477_v10  ;;  %v7493_v23 = vrot.slane %v3282_v58, %v6843_v37 }
 0x66f   : > { %v3151_v13 = vmul.f32 %v5390_v52, %v2926_v14  ;;  %3538 = vmatprep.mubr.f32.mxu1 %v5892_v4  ;;  %v7484_v60 = vadd.f32 %v3214_v29, %v3150_v61  ;;  %v3183_v20 = vsub.f32 1.0, %v5390_v52 }
 0x671   : > { %v3215_v35 = vmul.f32 %v3183_v20, %v7173_v0  ;;  %v7508_v20 = vrot.slane %v3282_v58, %v6865_v55 }
 0x672   : > { %3539 = vmatmul.mubr.f32.gmra.mrb[60].mxu1 %v7484_v60 }
 0x673   : > { %3544 = vmatprep.mubr.f32.mxu1 %v5892_v4  ;;  %v7489_v22 = vadd.f32 %v3215_v35, %v3151_v13 }
 0x676   : > { %3545 = vmatmul.mubr.f32.gmra.mrb[62].mxu1 %v7489_v22 }
 0x6cc   : > { %v3360_v32 = vpop.f32.mrb[0].mxu1 }
 0x6cd   : > { %v3361_v11 = vadd.f32 %v3360_v32, %v7493_v23  ;;  %v3362_v36 = vpop.f32.mrb[1].mxu1 }
 0x6cf   : > { %v4316_v18 = vmul.f32 -1.442695, %v3361_v11 }
 0x6d1   : > { %5391 = vpow2.f32 %v4316_v18  ;;  %v3366_v9 = vpop.f32.mrb[2].mxu1 }
 0x6d2   : > { %v3367_v0 = vadd.f32 %v3366_v9, %v7493_v23  ;;  %v3368_v56 = vpop.f32.mrb[3].mxu1 }
 0x6d4   : > { %v4317_v25 = vmul.f32 -1.442695, %v3367_v0 }
 0x6d5   : > { %v3372_v4 = vpop.f32.mrb[4].mxu1 }
 0x6d6   : > { %5393 = vpow2.f32 %v4317_v25  ;;  %v3373_v1 = vadd.f32 %v3372_v4, %v7493_v23  ;;  %v3374_v3 = vpop.f32.mrb[5].mxu1  ;;  %v3363_v25 = vadd.f32 %v3362_v36, %v7508_v20 }
 0x6d8   : > { %v4318_v27 = vmul.f32 -1.442695, %v3373_v1 }
 0x6d9   : > { %v3378_v26 = vpop.f32.mrb[6].mxu1 }
 0x6da   : > { %5395 = vpow2.f32 %v4318_v27  ;;  %v3379_v37 = vadd.f32 %v3378_v26, %v7493_v23  ;;  %v7499_v16 = vpop.f32.mrb[7].mxu1 }
 0x6db   : > { %v5392_v24 = vpop.eup %5391 }
 0x6dc   : > { %v3647_v41 = vadd.f32 1.0, %v5392_v24  ;;  %v4319_v15 = vmul.f32 -1.442695, %v3379_v37 }
 0x6dd   : > { %v3384_v54 = vpop.f32.mrb[8].mxu1 }
 0x6de   : > { %5397 = vrcp.f32 %v3647_v41  ;;  %v3385_v57 = vadd.f32 %v3384_v54, %v7493_v23  ;;  %v7502_v43 = vpop.f32.mrb[9].mxu1 }
 0x6df   : > { %5399 = vpow2.f32 %v4319_v15 }
 0x6e0   : > { %v5394_v61 = vpop.eup %5393  ;;  %v4320_v40 = vmul.f32 -1.442695, %v3385_v57  ;;  %v3369_v57 = vadd.f32 %v3368_v56, %v7508_v20 }
 0x6e1   : > { %v3648_v14 = vadd.f32 1.0, %v5394_v61  ;;  %v3390_v29 = vpop.f32.mrb[10].mxu1 }
 0x6e2   : > { %5401 = vpow2.f32 %v4320_v40  ;;  %v3391_v52 = vadd.f32 %v3390_v29, %v7493_v23  ;;  %v7505_v13 = vpop.f32.mrb[11].mxu1 }
 0x6e3   : > { %5403 = vrcp.f32 %v3648_v14 }
 0x6e4   : > { %v5396_v35 = vpop.eup %5395  ;;  %v4321_v32 = vmul.f32 -1.442695, %v3391_v52 }
 0x6e5   : > { %v3649_v11 = vadd.f32 1.0, %v5396_v35  ;;  %v3396_v18 = vpop.f32.mrb[12].mxu1 }
 0x6e6   : > { %5405 = vpow2.f32 %v4321_v32  ;;  %v3397_v9 = vadd.f32 %v3396_v18, %v7493_v23  ;;  %v7511_v0 = vpop.f32.mrb[13].mxu1 }
 0x6e7   : > { %5407 = vrcp.f32 %v3649_v11 }
 0x6e8   : > { %v5398_v4 = vpop.eup %5397  ;;  %v4322_v1 = vmul.f32 -1.442695, %v3397_v9 }
 0x6e9   : > { %v5400_v27 = vpop.eup %5399  ;;  %v3402_v26 = vpop.f32.mrb[14].mxu1  ;;  %v3743_v37 = vmul.f32 %v5398_v4, %v3363_v25  ;;  %v3775_v55 = vsub.f32 1.0, %v5398_v4 }
 0x6ea   : > { %v3650_v58 = vadd.f32 1.0, %v5400_v27  ;;  %5409 = vpow2.f32 %v4322_v1  ;;  %v3403_v24 = vadd.f32 %v3402_v26, %v7493_v23  ;;  %v7515_v41 = vpop.f32.mrb[15].mxu1 }
 0x6eb   : > { %v3807_v15 = vmul.f32 %v3775_v55, %v7206_v51  ;;  %v3375_v51 = vadd.f32 %v3374_v3, %v7508_v20  ;;  %v3381_v3 = vadd.f32 %v7499_v16, %v7508_v20 }
 0x6ec   : > { %v5402_v54 = vpop.eup %5401  ;;  %5411 = vrcp.f32 %v3650_v58  ;;  %v4323_v36 = vmul.f32 -1.442695, %v3403_v24 }
 0x6ed   : > { %v5404_v61 = vpop.eup %5403  ;;  %v3651_v40 = vadd.f32 1.0, %v5402_v54  ;;  %v3408_v14 = vpop.f32.mrb[16].mxu1  ;;  %v3839_v29 = vadd.f32 %v3807_v15, %v3743_v37 }
 0x6ee   : > { %v3744_v52 = vmul.f32 %v5404_v61, %v3369_v57  ;;  %5413 = vpow2.f32 %v4323_v36  ;;  %v3409_v35 = vadd.f32 %v3408_v14, %v7493_v23  ;;  %v7520_v32 = vpop.f32.mrb[17].mxu1  ;;  %v3776_v11 = vsub.f32 1.0, %v5404_v61 }
 0x6ef   : > { %5415 = vrcp.f32 %v3651_v40  ;;  %3871 = vxpose.xlu0.b32.start [1/16] %v3839_v29, 128 }
 0x6f0   : > { %v5406_v18 = vpop.eup %5405  ;;  %v4324_v9 = vmul.f32 -1.442695, %v3409_v35  ;;  %v3808_v56 = vmul.f32 %v3776_v11, %v7215_v47  ;;  %v3387_v35 = vadd.f32 %v7502_v43, %v7508_v20  ;;  %v3393_v43 = vadd.f32 %v7505_v13, %v7508_v20 }
 0x6f1   : > { %v5408_v25 = vpop.eup %5407  ;;  %v3652_v4 = vadd.f32 1.0, %v5406_v18  ;;  %v3414_v1 = vpop.f32.mrb[18].mxu1  ;;  %v3399_v13 = vadd.f32 %v7511_v0, %v7508_v20  ;;  %v3405_v0 = vadd.f32 %v7515_v41, %v7508_v20  ;;  %v3411_v41 = vadd.f32 %v7520_v32, %v7508_v20 }
 0x6f2   : > { %v3745_v27 = vmul.f32 %v5408_v25, %v3375_v51  ;;  %5417 = vpow2.f32 %v4324_v9  ;;  %v3415_v26 = vadd.f32 %v3414_v1, %v7493_v23  ;;  %v7525_v37 = vpop.f32.mrb[19].mxu1  ;;  %v3840_v55 = vadd.f32 %v3808_v56, %v3744_v52 }
 0x6f3   : > { %5419 = vrcp.f32 %v3652_v4  ;;  %v3777_v58 = vsub.f32 1.0, %v5408_v25  ;;  %v3417_v32 = vadd.f32 %v7525_v37, %v7508_v20 }
 0x6f4   : > { %v5410_v24 = vpop.eup %5409  ;;  %v4325_v15 = vmul.f32 -1.442695, %v3415_v26  ;;  %3872 = vxpose.xlu0.b32.cont [2/16] %v3840_v55, 128 }
 0x6f5   : > { %v3653_v54 = vadd.f32 1.0, %v5410_v24  ;;  %v3420_v47 = vpop.f32.mrb[20].mxu1  ;;  %v3809_v57 = vmul.f32 %v3777_v58, %v7225_v2 }
 0x6f6   : > { %v5412_v36 = vpop.eup %5411  ;;  %5421 = vpow2.f32 %v4325_v15  ;;  %v3421_v61 = vadd.f32 %v3420_v47, %v7493_v23  ;;  %v7531_v40 = vpop.f32.mrb[21].mxu1 }
 0x6f7   : > { %v3746_v14 = vmul.f32 %v5412_v36, %v3381_v3  ;;  %5423 = vrcp.f32 %v3653_v54  ;;  %v3841_v29 = vadd.f32 %v3809_v57, %v3745_v27  ;;  %v3778_v18 = vsub.f32 1.0, %v5412_v36 }
 0x6f8   : > { %v5414_v52 = vpop.eup %5413  ;;  %v4326_v11 = vmul.f32 -1.442695, %v3421_v61  ;;  %v3423_v37 = vadd.f32 %v7531_v40, %v7508_v20 }
 0x6f9   : > { %v5416_v16 = vpop.eup %5415  ;;  %v3654_v51 = vadd.f32 1.0, %v5414_v52  ;;  %3873 = vxpose.xlu0.b32.cont [3/16] %v3841_v29, 128  ;;  %v3426_v9 = vpop.f32.mrb[22].mxu1  ;;  %v3810_v4 = vmul.f32 %v3778_v18, %v7235_v50 }
 0x6fa   : > { %v3747_v2 = vmul.f32 %v5416_v16, %v3387_v35  ;;  %5425 = vpow2.f32 %v4326_v11  ;;  %v3427_v56 = vadd.f32 %v3426_v9, %v7493_v23  ;;  %v7536_v25 = vpop.f32.mrb[23].mxu1  ;;  %v3779_v1 = vsub.f32 1.0, %v5416_v16 }
 0x6fb   : > { %5427 = vrcp.f32 %v3654_v51  ;;  %v3842_v55 = vadd.f32 %v3810_v4, %v3746_v14  ;;  %v3429_v40 = vadd.f32 %v7536_v25, %v7508_v20 }
 0x6fc   : > { %v5418_v27 = vpop.eup %5417  ;;  %v4327_v26 = vmul.f32 -1.442695, %v3427_v56  ;;  %v3811_v3 = vmul.f32 %v3779_v1, %v7245_v30 }
 0x6fd   : > { %v5420_v58 = vpop.eup %5419  ;;  %v3655_v24 = vadd.f32 1.0, %v5418_v27  ;;  %v3432_v15 = vpop.f32.mrb[24].mxu1  ;;  %3874 = vxpose.xlu0.b32.cont [4/16] %v3842_v55, 128 }
 0x6fe   : > { %v3748_v54 = vmul.f32 %v5420_v58, %v3393_v43  ;;  %5429 = vpow2.f32 %v4327_v26  ;;  %v3433_v47 = vadd.f32 %v3432_v15, %v7493_v23  ;;  %v7543_v57 = vpop.f32.mrb[25].mxu1  ;;  %v3780_v50 = vsub.f32 1.0, %v5420_v58 }
 0x6ff   : > { %5431 = vrcp.f32 %v3655_v24  ;;  %v3843_v36 = vadd.f32 %v3811_v3, %v3747_v2  ;;  %v3435_v25 = vadd.f32 %v7543_v57, %v7508_v20 }
 0x700   : > { %v5422_v61 = vpop.eup %5421  ;;  %v4328_v14 = vmul.f32 -1.442695, %v3433_v47  ;;  %v3812_v29 = vmul.f32 %v3780_v50, %v7255_v28 }
 0x701   : > { %v5424_v52 = vpop.eup %5423  ;;  %v3656_v35 = vadd.f32 1.0, %v5422_v61  ;;  %v3438_v30 = vpop.f32.mrb[26].mxu1  ;;  %3875 = vxpose.xlu0.b32.cont [5/16] %v3843_v36, 128 }
 0x702   : > { %v3749_v11 = vmul.f32 %v5424_v52, %v3399_v13  ;;  %5433 = vpow2.f32 %v4328_v14  ;;  %v3439_v18 = vadd.f32 %v3438_v30, %v7493_v23  ;;  %v7549_v16 = vpop.f32.mrb[27].mxu1  ;;  %v3844_v51 = vadd.f32 %v3812_v29, %v3748_v54 }
 0x703   : > { %5435 = vrcp.f32 %v3656_v35  ;;  %v3781_v9 = vsub.f32 1.0, %v5424_v52  ;;  %v3441_v57 = vadd.f32 %v7549_v16, %v7508_v20 }
 0x704   : > { %v5426_v2 = vpop.eup %5425  ;;  %v4329_v56 = vmul.f32 -1.442695, %v3439_v18 }
 0x705   : > { %v5428_v4 = vpop.eup %5427  ;;  %v3657_v28 = vadd.f32 1.0, %v5426_v2  ;;  %v3444_v1 = vpop.f32.mrb[28].mxu1  ;;  %v3813_v27 = vmul.f32 %v3781_v9, %v7265_v5  ;;  %3876 = vxpose.xlu0.b32.cont [6/16] %v3844_v51, 128 }
 0x706   : > { %v3750_v43 = vmul.f32 %v5428_v4, %v3405_v0  ;;  %5437 = vpow2.f32 %v4329_v56  ;;  %v3445_v26 = vadd.f32 %v3444_v1, %v7493_v23  ;;  %v7555_v55 = vpop.f32.mrb[29].mxu1  ;;  %v3782_v58 = vsub.f32 1.0, %v5428_v4 }
 0x707   : > { %5439 = vrcp.f32 %v3657_v28  ;;  %v3845_v24 = vadd.f32 %v3813_v27, %v3749_v11  ;;  %v3447_v16 = vadd.f32 %v7555_v55, %v7508_v20 }
 0x708   : > { %v5430_v15 = vpop.eup %5429  ;;  %v4330_v3 = vmul.f32 -1.442695, %v3445_v26  ;;  %v3814_v54 = vmul.f32 %v3782_v58, %v7275_v7 }
 0x709   : > { %v5432_v47 = vpop.eup %5431  ;;  %v3658_v50 = vadd.f32 1.0, %v5430_v15  ;;  %v3450_v5 = vpop.f32.mrb[30].mxu1  ;;  %3877 = vxpose.xlu0.b32.cont [7/16] %v3845_v24, 128 }
 0x70a   : > { %v3751_v36 = vmul.f32 %v5432_v47, %v3411_v41  ;;  %5441 = vpow2.f32 %v4330_v3  ;;  %v3451_v61 = vadd.f32 %v3450_v5, %v7493_v23  ;;  %v7561_v13 = vpop.f32.mrb[31].mxu1  ;;  %v3846_v14 = vadd.f32 %v3814_v54, %v3750_v43 }
 0x70b   : > { %5443 = vrcp.f32 %v3658_v50  ;;  %v3783_v29 = vsub.f32 1.0, %v5432_v47  ;;  %v3453_v55 = vadd.f32 %v7561_v13, %v7508_v20 }
 0x70c   : > { %v5434_v52 = vpop.eup %5433  ;;  %v4331_v35 = vmul.f32 -1.442695, %v3451_v61 }
 0x70d   : > { %v5436_v30 = vpop.eup %5435  ;;  %v3659_v7 = vadd.f32 1.0, %v5434_v52  ;;  %v3456_v11 = vpop.f32.mrb[32].mxu1  ;;  %v3815_v18 = vmul.f32 %v3783_v29, %v7285_v19  ;;  %3878 = vxpose.xlu0.b32.cont [8/16] %v3846_v14, 128 }
 0x70e   : > { %v3752_v51 = vmul.f32 %v5436_v30, %v3417_v32  ;;  %5445 = vpow2.f32 %v4331_v35  ;;  %v3457_v9 = vadd.f32 %v3456_v11, %v7493_v23  ;;  %v7567_v2 = vpop.f32.mrb[33].mxu1  ;;  %v3784_v0 = vsub.f32 1.0, %v5436_v30 }
 0x70f   : > { %5447 = vrcp.f32 %v3659_v7  ;;  %v3847_v56 = vadd.f32 %v3815_v18, %v3751_v36  ;;  %v3459_v13 = vadd.f32 %v7567_v2, %v7508_v20 }
 0x710   : > { %v5438_v4 = vpop.eup %5437  ;;  %v4332_v28 = vmul.f32 -1.442695, %v3457_v9  ;;  %v3816_v1 = vmul.f32 %v3784_v0, %v7295_v46 }
 0x711   : > { %v5440_v27 = vpop.eup %5439  ;;  %v3660_v43 = vadd.f32 1.0, %v5438_v4  ;;  %v3462_v19 = vpop.f32.mrb[34].mxu1  ;;  %3879 = vxpose.xlu0.b32.cont [9/16] %v3847_v56, 128 }
 0x712   : > { %v3753_v26 = vmul.f32 %v5440_v27, %v3423_v37  ;;  %5449 = vpow2.f32 %v4332_v28  ;;  %v3463_v58 = vadd.f32 %v3462_v19, %v7493_v23  ;;  %v7573_v24 = vpop.f32.mrb[35].mxu1  ;;  %v3848_v15 = vadd.f32 %v3816_v1, %v3752_v51 }
 0x713   : > { %5451 = vrcp.f32 %v3660_v43  ;;  %v3785_v41 = vsub.f32 1.0, %v5440_v27  ;;  %v3465_v2 = vadd.f32 %v7573_v24, %v7508_v20 }
 0x714   : > { %v5442_v3 = vpop.eup %5441  ;;  %v4333_v54 = vmul.f32 -1.442695, %v3463_v58 }
 0x715   : > { %v5444_v47 = vpop.eup %5443  ;;  %v3661_v46 = vadd.f32 1.0, %v5442_v3  ;;  %v3468_v50 = vpop.f32.mrb[36].mxu1  ;;  %v3817_v5 = vmul.f32 %v3785_v41, %v7305_v53  ;;  %3880 = vxpose.xlu0.b32.cont [10/16] %v3848_v15, 128 }
 0x716   : > { %v3754_v36 = vmul.f32 %v5444_v47, %v3429_v40  ;;  %5453 = vpow2.f32 %v4333_v54  ;;  %v3469_v61 = vadd.f32 %v3468_v50, %v7493_v23  ;;  %v7579_v14 = vpop.f32.mrb[37].mxu1  ;;  %v3786_v29 = vsub.f32 1.0, %v5444_v47 }
 0x717   : > { %5455 = vrcp.f32 %v3661_v46  ;;  %v3849_v52 = vadd.f32 %v3817_v5, %v3753_v26  ;;  %v3471_v24 = vadd.f32 %v7579_v14, %v7508_v20 }
 0x718   : > { %v5446_v32 = vpop.eup %5445  ;;  %v4334_v35 = vmul.f32 -1.442695, %v3469_v61  ;;  %v3818_v30 = vmul.f32 %v3786_v29, %v7315_v39 }
 0x719   : > { %v5448_v7 = vpop.eup %5447  ;;  %v3662_v11 = vadd.f32 1.0, %v5446_v32  ;;  %v3474_v53 = vpop.f32.mrb[38].mxu1  ;;  %3881 = vxpose.xlu0.b32.cont [11/16] %v3849_v52, 128 }
 0x71a   : > { %v3755_v18 = vmul.f32 %v5448_v7, %v3435_v25  ;;  %5457 = vpow2.f32 %v4334_v35  ;;  %v3475_v51 = vadd.f32 %v3474_v53, %v7493_v23  ;;  %v7585_v9 = vpop.f32.mrb[39].mxu1  ;;  %v3850_v0 = vadd.f32 %v3818_v30, %v3754_v36 }
 0x71b   : > { %5459 = vrcp.f32 %v3662_v11  ;;  %v3787_v56 = vsub.f32 1.0, %v5448_v7  ;;  %v3477_v14 = vadd.f32 %v7585_v9, %v7508_v20 }
 0x71c   : > { %v5450_v4 = vpop.eup %5449  ;;  %v4335_v37 = vmul.f32 -1.442695, %v3475_v51 }
 0x71d   : > { %v5452_v28 = vpop.eup %5451  ;;  %v3663_v39 = vadd.f32 1.0, %v5450_v4  ;;  %v3480_v1 = vpop.f32.mrb[40].mxu1  ;;  %v3819_v27 = vmul.f32 %v3787_v56, %v7325_v44  ;;  %3882 = vxpose.xlu0.b32.cont [12/16] %v3850_v0, 128 }
 0x71e   : > { %v3756_v43 = vmul.f32 %v5452_v28, %v3441_v57  ;;  %5461 = vpow2.f32 %v4335_v37  ;;  %v3481_v19 = vadd.f32 %v3480_v1, %v7493_v23  ;;  %v7591_v26 = vpop.f32.mrb[41].mxu1  ;;  %v3788_v58 = vsub.f32 1.0, %v5452_v28 }
 0x71f   : > { %5463 = vrcp.f32 %v3663_v39  ;;  %v3851_v15 = vadd.f32 %v3819_v27, %v3755_v18  ;;  %v3483_v9 = vadd.f32 %v7591_v26, %v7508_v20 }
 0x720   : > { %v5454_v41 = vpop.eup %5453  ;;  %v4336_v3 = vmul.f32 -1.442695, %v3481_v19  ;;  %v3820_v40 = vmul.f32 %v3788_v58, %v7335_v63 }
 0x721   : > { %v5456_v54 = vpop.eup %5455  ;;  %v3664_v47 = vadd.f32 1.0, %v5454_v41  ;;  %v3486_v44 = vpop.f32.mrb[42].mxu1  ;;  %3883 = vxpose.xlu0.b32.cont [13/16] %v3851_v15, 128 }
 0x722   : > { %v3757_v46 = vmul.f32 %v5456_v54, %v3447_v16  ;;  %5465 = vpow2.f32 %v4336_v3  ;;  %v3487_v50 = vadd.f32 %v3486_v44, %v7493_v23  ;;  %v7597_v5 = vpop.f32.mrb[43].mxu1  ;;  %v3852_v36 = vadd.f32 %v3820_v40, %v3756_v43 }
 0x723   : > { %5467 = vrcp.f32 %v3664_v47  ;;  %v3789_v61 = vsub.f32 1.0, %v5456_v54  ;;  %v3489_v26 = vadd.f32 %v7597_v5, %v7508_v20 }
 0x724   : > { %v5458_v29 = vpop.eup %5457  ;;  %v4337_v52 = vmul.f32 -1.442695, %v3487_v50 }
 0x725   : > { %v5460_v32 = vpop.eup %5459  ;;  %v3665_v63 = vadd.f32 1.0, %v5458_v29  ;;  %v3492_v25 = vpop.f32.mrb[44].mxu1  ;;  %v3821_v35 = vmul.f32 %v3789_v61, %v7345_v48  ;;  %3884 = vxpose.xlu0.b32.cont [14/16] %v3852_v36, 128 }
 0x726   : > { %v3758_v30 = vmul.f32 %v5460_v32, %v3453_v55  ;;  %5469 = vpow2.f32 %v4337_v52  ;;  %v3493_v7 = vadd.f32 %v3492_v25, %v7493_v23  ;;  %v7603_v11 = vpop.f32.mrb[45].mxu1  ;;  %v3790_v53 = vsub.f32 1.0, %v5460_v32 }
 0x727   : > { %5471 = vrcp.f32 %v3665_v63  ;;  %v3853_v18 = vadd.f32 %v3821_v35, %v3757_v46  ;;  %v3495_v5 = vadd.f32 %v7603_v11, %v7508_v20 }
 0x728   : > { %v5462_v51 = vpop.eup %5461  ;;  %v4338_v0 = vmul.f32 -1.442695, %v3493_v7  ;;  %v3822_v56 = vmul.f32 %v3790_v53, %v7355_v21 }
 0x729   : > { %v5464_v4 = vpop.eup %5463  ;;  %v3666_v57 = vadd.f32 1.0, %v5462_v51  ;;  %v3498_v48 = vpop.f32.mrb[46].mxu1  ;;  %3885 = vxpose.xlu0.b32.cont [15/16] %v3853_v18, 128 }
 0x72a   : > { %5473 = vpow2.f32 %v4338_v0  ;;  %v3499_v37 = vadd.f32 %v3498_v48, %v7493_v23  ;;  %v7609_v28 = vpop.f32.mrb[47].mxu1  ;;  %v3854_v39 = vadd.f32 %v3822_v56, %v3758_v30  ;;  %v3759_v1 = vmul.f32 %v5464_v4, %v3459_v13 }
 0x72b   : > { %5475 = vrcp.f32 %v3666_v57  ;;  %v3791_v27 = vsub.f32 1.0, %v5464_v4  ;;  %v3501_v11 = vadd.f32 %v7609_v28, %v7508_v20 }
 0x72c   : > { %v5466_v43 = vpop.eup %5465  ;;  %v4339_v19 = vmul.f32 -1.442695, %v3499_v37 }
 0x72d   : > { %v5468_v58 = vpop.eup %5467  ;;  %v3667_v21 = vadd.f32 1.0, %v5466_v43  ;;  %v3504_v15 = vpop.f32.mrb[48].mxu1  ;;  %v3823_v41 = vmul.f32 %v3791_v27, %v7365_v17  ;;  %3886 = vxpose.xlu0.b32.end [16/16] %v3854_v39, 128 }
 0x72e   : > { %v3760_v16 = vmul.f32 %v5468_v58, %v3465_v2  ;;  %5477 = vpow2.f32 %v4339_v19  ;;  %v3505_v3 = vadd.f32 %v3504_v15, %v7493_v23  ;;  %v7615_v40 = vpop.f32.mrb[49].mxu1  ;;  %v3792_v54 = vsub.f32 1.0, %v5468_v58 }
 0x72f   : > { %5479 = vrcp.f32 %v3667_v21  ;;  %v3855_v47 = vadd.f32 %v3823_v41, %v3759_v1  ;;  %v3507_v28 = vadd.f32 %v7615_v40, %v7508_v20 }
 0x730   : > { %v5470_v44 = vpop.eup %5469  ;;  %v4340_v46 = vmul.f32 -1.442695, %v3505_v3  ;;  %v3824_v50 = vmul.f32 %v3792_v54, %v7375_v33 }
 0x731   : > { %v5472_v36 = vpop.eup %5471  ;;  %v3668_v61 = vadd.f32 1.0, %v5470_v44  ;;  %3919 = vxpose.xlu1.b32.start [1/16] %v3855_v47, 128  ;;  %v3510_v17 = vpop.f32.mrb[50].mxu1 }
 0x732   : > { %v3761_v29 = vmul.f32 %v5472_v36, %v3471_v24  ;;  %5481 = vpow2.f32 %v4340_v46  ;;  %v3511_v55 = vadd.f32 %v3510_v17, %v7493_v23  ;;  %v7621_v52 = vpop.f32.mrb[51].mxu1  ;;  %v3856_v32 = vadd.f32 %v3824_v50, %v3760_v16 }
 0x733   : > { %5483 = vrcp.f32 %v3668_v61  ;;  %v3793_v63 = vsub.f32 1.0, %v5472_v36 }
 0x734   : > { %v5474_v25 = vpop.eup %5473  ;;  %v4341_v35 = vmul.f32 -1.442695, %v3511_v55 }
 0x735   : > { %v5476_v30 = vpop.eup %5475  ;;  %v3669_v33 = vadd.f32 1.0, %v5474_v25  ;;  %3920 = vxpose.xlu1.b32.cont [2/16] %v3856_v32, 128  ;;  %v3516_v7 = vpop.f32.mrb[52].mxu1  ;;  %v3825_v53 = vmul.f32 %v3793_v63, %v7385_v38 }
 0x736   : > { %v3762_v18 = vmul.f32 %v5476_v30, %v3477_v14  ;;  %5485 = vpow2.f32 %v4341_v35  ;;  %v3517_v51 = vadd.f32 %v3516_v7, %v7493_v23  ;;  %v7627_v13 = vpop.f32.mrb[53].mxu1  ;;  %v3794_v0 = vsub.f32 1.0, %v5476_v30 }
 0x737   : > { %5487 = vrcp.f32 %v3669_v33  ;;  %v3857_v56 = vadd.f32 %v3825_v53, %v3761_v29 }
 0x738   : > { %v5478_v4 = vpop.eup %5477  ;;  %v4342_v57 = vmul.f32 -1.442695, %v3517_v51  ;;  %v3826_v48 = vmul.f32 %v3794_v0, %v7395_v42 }
 0x739   : > { %v5480_v37 = vpop.eup %5479  ;;  %v3670_v39 = vadd.f32 1.0, %v5478_v4  ;;  %3921 = vxpose.xlu1.b32.cont [3/16] %v3857_v56, 128  ;;  %v3522_v38 = vpop.f32.mrb[54].mxu1 }
 0x73a   : > { %v3763_v1 = vmul.f32 %v5480_v37, %v3483_v9  ;;  %5489 = vpow2.f32 %v4342_v57  ;;  %v3523_v27 = vadd.f32 %v3522_v38, %v7493_v23  ;;  %v7633_v43 = vpop.f32.mrb[55].mxu1  ;;  %v3858_v2 = vadd.f32 %v3826_v48, %v3762_v18 }
 0x73b   : > { %5491 = vrcp.f32 %v3670_v39  ;;  %v3795_v19 = vsub.f32 1.0, %v5480_v37 }
 0x73c   : > { %v5482_v58 = vpop.eup %5481  ;;  %v4343_v21 = vmul.f32 -1.442695, %v3523_v27 }
 0x73d   : > { %v5484_v15 = vpop.eup %5483  ;;  %v3671_v42 = vadd.f32 1.0, %v5482_v58  ;;  %3922 = vxpose.xlu1.b32.cont [4/16] %v3858_v2, 128  ;;  %v3528_v41 = vpop.f32.mrb[56].mxu1  ;;  %v3827_v16 = vmul.f32 %v3795_v19, %v7405_v49  ;;  %v3513_v58 = vadd.f32 %v7621_v52, %v7508_v20 }
 0x73e   : > { %v3764_v3 = vmul.f32 %v5484_v15, %v3489_v26  ;;  %5493 = vpow2.f32 %v4343_v21  ;;  %v3529_v54 = vadd.f32 %v3528_v41, %v7493_v23  ;;  %v7639_v47 = vpop.f32.mrb[57].mxu1  ;;  %v3796_v44 = vsub.f32 1.0, %v5484_v15 }
 0x73f   : > { %5495 = vrcp.f32 %v3671_v42  ;;  %v3859_v24 = vadd.f32 %v3827_v16, %v3763_v1  ;;  %v3519_v16 = vadd.f32 %v7627_v13, %v7508_v20 }
 0x740   : > { %v5486_v46 = vpop.eup %5485  ;;  %v4344_v50 = vmul.f32 -1.442695, %v3529_v54  ;;  %v3828_v36 = vmul.f32 %v3796_v44, %v7415_v6 }
 0x741   : > { %v5488_v61 = vpop.eup %5487  ;;  %v3672_v17 = vadd.f32 1.0, %v5486_v46  ;;  %3923 = vxpose.xlu1.b32.cont [5/16] %v3859_v24, 128  ;;  %v3534_v49 = vpop.f32.mrb[58].mxu1 }
 0x742   : > { %v3765_v29 = vmul.f32 %v5488_v61, %v3495_v5  ;;  %5497 = vpow2.f32 %v4344_v50  ;;  %v3535_v55 = vadd.f32 %v3534_v49, %v7493_v23  ;;  %v7645_v32 = vpop.f32.mrb[59].mxu1  ;;  %v3860_v63 = vadd.f32 %v3828_v36, %v3764_v3 }
 0x743   : > { %5499 = vrcp.f32 %v3672_v17  ;;  %v3797_v25 = vsub.f32 1.0, %v5488_v61 }
 0x744   : > { %v5490_v14 = vpop.eup %5489  ;;  %v4345_v35 = vmul.f32 -1.442695, %v3535_v55 }
 0x745   : > { %v5492_v30 = vpop.eup %5491  ;;  %v3673_v6 = vadd.f32 1.0, %v5490_v14  ;;  %3924 = vxpose.xlu1.b32.cont [6/16] %v3860_v63, 128  ;;  %v3540_v33 = vpop.f32.mrb[60].mxu1  ;;  %v3829_v7 = vmul.f32 %v3797_v25, %v7425_v34 }
 0x746   : > { %v3766_v53 = vmul.f32 %v5492_v30, %v3501_v11  ;;  %5501 = vpow2.f32 %v4345_v35  ;;  %v3541_v18 = vadd.f32 %v3540_v33, %v7493_v23  ;;  %v7651_v51 = vpop.f32.mrb[61].mxu1  ;;  %v3798_v0 = vsub.f32 1.0, %v5492_v30 }
 0x747   : > { %5503 = vrcp.f32 %v3673_v6  ;;  %v3861_v56 = vadd.f32 %v3829_v7, %v3765_v29  ;;  %v3531_v29 = vadd.f32 %v7639_v47, %v7508_v20 }
 0x748   : > { %v5494_v4 = vpop.eup %5493  ;;  %v4346_v9 = vmul.f32 -1.442695, %v3541_v18  ;;  %v3830_v57 = vmul.f32 %v3798_v0, %v7435_v62 }
 0x749   : > { %v5496_v48 = vpop.eup %5495  ;;  %v3674_v37 = vadd.f32 1.0, %v5494_v4  ;;  %3925 = vxpose.xlu1.b32.cont [7/16] %v3861_v56, 128  ;;  %v3546_v34 = vpop.f32.mrb[62].mxu1 }
 0x74a   : > { %v3767_v39 = vmul.f32 %v5496_v48, %v3507_v28  ;;  %5505 = vpow2.f32 %v4346_v9  ;;  %v3547_v38 = vadd.f32 %v3546_v34, %v7493_v23  ;;  %v3548_v1 = vpop.f32.mrb[63].mxu1  ;;  %v3862_v27 = vadd.f32 %v3830_v57, %v3766_v53 }
 0x74b   : > { %5507 = vrcp.f32 %v3674_v37  ;;  %v3799_v2 = vsub.f32 1.0, %v5496_v48  ;;  %v3549_v4 = vadd.f32 %v3548_v1, %v7508_v20 }
 0x74c   : > { %v5498_v19 = vpop.eup %5497  ;;  %v4347_v40 = vmul.f32 -1.442695, %v3547_v38 }
 0x74d   : > { %v5500_v26 = vpop.eup %5499  ;;  %v3675_v21 = vadd.f32 1.0, %v5498_v19  ;;  %3926 = vxpose.xlu1.b32.cont [8/16] %v3862_v27, 128  ;;  %v3831_v62 = vmul.f32 %v3799_v2, %v7442_v45  ;;  %v3525_v45 = vadd.f32 %v7633_v43, %v7508_v20 }
 0x74e   : > { %v3768_v15 = vmul.f32 %v5500_v26, %v3513_v58  ;;  %5509 = vpow2.f32 %v4347_v40  ;;  %v3800_v42 = vsub.f32 1.0, %v5500_v26 }
 0x74f   : > { %5511 = vrcp.f32 %v3675_v21  ;;  %v3863_v41 = vadd.f32 %v3831_v62, %v3767_v39 }
 0x750   : > { %v5502_v23 = vpop.eup %5501  ;;  %v3832_v3 = vmul.f32 %v3800_v42, %v7449_v31 }
 0x751   : > { %v5504_v54 = vpop.eup %5503  ;;  %v3676_v44 = vadd.f32 1.0, %v5502_v23  ;;  %3927 = vxpose.xlu1.b32.cont [9/16] %v3863_v41, 128 }
 0x752   : > { %v3769_v52 = vmul.f32 %v5504_v54, %v3519_v16  ;;  %v3864_v24 = vadd.f32 %v3832_v3, %v3768_v15  ;;  %v3801_v46 = vsub.f32 1.0, %v5504_v54 }
 0x753   : > { %5513 = vrcp.f32 %v3676_v44 }
 0x754   : > { %v5506_v5 = vpop.eup %5505  ;;  %v3833_v50 = vmul.f32 %v3801_v46, %v7456_v8  ;;  %v3537_v8 = vadd.f32 %v7645_v32, %v7508_v20 }
 0x755   : > { %v5508_v36 = vpop.eup %5507  ;;  %v3677_v61 = vadd.f32 1.0, %v5506_v5  ;;  %3928 = vxpose.xlu1.b32.cont [10/16] %v3864_v24, 128 }
 0x756   : > { %v3770_v17 = vmul.f32 %v5508_v36, %v3525_v45  ;;  %v3865_v13 = vadd.f32 %v3833_v50, %v3769_v52  ;;  %v3802_v49 = vsub.f32 1.0, %v5508_v36 }
 0x757   : > { %5515 = vrcp.f32 %v3677_v61 }
 0x758   : > { %v5510_v31 = vpop.eup %5509  ;;  %v3834_v55 = vmul.f32 %v3802_v49, %v7463_v59  ;;  %v3543_v59 = vadd.f32 %v7651_v51, %v7508_v20 }
 0x759   : > { %v5512_v63 = vpop.eup %5511  ;;  %v3678_v25 = vadd.f32 1.0, %v5510_v31  ;;  %3929 = vxpose.xlu1.b32.cont [11/16] %v3865_v13, 128 }
 0x75a   : > { %v3771_v14 = vmul.f32 %v5512_v63, %v3531_v29  ;;  %v3866_v43 = vadd.f32 %v3834_v55, %v3770_v17  ;;  %v3803_v11 = vsub.f32 1.0, %v5512_v63 }
 0x75b   : > { %5517 = vrcp.f32 %v3678_v25 }
 0x75c   : > { %v3835_v35 = vmul.f32 %v3803_v11, %v7470_v12 }
 0x75d   : > { %v5514_v30 = vpop.eup %5513  ;;  %3930 = vxpose.xlu1.b32.cont [12/16] %v3866_v43, 128 }
 0x75e   : > { %v3772_v6 = vmul.f32 %v5514_v30, %v3537_v8  ;;  %v3867_v33 = vadd.f32 %v3835_v35, %v3771_v14  ;;  %v3804_v7 = vsub.f32 1.0, %v5514_v30 }
 0x760   : > { %v3836_v47 = vmul.f32 %v3804_v7, %v7477_v10 }
 0x761   : > { %v5516_v53 = vpop.eup %5515  ;;  %3931 = vxpose.xlu1.b32.cont [13/16] %v3867_v33, 128 }
 0x762   : > { %v3773_v18 = vmul.f32 %v5516_v53, %v3543_v59  ;;  %v3868_v0 = vadd.f32 %v3836_v47, %v3772_v6  ;;  %v3805_v56 = vsub.f32 1.0, %v5516_v53 }
 0x764   : > { %v3837_v32 = vmul.f32 %v3805_v56, %v7484_v60 }
 0x765   : > { %v5518_v12 = vpop.eup %5517  ;;  %3932 = vxpose.xlu1.b32.cont [14/16] %v3868_v0, 128 }
 0x766   : > { %v3774_v28 = vmul.f32 %v5518_v12, %v3549_v4  ;;  %v3869_v9 = vadd.f32 %v3837_v32, %v3773_v18  ;;  %v3806_v57 = vsub.f32 1.0, %v5518_v12 }
 0x768   : > { %v3838_v48 = vmul.f32 %v3806_v57, %v7489_v22 }
 0x769   : > { %3933 = vxpose.xlu1.b32.cont [15/16] %v3869_v9, 128 }
 0x76a   : > { %v3870_v51 = vadd.f32 %v3838_v48, %v3774_v28 }
 0x76d   : > { %3934 = vxpose.xlu1.b32.end [16/16] %v3870_v51, 128 }
 0x771   : > { %v3887_v10 = vpop.trf.xlu0 }
 0x772   : > { %3903 = vst [vmem:[#allocation17] sm:$0xff] %v3887_v10 }
 0x775   : > { %v3888_v37 = vpop.trf.xlu0 }
 0x776   : > { %3904 = vst [vmem:[#allocation17 + $0x8] sm:$0xff] %v3888_v37 }
 0x779   : > { %v3889_v34 = vpop.trf.xlu0 }
 0x77a   : > { %3905 = vst [vmem:[#allocation17 + $0x10] sm:$0xff] %v3889_v34 }
 0x77d   : > { %v3890_v39 = vpop.trf.xlu0 }
 0x77e   : > { %3906 = vst [vmem:[#allocation17 + $0x18] sm:$0xff] %v3890_v39 }
 0x781   : > { %v3891_v20 = vpop.trf.xlu0 }
 0x782   : > { %3907 = vst [vmem:[#allocation17 + $0x20] sm:$0xff] %v3891_v20 }
 0x785   : > { %v3892_v60 = vpop.trf.xlu0 }
 0x786   : > { %3908 = vst [vmem:[#allocation17 + $0x28] sm:$0xff] %v3892_v60 }
 0x789   : > { %v3893_v38 = vpop.trf.xlu0 }
 0x78a   : > { %3909 = vst [vmem:[#allocation17 + $0x30] sm:$0xff] %v3893_v38 }
 0x78d   : > { %v3894_v1 = vpop.trf.xlu0 }
 0x78e   : > { %3910 = vst [vmem:[#allocation17 + $0x38] sm:$0xff] %v3894_v1 }
 0x791   : > { %v3895_v22 = vpop.trf.xlu0 }
 0x792   : > { %3911 = vst [vmem:[#allocation18] sm:$0xff] %v3895_v22 }
 0x795   : > { %v3896_v27 = vpop.trf.xlu0 }
 0x796   : > { %3912 = vst [vmem:[#allocation18 + $0x8] sm:$0xff] %v3896_v27 }
 0x799   : > { %v3897_v2 = vpop.trf.xlu0 }
 0x79a   : > { %3913 = vst [vmem:[#allocation18 + $0x10] sm:$0xff] %v3897_v2 }
 0x79d   : > { %v3898_v19 = vpop.trf.xlu0 }
 0x79e   : > { %3914 = vst [vmem:[#allocation18 + $0x18] sm:$0xff] %v3898_v19 }
 0x7a1   : > { %v3899_v58 = vpop.trf.xlu0 }
 0x7a2   : > { %3915 = vst [vmem:[#allocation18 + $0x20] sm:$0xff] %v3899_v58 }
 0x7a5   : > { %v3900_v40 = vpop.trf.xlu0 }
 0x7a6   : > { %3916 = vst [vmem:[#allocation18 + $0x28] sm:$0xff] %v3900_v40 }
 0x7a9   : > { %v3901_v26 = vpop.trf.xlu0 }
 0x7aa   : > { %3917 = vst [vmem:[#allocation18 + $0x30] sm:$0xff] %v3901_v26 }
 0x7ad   : > { %v3902_v21 = vpop.trf.xlu0 }
 0x7ae   : > { %3918 = vst [vmem:[#allocation18 + $0x38] sm:$0xff] %v3902_v21 }
 0x7b1   : > { %v3935_v62 = vpop.trf.xlu1 }
 0x7b2   : > { %3952 = vst [vmem:[#allocation17 + $0x40] sm:$0xff] %v3935_v62 }
 0x7b5   : > { %v3936_v15 = vpop.trf.xlu1 }
 0x7b6   : > { %3953 = vst [vmem:[#allocation17 + $0x48] sm:$0xff] %v3936_v15 }
 0x7b9   : > { %v3937_v42 = vpop.trf.xlu1 }
 0x7ba   : > { %3954 = vst [vmem:[#allocation17 + $0x50] sm:$0xff] %v3937_v42 }
 0x7bd   : > { %v3938_v41 = vpop.trf.xlu1 }
 0x7be   : > { %3955 = vst [vmem:[#allocation17 + $0x58] sm:$0xff] %v3938_v41 }
 0x7c1   : > { %v3939_v23 = vpop.trf.xlu1 }
 0x7c2   : > { %3956 = vst [vmem:[#allocation17 + $0x60] sm:$0xff] %v3939_v23 }
 0x7c5   : > { %v3940_v16 = vpop.trf.xlu1 }
 0x7c6   : > { %3957 = vst [vmem:[#allocation17 + $0x68] sm:$0xff] %v3940_v16 }
 0x7c9   : > { %v3941_v3 = vpop.trf.xlu1 }
 0x7ca   : > { %3958 = vst [vmem:[#allocation17 + $0x70] sm:$0xff] %v3941_v3 }
 0x7cd   : > { %v3942_v54 = vpop.trf.xlu1 }
 0x7ce   : > { %3959 = vst [vmem:[#allocation17 + $0x78] sm:$0xff] %v3942_v54 }
 0x7d1   : > { %v3943_v44 = vpop.trf.xlu1 }
 0x7d2   : > { %3961 = vst [vmem:[#allocation18 + $0x40] sm:$0xff] %v3943_v44 }
 0x7d5   : > { %v3944_v52 = vpop.trf.xlu1 }
 0x7d6   : > { %3962 = vst [vmem:[#allocation18 + $0x48] sm:$0xff] %v3944_v52 }
 0x7d9   : > { %v3945_v24 = vpop.trf.xlu1 }
 0x7da   : > { %3963 = vst [vmem:[#allocation18 + $0x50] sm:$0xff] %v3945_v24 }
 0x7dd   : > { %v3946_v46 = vpop.trf.xlu1 }
 0x7de   : > { %3964 = vst [vmem:[#allocation18 + $0x58] sm:$0xff] %v3946_v46 }
 0x7e1   : > { %v3947_v5 = vpop.trf.xlu1 }
 0x7e2   : > { %3965 = vst [vmem:[#allocation18 + $0x60] sm:$0xff] %v3947_v5 }
 0x7e5   : > { %v3948_v45 = vpop.trf.xlu1 }
 0x7e6   : > { %3966 = vst [vmem:[#allocation18 + $0x68] sm:$0xff] %v3948_v45 }
 0x7e9   : > { %v3949_v50 = vpop.trf.xlu1 }
 0x7ea   : > { %3967 = vst [vmem:[#allocation18 + $0x70] sm:$0xff] %v3949_v50 }
 0x7ed   : > { %v3950_v36 = vpop.trf.xlu1 }
 0x7ee   : > { %3968 = vst [vmem:[#allocation18 + $0x78] sm:$0xff] %v3950_v36 }
 0x7ef PF: > { %p5057_p4 = scmp.eq.s32.totalorder %s5990_s13, 9  ;;  %s5893_s5 = smov [#allocation17]  }
 0x7f0   : > { %s3975_s21 = sshll.u32 %s5893_s5, 4  ;;  %s3976_s21 = int_to_ptr.vmem [resolvable:$true] %s3975_s21 }
 0x7f1   : > { %s5757_s18 = scalar_lea.vmem %s3976_s21, 2048  ;;  %p5764_p1 = scmp.lt.s32.totalorder %s3976_s21, %s3976_s21 }
 0x7f2   : > { %p5758_p8 = scmp.ne.s32.totalorder %s3976_s21, %s5757_s18  ;;  %p5765_p7 = scmp.lt.s32.totalorder %s5757_s18, %s5757_s18 }
 0x7f4   : > { %p5759_p12 = pnand %p5758_p8, %p5057_p4  ;;  %p5766_p6 = por %p5765_p7, %p5764_p1 }
 0x7f6   : > { %p5760_p13 = pneg %p5759_p12 }
 0x7f8   : > { %p5767_p2 = pnand %p5766_p6, %p5760_p13 }
 0x7fa   : > { %5770 = shalt.err (!%p5767_p2)
}
 0x7fb   : > { %s7795_s23 = sld [smem:[#allocation34_spill]] }
 0x801   : > { %s5771_s19 = scalar_lea.hbm %s7795_s23, 2048 }
 0x802   : > { %p5772_p3 = scmp.ne.s32.totalorder %s7795_s23, %s5771_s19  ;;  %p5777_p0 = scmp.lt.u32.totalorder %s5771_s19, %s7795_s23 }
 0x804   : > { %p5773_p11 = pnand %p5772_p3, %p5057_p4 }
 0x806   : > { %p5774_p10 = pneg %p5773_p11 }
 0x808   : > { %p5779_p5 = pnand %p5777_p0, %p5774_p10 }
 0x80a   : > { %5782 = shalt.err (!%p5779_p5)
}
 0x80b   : > { %s5894_s26 = smov 128   ;;  %s5895_s25 = smov 8  }
 0x80c   : > { %5011 = dma.vmem_to_hbm [thread:$0]  (%p5057_p4), %s3976_s21, 2048, %s7795_s23, [#allocation7], %s5894_s26, %s5894_s26, %s5895_s25  }
 0x80d   : > { %s5896_s20 = smov [#allocation18]  }
 0x80e   : > { %s3988_s0 = sshll.u32 %s5896_s20, 4  ;;  %s3989_s0 = int_to_ptr.vmem [resolvable:$true] %s3988_s0 }
 0x80f   : > { %s5783_s17 = scalar_lea.vmem %s3989_s0, 2048  ;;  %p5790_p13 = scmp.lt.s32.totalorder %s3989_s0, %s3989_s0 }
 0x810   : > { %p5784_p9 = scmp.ne.s32.totalorder %s3989_s0, %s5783_s17  ;;  %p5791_p1 = scmp.lt.s32.totalorder %s5783_s17, %s5783_s17 }
 0x812   : > { %p5785_p8 = pnand %p5784_p9, %p5057_p4  ;;  %p5792_p7 = por %p5791_p1, %p5790_p13 }
 0x814   : > { %p5786_p12 = pneg %p5785_p8 }
 0x816   : > { %p5793_p6 = pnand %p5792_p7, %p5786_p12 }
 0x818   : > { %5796 = shalt.err (!%p5793_p6)
}
 0x819   : > { %s7796_s2 = sld [smem:[#allocation35_spill]] }
 0x81f   : > { %s5797_s4 = scalar_lea.hbm %s7796_s2, 2048 }
 0x820   : > { %p5798_p2 = scmp.ne.s32.totalorder %s7796_s2, %s5797_s4  ;;  %p5803_p10 = scmp.lt.u32.totalorder %s5797_s4, %s7796_s2 }
 0x822   : > { %p5799_p3 = pnand %p5798_p2, %p5057_p4 }
 0x824   : > { %p5800_p11 = pneg %p5799_p3 }
 0x826   : > { %p5805_p0 = pnand %p5803_p10, %p5800_p11 }
 0x828   : > { %5808 = shalt.err (!%p5805_p0)
}
 0x829   : > { %5013 = dma.vmem_to_hbm [thread:$0]  (%p5057_p4), %s3989_s0, 2048, %s7796_s2, [#allocation19], %s5894_s26, %s5894_s26, %s5895_s25  }
 0x82a   : > { %5852 = dma.done.wait (%p5057_p4), [#allocation7], 2048  }
 0x82b   : > { %5854 = vsyncadd (%p5057_p4), [#allocation7], 4294965248 }
 0x82c   : > { %5856 = dma.done.wait (%p5057_p4), [#allocation19], 2048  }
 0x82d   : > { %5858 = vsyncadd (%p5057_p4), [#allocation19], 4294965248 }
 0x82e PF: > { %p28_p5 = scmp.ge.s32.totalorder %s6115_s10, 12   ;;  %s7797_s27 = smov %s5865_s28 }
 0x82f   : > { %s7798_s28 = smov %s5869_s29  ;;  %s7799_s29 = smov %s6126_s24 }
 0x830   : > { %s7800_s30 = smov %s6115_s10  ;;  %30 = sbr.rel (!%p28_p5) target bundleno = 20 (0x14), region = 151 }
 0x837   :  { %4008 = vsyncpa [#allocation6], 1 }
 0x838   :  { %4010 = vsyncpa [#allocation6 + $0x1], 1 }
 0x839   :  { %4011 = vsyncpa [#allocation9], 1 }
 0x83a   :  { %4012 = vsyncpa [#allocation12], 1 }
 0x83b   :  { %4013 = vsyncpa [#allocation7], 1 }
 0x83c   :  { %4015 = vsyncpa [#allocation7 + $0x1], 1 }
 0x83d   :  { %4016 = vsyncpa [#allocation19], 1 }

</bundles_post_ra>
